<compile_context>
chip_gen: v5e
topology: v5e:2x2
jax: 0.10.0
libtpu: 0.0.40
codegen_flags: <defaults>
</compile_context>

<pallas_src>
import functools

import jax
import jax.numpy as jnp
from jax.experimental import pallas as pl
from jax.experimental.pallas import tpu as pltpu


# --------------------------------- kernel -----------------------------------
def _residual_block(h, masks, wcat_ref, b_ref, scale_ref, shift_ref, br_ref):
    """out = relu(bn(conv_K(h))) + conv_1x1(h)   (channels-last, f32 result).

    h: (M, Cin) activation, M = Bt * Lp (batch tile flattened into the matmul
    M dimension).  wcat_ref packs [w_tap0 | ... | w_tap{K-1} | w_res] along the
    output-column axis, so ALL taps plus the 1x1 residual are ONE MXU matmul.
    """
    M = h.shape[0]
    Cout = b_ref.shape[-1]
    K = wcat_ref.shape[1] // Cout - 1
    P = K // 2
    h_mx = h.astype(wcat_ref.dtype)            # bf16 operands for the MXU

    # Single wide matmul: (M, Cin) @ (Cin, (K+1)*Cout), f32 accumulation.
    y_all = jnp.dot(h_mx, wcat_ref[...], preferred_element_type=jnp.float32)

    # Per-tap time alignment AFTER the matmul: pltpu.roll (XLU slot) + a
    # precomputed (M, 1) float mask (VPU) reproduce Conv1d zero padding
    # exactly, including cross-batch wraparound of the flattened roll.
    # Column slice offsets are 128-aligned (Cout in {128, 256}).
    acc = jnp.zeros((M, Cout), jnp.float32)
    for k in range(K):                         # K in {3, 5, 7}: small & static
        yk = y_all[:, k * Cout:(k + 1) * Cout]
        d = P - k                              # static shift for this tap
        if d == 0:
            acc = acc + yk
        else:
            rolled = pltpu.roll(yk, shift=d % M, axis=0)
            acc = acc + rolled * masks[d]

    y = acc + b_ref[...]                       # conv bias            (f32)
    y = y * scale_ref[...] + shift_ref[...]    # folded BatchNorm     (f32)
    y = jnp.maximum(y, 0.0)                    # ReLU

    res = y_all[:, K * Cout:(K + 1) * Cout] + br_ref[...]   # 1x1 residual
    return y + res


def _msconv_kernel(x_ref,
                   w1, b1, s1, t1, r1,
                   w2, b2, s2, t2, r2,
                   w3, b3, s3, t3, r3,
                   o_ref, *, l_valid):
    Bt, Lp, Cin = x_ref.shape
    M = Bt * Lp

    # Within-batch sequence position of each flattened row, computed ONCE per
    # grid step at (M, 1).  The padding / batch-boundary masks for every shift
    # |d| <= 3 are shared by all three blocks and broadcast over Cout.
    pos = jax.lax.broadcasted_iota(jnp.int32, (Bt, Lp, 1), 1).reshape(M, 1)
    masks = {
        d: jnp.logical_and(pos >= d, pos < l_valid + d).astype(jnp.float32)
        for d in (-3, -2, -1, 1, 2, 3)
    }

    h = x_ref[...].reshape(M, Cin)             # bf16, fed straight to the MXU
    h = _residual_block(h, masks, w1, b1, s1, t1, r1)
    h = _residual_block(h, masks, w2, b2, s2, t2, r2)
    h = _residual_block(h, masks, w3, b3, s3, t3, r3)

    Cout = o_ref.shape[2]
    o_ref[...] = h.reshape(Bt, Lp, Cout).astype(o_ref.dtype)


# --------------------------- parameters / wrapper ----------------------------
def fold_bn(gamma, beta, mean, var, eps=1e-5):
    scale = gamma / jnp.sqrt(var + eps)
    shift = beta - mean * scale
    return scale, shift


def prepare_params(params, compute_dtype=jnp.bfloat16, eps=1e-5):
    """One-time weight packing, BN folding and MXU-dtype casts.

    The K conv taps and the 1x1 residual are concatenated along the output
    column axis into one (Cin, (K+1)*Cout) RHS so each block needs a single
    MXU matmul (and the Cout=128 block uses the full 256-wide MXU).
    """
    out = []
    for blk in params:
        w = jnp.transpose(blk["w"], (2, 1, 0))                # (K, Cin, Cout)
        K, Cin, Cout = w.shape
        wr = jnp.transpose(blk["wr"][:, :, 0])                # (Cin, Cout)
        wcat = jnp.concatenate(list(w) + [wr], axis=1).astype(compute_dtype)
        scale, shift = fold_bn(blk["gamma"], blk["beta"], blk["mean"],
                               blk["var"], eps)
        out.append({
            "wcat": wcat,                                     # (Cin,(K+1)*Cout)
            "b": blk["b"].astype(jnp.float32).reshape(1, Cout),
            "scale": scale.astype(jnp.float32).reshape(1, Cout),
            "shift": shift.astype(jnp.float32).reshape(1, Cout),
            "br": blk["br"].astype(jnp.float32).reshape(1, Cout),
        })
    return out


def _num_tensorcores_per_chip():
    """Best-effort: 2 TensorCores per chip on v4/v5p (megacore) and v7x,
    1 on v5e/v6e.  Defaults to 1 (harmless: just picks the biggest tile)."""
    try:
        kind = jax.devices()[0].device_kind.lower()
    except Exception:
        return 1
    if "lite" in kind or "v5e" in kind or "v6e" in kind:
        return 1
    if "v7" in kind or "v5p" in kind or "v4" in kind:
        return 2
    return 1


def _pick_batch_tile(B, L, num_cores, target_m):
    """Largest divisor Bt of B with Bt*L <= target_m.  On multi-TensorCore
    chips, prefer an even number of grid steps >= 2 so both cores get equal
    work; on single-TC chips the grid is a serial loop, so just maximize M."""
    divs = [bt for bt in range(1, B + 1) if B % bt == 0]
    fits = [bt for bt in divs if bt == 1 or bt * L <= target_m]
    if num_cores > 1 and B >= 2:
        even = [bt for bt in fits if (B // bt) >= 2 and (B // bt) % 2 == 0]
        if even:
            return max(even)
    return max(fits)


def _vmem_limit_bytes(M, Cin, blocks, out_itemsize):
    """Rough upper bound on the kernel's VMEM footprint.  Returns None when
    the default 32 MiB scoped budget is clearly enough (the common case)."""
    couts = [int(b["b"].shape[-1]) for b in blocks]
    wide = [int(b["wcat"].shape[1]) for b in blocks]
    weights = 2 * sum(int(b["wcat"].size) * 2 + 4 * 4 * c
                      for b, c in zip(blocks, couts))          # double-buffered
    io = 2 * M * Cin * 2 + 2 * M * couts[-1] * out_itemsize    # double-buffered
    inter = M * 4 * (max(wide) + 4 * max(couts))               # y_all + temps
    est = weights + io + inter
    if est <= 24 * 1024 * 1024:
        return None
    return min(112 * 1024 * 1024, 2 * est)


def mult_scale_conv1d(x, blocks, *, batch_tile=None, target_m=None):
    """Fused forward pass.  x: (B, L, C_in)  ->  (B, C_out, L)."""
    B, L, Cin = x.shape
    Cout = blocks[-1]["b"].shape[-1]

    # Pad L to a multiple of 8 so the (Bt, Lp, C) <-> (Bt*Lp, C) reshapes in
    # the kernel never cross sublane tile boundaries.  The in-kernel masks use
    # the ORIGINAL L, so Conv1d zero-padding semantics are unchanged and the
    # garbage padded rows are sliced off below.
    Lp = -(-L // 8) * 8
    xb = x.astype(jnp.bfloat16)                 # bf16 input: half HBM traffic
    if Lp != L:
        xb = jnp.pad(xb, ((0, 0), (0, Lp - L), (0, 0)))

    num_cores = _num_tensorcores_per_chip()
    if target_m is None:
        target_m = 512 if num_cores > 1 else 1024   # v7x has tighter VMEM
    if batch_tile is None:
        batch_tile = _pick_batch_tile(B, Lp, num_cores, target_m)
    # TODO(synk): remainder batch tiles are not handled (divisor tiles only).
    assert B % batch_tile == 0, (B, batch_tile)
    grid = (B // batch_tile,)

    in_specs = [pl.BlockSpec((batch_tile, Lp, Cin), lambda i: (i, 0, 0))]
    args = [xb]
    for blk in blocks:
        for name in ("wcat", "b", "scale", "shift", "br"):
            a = blk[name]
            # Constant index_map -> fetched once, resident in VMEM.
            in_specs.append(pl.BlockSpec(a.shape, lambda i, nd=a.ndim: (0,) * nd))
            args.append(a)

    vmem_limit = _vmem_limit_bytes(batch_tile * Lp, Cin, blocks,
                                   jnp.dtype(x.dtype).itemsize)

    out = pl.pallas_call(
        functools.partial(_msconv_kernel, l_valid=L),
        out_shape=jax.ShapeDtypeStruct((B, Lp, Cout), x.dtype),
        grid=grid,
        in_specs=in_specs,
        out_specs=pl.BlockSpec((batch_tile, Lp, Cout), lambda i: (i, 0, 0)),
        compiler_params=pltpu.CompilerParams(
            dimension_semantics=("parallel",),
            vmem_limit_bytes=vmem_limit),
    )(*args)

    if Lp != L:
        out = out[:, :L, :]
    # Lane-dense (Cout-last) kernel output; transpose to torch NCL layout in
    # XLA.  If the consumer accepts channels-last (B, L, C_out), drop this.
    return jnp.transpose(out, (0, 2, 1))        # (B, C_out, L)


# --------------------------- pure-JAX reference ------------------------------
def mult_scale_conv1d_ref(x, params, compute_dtype=jnp.float32, eps=1e-5):
    """Reference in torch NCL layout.

    compute_dtype=float32  -> exact module semantics (eval mode).
    compute_dtype=bfloat16 -> same MXU-operand rounding as the kernel
                              (f32 accumulation), for a tight comparison.
    """
    h = jnp.transpose(x, (0, 2, 1))             # (B, C, L)
    for blk in params:
        scale, shift = fold_bn(blk["gamma"], blk["beta"], blk["mean"],
                               blk["var"], eps)
        P = blk["w"].shape[-1] // 2
        hc = h.astype(compute_dtype)
        y = jax.lax.conv_general_dilated(
            hc, blk["w"].astype(compute_dtype), (1,), [(P, P)],
            dimension_numbers=("NCH", "OIH", "NCH"),
            preferred_element_type=jnp.float32)
        y = y + blk["b"][None, :, None]
        y = y * scale[None, :, None] + shift[None, :, None]
        y = jnp.maximum(y, 0.0)
        r = jax.lax.conv_general_dilated(
            hc, blk["wr"].astype(compute_dtype), (1,), [(0, 0)],
            dimension_numbers=("NCH", "OIH", "NCH"),
            preferred_element_type=jnp.float32)
        r = r + blk["br"][None, :, None]
        h = y + r
    return h


# ----------------------------------- setup -----------------------------------
def _make_block_params(key, cin, cout, ksize):
    ks = jax.random.split(key, 8)
    fan = cin * ksize
    return {
        "w": jax.random.normal(ks[0], (cout, cin, ksize), jnp.float32) / jnp.sqrt(fan),
        "b": jax.random.normal(ks[1], (cout,), jnp.float32) * 0.05,
        "gamma": 0.5 + jax.random.uniform(ks[2], (cout,), jnp.float32),
        "beta": jax.random.normal(ks[3], (cout,), jnp.float32) * 0.1,
        "mean": jax.random.normal(ks[4], (cout,), jnp.float32) * 0.1,
        "var": 0.5 + jax.random.uniform(ks[5], (cout,), jnp.float32),
        "wr": jax.random.normal(ks[6], (cout, cin, 1), jnp.float32) / jnp.sqrt(cin),
        "br": jax.random.normal(ks[7], (cout,), jnp.float32) * 0.05,
    }


if __name__ == "__main__":
    # Small shapes consistent with the module: in=128, mid=256, out=128.
    B, L = 2, 16
    C_IN, C_MID, C_OUT = 128, 256, 128

    key = jax.random.PRNGKey(0)
    kx, k1, k2, k3 = jax.random.split(key, 4)
    x = jax.random.normal(kx, (B, L, C_IN), jnp.float32)

    params = [
        _make_block_params(k1, C_IN, C_MID, 3),
        _make_block_params(k2, C_MID, C_MID, 5),
        _make_block_params(k3, C_MID, C_OUT, 7),
    ]

    blocks = prepare_params(params, compute_dtype=jnp.bfloat16)
    fwd = jax.jit(functools.partial(mult_scale_conv1d, blocks=blocks))
    out = jax.block_until_ready(fwd(x))
    assert out.shape == (B, C_OUT, L), out.shape

    # Tight check vs. a reference using the same bf16 operand rounding
    # (f32 accumulation) as the kernel.
    ref_bf16 = jax.block_until_ready(
        mult_scale_conv1d_ref(x, params, compute_dtype=jnp.bfloat16))
    tight_err = float(jnp.max(jnp.abs(out - ref_bf16)))
    assert jnp.allclose(out, ref_bf16, rtol=2e-3, atol=2e-3), tight_err

    # Loose sanity check vs. exact f32 module semantics (bf16 MXU operands
    # introduce a small, expected numerical difference).
    ref_f32 = jax.block_until_ready(
        mult_scale_conv1d_ref(x, params, compute_dtype=jnp.float32))
    rel_err = float(jnp.max(jnp.abs(out - ref_f32)) / jnp.max(jnp.abs(ref_f32)))
    assert rel_err < 5e-2, rel_err

    print("KERNEL_OK")
</pallas_src>

<mosaic_0001>
module attributes {stable_mosaic.version = 11 : i64} {
  func.func @_msconv_kernel(%arg0: i32, %arg1: memref<2x16x128xbf16, #tpu.memory_space<vmem>>, %arg2: memref<128x1024xbf16, #tpu.memory_space<vmem>>, %arg3: memref<1x256xf32, #tpu.memory_space<vmem>>, %arg4: memref<1x256xf32, #tpu.memory_space<vmem>>, %arg5: memref<1x256xf32, #tpu.memory_space<vmem>>, %arg6: memref<1x256xf32, #tpu.memory_space<vmem>>, %arg7: memref<256x1536xbf16, #tpu.memory_space<vmem>>, %arg8: memref<1x256xf32, #tpu.memory_space<vmem>>, %arg9: memref<1x256xf32, #tpu.memory_space<vmem>>, %arg10: memref<1x256xf32, #tpu.memory_space<vmem>>, %arg11: memref<1x256xf32, #tpu.memory_space<vmem>>, %arg12: memref<256x1024xbf16, #tpu.memory_space<vmem>>, %arg13: memref<1x128xf32, #tpu.memory_space<vmem>>, %arg14: memref<1x128xf32, #tpu.memory_space<vmem>>, %arg15: memref<1x128xf32, #tpu.memory_space<vmem>>, %arg16: memref<1x128xf32, #tpu.memory_space<vmem>>, %arg17: memref<2x16x128xf32, #tpu.memory_space<vmem>>) attributes {dimension_semantics = [#tpu.dimension_semantics<parallel>], iteration_bounds = array<i64: 1>, scalar_prefetch = 0 : i64, scratch_operands = 0 : i64, tpu.core_type = #tpu.core_type<tc>, window_params = [{transform_indices = @transform_0, window_bounds = array<i64: 2, 16, 128>}, {pipeline_mode = #tpu.pipeline_mode<synchronous>, transform_indices = @transform_1, window_bounds = array<i64: 128, 1024>}, {pipeline_mode = #tpu.pipeline_mode<synchronous>, transform_indices = @transform_2, window_bounds = array<i64: 1, 256>}, {pipeline_mode = #tpu.pipeline_mode<synchronous>, transform_indices = @transform_3, window_bounds = array<i64: 1, 256>}, {pipeline_mode = #tpu.pipeline_mode<synchronous>, transform_indices = @transform_4, window_bounds = array<i64: 1, 256>}, {pipeline_mode = #tpu.pipeline_mode<synchronous>, transform_indices = @transform_5, window_bounds = array<i64: 1, 256>}, {pipeline_mode = #tpu.pipeline_mode<synchronous>, transform_indices = @transform_6, window_bounds = array<i64: 256, 1536>}, {pipeline_mode = #tpu.pipeline_mode<synchronous>, transform_indices = @transform_7, window_bounds = array<i64: 1, 256>}, {pipeline_mode = #tpu.pipeline_mode<synchronous>, transform_indices = @transform_8, window_bounds = array<i64: 1, 256>}, {pipeline_mode = #tpu.pipeline_mode<synchronous>, transform_indices = @transform_9, window_bounds = array<i64: 1, 256>}, {pipeline_mode = #tpu.pipeline_mode<synchronous>, transform_indices = @transform_10, window_bounds = array<i64: 1, 256>}, {pipeline_mode = #tpu.pipeline_mode<synchronous>, transform_indices = @transform_11, window_bounds = array<i64: 256, 1024>}, {pipeline_mode = #tpu.pipeline_mode<synchronous>, transform_indices = @transform_12, window_bounds = array<i64: 1, 128>}, {pipeline_mode = #tpu.pipeline_mode<synchronous>, transform_indices = @transform_13, window_bounds = array<i64: 1, 128>}, {pipeline_mode = #tpu.pipeline_mode<synchronous>, transform_indices = @transform_14, window_bounds = array<i64: 1, 128>}, {pipeline_mode = #tpu.pipeline_mode<synchronous>, transform_indices = @transform_15, window_bounds = array<i64: 1, 128>}, {transform_indices = @transform_16, window_bounds = array<i64: 2, 16, 128>}]} {
    %0 = tpu.iota {dimensions = array<i32: 1>} : vector<2x16x1xi32>
    %1 = vector.shape_cast %0 : vector<2x16x1xi32> to vector<32x1xi32>
    %c-3_i32 = arith.constant -3 : i32
    %2 = vector.broadcast %c-3_i32 : i32 to vector<32x1xi32>
    %3 = arith.cmpi sge, %1, %2 : vector<32x1xi32>
    %c13_i32 = arith.constant 13 : i32
    %4 = vector.broadcast %c13_i32 : i32 to vector<32x1xi32>
    %5 = arith.cmpi slt, %1, %4 : vector<32x1xi32>
    %6 = arith.andi %3, %5 : vector<32x1xi1>
    %7 = arith.extui %6 : vector<32x1xi1> to vector<32x1xi32>
    %8 = arith.sitofp %7 : vector<32x1xi32> to vector<32x1xf32>
    %c-2_i32 = arith.constant -2 : i32
    %9 = vector.broadcast %c-2_i32 : i32 to vector<32x1xi32>
    %10 = arith.cmpi sge, %1, %9 : vector<32x1xi32>
    %c14_i32 = arith.constant 14 : i32
    %11 = vector.broadcast %c14_i32 : i32 to vector<32x1xi32>
    %12 = arith.cmpi slt, %1, %11 : vector<32x1xi32>
    %13 = arith.andi %10, %12 : vector<32x1xi1>
    %14 = arith.extui %13 : vector<32x1xi1> to vector<32x1xi32>
    %15 = arith.sitofp %14 : vector<32x1xi32> to vector<32x1xf32>
    %c-1_i32 = arith.constant -1 : i32
    %16 = vector.broadcast %c-1_i32 : i32 to vector<32x1xi32>
    %17 = arith.cmpi sge, %1, %16 : vector<32x1xi32>
    %c15_i32 = arith.constant 15 : i32
    %18 = vector.broadcast %c15_i32 : i32 to vector<32x1xi32>
    %19 = arith.cmpi slt, %1, %18 : vector<32x1xi32>
    %20 = arith.andi %17, %19 : vector<32x1xi1>
    %21 = arith.extui %20 : vector<32x1xi1> to vector<32x1xi32>
    %22 = arith.sitofp %21 : vector<32x1xi32> to vector<32x1xf32>
    %c1_i32 = arith.constant 1 : i32
    %23 = vector.broadcast %c1_i32 : i32 to vector<32x1xi32>
    %24 = arith.cmpi sge, %1, %23 : vector<32x1xi32>
    %c17_i32 = arith.constant 17 : i32
    %25 = vector.broadcast %c17_i32 : i32 to vector<32x1xi32>
    %26 = arith.cmpi slt, %1, %25 : vector<32x1xi32>
    %27 = arith.andi %24, %26 : vector<32x1xi1>
    %28 = arith.extui %27 : vector<32x1xi1> to vector<32x1xi32>
    %29 = arith.sitofp %28 : vector<32x1xi32> to vector<32x1xf32>
    %c2_i32 = arith.constant 2 : i32
    %30 = vector.broadcast %c2_i32 : i32 to vector<32x1xi32>
    %31 = arith.cmpi sge, %1, %30 : vector<32x1xi32>
    %c18_i32 = arith.constant 18 : i32
    %32 = vector.broadcast %c18_i32 : i32 to vector<32x1xi32>
    %33 = arith.cmpi slt, %1, %32 : vector<32x1xi32>
    %34 = arith.andi %31, %33 : vector<32x1xi1>
    %35 = arith.extui %34 : vector<32x1xi1> to vector<32x1xi32>
    %36 = arith.sitofp %35 : vector<32x1xi32> to vector<32x1xf32>
    %c3_i32 = arith.constant 3 : i32
    %37 = vector.broadcast %c3_i32 : i32 to vector<32x1xi32>
    %38 = arith.cmpi sge, %1, %37 : vector<32x1xi32>
    %c19_i32 = arith.constant 19 : i32
    %39 = vector.broadcast %c19_i32 : i32 to vector<32x1xi32>
    %40 = arith.cmpi slt, %1, %39 : vector<32x1xi32>
    %41 = arith.andi %38, %40 : vector<32x1xi1>
    %42 = arith.extui %41 : vector<32x1xi1> to vector<32x1xi32>
    %43 = arith.sitofp %42 : vector<32x1xi32> to vector<32x1xf32>
    %c0 = arith.constant 0 : index
    %c0_0 = arith.constant 0 : index
    %c0_1 = arith.constant 0 : index
    %44 = vector.load %arg1[%c0, %c0_0, %c0_1] : memref<2x16x128xbf16, #tpu.memory_space<vmem>>, vector<2x16x128xbf16>
    %45 = vector.shape_cast %44 : vector<2x16x128xbf16> to vector<32x128xbf16>
    %c0_2 = arith.constant 0 : index
    %c0_3 = arith.constant 0 : index
    %46 = vector.load %arg2[%c0_2, %c0_3] : memref<128x1024xbf16, #tpu.memory_space<vmem>>, vector<128x1024xbf16>
    %cst = arith.constant dense<0.000000e+00> : vector<32x1024xf32>
    %47 = tpu.matmul %45, %46, %cst {dimension_numbers = #tpu.dot_dimension_numbers<[1], [0], [0], [1], [0, 0, 1, 1], [], []>} : vector<32x128xbf16>, vector<128x1024xbf16>, vector<32x1024xf32> -> vector<32x1024xf32>
    %cst_4 = arith.constant 0.000000e+00 : f32
    %48 = vector.broadcast %cst_4 : f32 to vector<32x256xf32>
    %49 = vector.extract_strided_slice %47 {offsets = [0, 0], sizes = [32, 256], strides = [1, 1]} : vector<32x1024xf32> to vector<32x256xf32>
    %c1_i32_5 = arith.constant 1 : i32
    %50 = tpu.dynamic_rotate %49 by %c1_i32_5 dim 0 : vector<32x256xf32>, i32 -> vector<32x256xf32>
    %51 = vector.broadcast %29 : vector<32x1xf32> to vector<32x256xf32>
    %52 = arith.mulf %50, %51 : vector<32x256xf32>
    %53 = arith.addf %48, %52 : vector<32x256xf32>
    %54 = vector.extract_strided_slice %47 {offsets = [0, 256], sizes = [32, 256], strides = [1, 1]} : vector<32x1024xf32> to vector<32x256xf32>
    %55 = arith.addf %53, %54 : vector<32x256xf32>
    %56 = vector.extract_strided_slice %47 {offsets = [0, 512], sizes = [32, 256], strides = [1, 1]} : vector<32x1024xf32> to vector<32x256xf32>
    %c31_i32 = arith.constant 31 : i32
    %57 = tpu.dynamic_rotate %56 by %c31_i32 dim 0 : vector<32x256xf32>, i32 -> vector<32x256xf32>
    %58 = vector.broadcast %22 : vector<32x1xf32> to vector<32x256xf32>
    %59 = arith.mulf %57, %58 : vector<32x256xf32>
    %60 = arith.addf %55, %59 : vector<32x256xf32>
    %c0_6 = arith.constant 0 : index
    %c0_7 = arith.constant 0 : index
    %61 = vector.load %arg3[%c0_6, %c0_7] : memref<1x256xf32, #tpu.memory_space<vmem>>, vector<1x256xf32>
    %62 = vector.broadcast %61 : vector<1x256xf32> to vector<32x256xf32>
    %63 = arith.addf %60, %62 : vector<32x256xf32>
    %c0_8 = arith.constant 0 : index
    %c0_9 = arith.constant 0 : index
    %64 = vector.load %arg4[%c0_8, %c0_9] : memref<1x256xf32, #tpu.memory_space<vmem>>, vector<1x256xf32>
    %65 = vector.broadcast %64 : vector<1x256xf32> to vector<32x256xf32>
    %66 = arith.mulf %63, %65 : vector<32x256xf32>
    %c0_10 = arith.constant 0 : index
    %c0_11 = arith.constant 0 : index
    %67 = vector.load %arg5[%c0_10, %c0_11] : memref<1x256xf32, #tpu.memory_space<vmem>>, vector<1x256xf32>
    %68 = vector.broadcast %67 : vector<1x256xf32> to vector<32x256xf32>
    %69 = arith.addf %66, %68 : vector<32x256xf32>
    %cst_12 = arith.constant 0.000000e+00 : f32
    %70 = vector.broadcast %cst_12 : f32 to vector<32x256xf32>
    %71 = arith.maximumf %69, %70 : vector<32x256xf32>
    %72 = vector.extract_strided_slice %47 {offsets = [0, 768], sizes = [32, 256], strides = [1, 1]} : vector<32x1024xf32> to vector<32x256xf32>
    %c0_13 = arith.constant 0 : index
    %c0_14 = arith.constant 0 : index
    %73 = vector.load %arg6[%c0_13, %c0_14] : memref<1x256xf32, #tpu.memory_space<vmem>>, vector<1x256xf32>
    %74 = vector.broadcast %73 : vector<1x256xf32> to vector<32x256xf32>
    %75 = arith.addf %72, %74 : vector<32x256xf32>
    %76 = arith.addf %71, %75 : vector<32x256xf32>
    %77 = arith.truncf %76 : vector<32x256xf32> to vector<32x256xbf16>
    %c0_15 = arith.constant 0 : index
    %c0_16 = arith.constant 0 : index
    %78 = vector.load %arg7[%c0_15, %c0_16] : memref<256x1536xbf16, #tpu.memory_space<vmem>>, vector<256x1536xbf16>
    %cst_17 = arith.constant dense<0.000000e+00> : vector<32x1536xf32>
    %79 = tpu.matmul %77, %78, %cst_17 {dimension_numbers = #tpu.dot_dimension_numbers<[1], [0], [0], [1], [0, 0, 1, 1], [], []>} : vector<32x256xbf16>, vector<256x1536xbf16>, vector<32x1536xf32> -> vector<32x1536xf32>
    %cst_18 = arith.constant 0.000000e+00 : f32
    %80 = vector.broadcast %cst_18 : f32 to vector<32x256xf32>
    %81 = vector.extract_strided_slice %79 {offsets = [0, 0], sizes = [32, 256], strides = [1, 1]} : vector<32x1536xf32> to vector<32x256xf32>
    %c2_i32_19 = arith.constant 2 : i32
    %82 = tpu.dynamic_rotate %81 by %c2_i32_19 dim 0 : vector<32x256xf32>, i32 -> vector<32x256xf32>
    %83 = vector.broadcast %36 : vector<32x1xf32> to vector<32x256xf32>
    %84 = arith.mulf %82, %83 : vector<32x256xf32>
    %85 = arith.addf %80, %84 : vector<32x256xf32>
    %86 = vector.extract_strided_slice %79 {offsets = [0, 256], sizes = [32, 256], strides = [1, 1]} : vector<32x1536xf32> to vector<32x256xf32>
    %c1_i32_20 = arith.constant 1 : i32
    %87 = tpu.dynamic_rotate %86 by %c1_i32_20 dim 0 : vector<32x256xf32>, i32 -> vector<32x256xf32>
    %88 = vector.broadcast %29 : vector<32x1xf32> to vector<32x256xf32>
    %89 = arith.mulf %87, %88 : vector<32x256xf32>
    %90 = arith.addf %85, %89 : vector<32x256xf32>
    %91 = vector.extract_strided_slice %79 {offsets = [0, 512], sizes = [32, 256], strides = [1, 1]} : vector<32x1536xf32> to vector<32x256xf32>
    %92 = arith.addf %90, %91 : vector<32x256xf32>
    %93 = vector.extract_strided_slice %79 {offsets = [0, 768], sizes = [32, 256], strides = [1, 1]} : vector<32x1536xf32> to vector<32x256xf32>
    %c31_i32_21 = arith.constant 31 : i32
    %94 = tpu.dynamic_rotate %93 by %c31_i32_21 dim 0 : vector<32x256xf32>, i32 -> vector<32x256xf32>
    %95 = vector.broadcast %22 : vector<32x1xf32> to vector<32x256xf32>
    %96 = arith.mulf %94, %95 : vector<32x256xf32>
    %97 = arith.addf %92, %96 : vector<32x256xf32>
    %98 = vector.extract_strided_slice %79 {offsets = [0, 1024], sizes = [32, 256], strides = [1, 1]} : vector<32x1536xf32> to vector<32x256xf32>
    %c30_i32 = arith.constant 30 : i32
    %99 = tpu.dynamic_rotate %98 by %c30_i32 dim 0 : vector<32x256xf32>, i32 -> vector<32x256xf32>
    %100 = vector.broadcast %15 : vector<32x1xf32> to vector<32x256xf32>
    %101 = arith.mulf %99, %100 : vector<32x256xf32>
    %102 = arith.addf %97, %101 : vector<32x256xf32>
    %c0_22 = arith.constant 0 : index
    %c0_23 = arith.constant 0 : index
    %103 = vector.load %arg8[%c0_22, %c0_23] : memref<1x256xf32, #tpu.memory_space<vmem>>, vector<1x256xf32>
    %104 = vector.broadcast %103 : vector<1x256xf32> to vector<32x256xf32>
    %105 = arith.addf %102, %104 : vector<32x256xf32>
    %c0_24 = arith.constant 0 : index
    %c0_25 = arith.constant 0 : index
    %106 = vector.load %arg9[%c0_24, %c0_25] : memref<1x256xf32, #tpu.memory_space<vmem>>, vector<1x256xf32>
    %107 = vector.broadcast %106 : vector<1x256xf32> to vector<32x256xf32>
    %108 = arith.mulf %105, %107 : vector<32x256xf32>
    %c0_26 = arith.constant 0 : index
    %c0_27 = arith.constant 0 : index
    %109 = vector.load %arg10[%c0_26, %c0_27] : memref<1x256xf32, #tpu.memory_space<vmem>>, vector<1x256xf32>
    %110 = vector.broadcast %109 : vector<1x256xf32> to vector<32x256xf32>
    %111 = arith.addf %108, %110 : vector<32x256xf32>
    %cst_28 = arith.constant 0.000000e+00 : f32
    %112 = vector.broadcast %cst_28 : f32 to vector<32x256xf32>
    %113 = arith.maximumf %111, %112 : vector<32x256xf32>
    %114 = vector.extract_strided_slice %79 {offsets = [0, 1280], sizes = [32, 256], strides = [1, 1]} : vector<32x1536xf32> to vector<32x256xf32>
    %c0_29 = arith.constant 0 : index
    %c0_30 = arith.constant 0 : index
    %115 = vector.load %arg11[%c0_29, %c0_30] : memref<1x256xf32, #tpu.memory_space<vmem>>, vector<1x256xf32>
    %116 = vector.broadcast %115 : vector<1x256xf32> to vector<32x256xf32>
    %117 = arith.addf %114, %116 : vector<32x256xf32>
    %118 = arith.addf %113, %117 : vector<32x256xf32>
    %119 = arith.truncf %118 : vector<32x256xf32> to vector<32x256xbf16>
    %c0_31 = arith.constant 0 : index
    %c0_32 = arith.constant 0 : index
    %120 = vector.load %arg12[%c0_31, %c0_32] : memref<256x1024xbf16, #tpu.memory_space<vmem>>, vector<256x1024xbf16>
    %cst_33 = arith.constant dense<0.000000e+00> : vector<32x1024xf32>
    %121 = tpu.matmul %119, %120, %cst_33 {dimension_numbers = #tpu.dot_dimension_numbers<[1], [0], [0], [1], [0, 0, 1, 1], [], []>} : vector<32x256xbf16>, vector<256x1024xbf16>, vector<32x1024xf32> -> vector<32x1024xf32>
    %cst_34 = arith.constant 0.000000e+00 : f32
    %122 = vector.broadcast %cst_34 : f32 to vector<32x128xf32>
    %123 = vector.extract_strided_slice %121 {offsets = [0, 0], sizes = [32, 128], strides = [1, 1]} : vector<32x1024xf32> to vector<32x128xf32>
    %c3_i32_35 = arith.constant 3 : i32
    %124 = tpu.dynamic_rotate %123 by %c3_i32_35 dim 0 : vector<32x128xf32>, i32 -> vector<32x128xf32>
    %125 = vector.broadcast %43 : vector<32x1xf32> to vector<32x128xf32>
    %126 = arith.mulf %124, %125 : vector<32x128xf32>
    %127 = arith.addf %122, %126 : vector<32x128xf32>
    %128 = vector.extract_strided_slice %121 {offsets = [0, 128], sizes = [32, 128], strides = [1, 1]} : vector<32x1024xf32> to vector<32x128xf32>
    %c2_i32_36 = arith.constant 2 : i32
    %129 = tpu.dynamic_rotate %128 by %c2_i32_36 dim 0 : vector<32x128xf32>, i32 -> vector<32x128xf32>
    %130 = vector.broadcast %36 : vector<32x1xf32> to vector<32x128xf32>
    %131 = arith.mulf %129, %130 : vector<32x128xf32>
    %132 = arith.addf %127, %131 : vector<32x128xf32>
    %133 = vector.extract_strided_slice %121 {offsets = [0, 256], sizes = [32, 128], strides = [1, 1]} : vector<32x1024xf32> to vector<32x128xf32>
    %c1_i32_37 = arith.constant 1 : i32
    %134 = tpu.dynamic_rotate %133 by %c1_i32_37 dim 0 : vector<32x128xf32>, i32 -> vector<32x128xf32>
    %135 = vector.broadcast %29 : vector<32x1xf32> to vector<32x128xf32>
    %136 = arith.mulf %134, %135 : vector<32x128xf32>
    %137 = arith.addf %132, %136 : vector<32x128xf32>
    %138 = vector.extract_strided_slice %121 {offsets = [0, 384], sizes = [32, 128], strides = [1, 1]} : vector<32x1024xf32> to vector<32x128xf32>
    %139 = arith.addf %137, %138 : vector<32x128xf32>
    %140 = vector.extract_strided_slice %121 {offsets = [0, 512], sizes = [32, 128], strides = [1, 1]} : vector<32x1024xf32> to vector<32x128xf32>
    %c31_i32_38 = arith.constant 31 : i32
    %141 = tpu.dynamic_rotate %140 by %c31_i32_38 dim 0 : vector<32x128xf32>, i32 -> vector<32x128xf32>
    %142 = vector.broadcast %22 : vector<32x1xf32> to vector<32x128xf32>
    %143 = arith.mulf %141, %142 : vector<32x128xf32>
    %144 = arith.addf %139, %143 : vector<32x128xf32>
    %145 = vector.extract_strided_slice %121 {offsets = [0, 640], sizes = [32, 128], strides = [1, 1]} : vector<32x1024xf32> to vector<32x128xf32>
    %c30_i32_39 = arith.constant 30 : i32
    %146 = tpu.dynamic_rotate %145 by %c30_i32_39 dim 0 : vector<32x128xf32>, i32 -> vector<32x128xf32>
    %147 = vector.broadcast %15 : vector<32x1xf32> to vector<32x128xf32>
    %148 = arith.mulf %146, %147 : vector<32x128xf32>
    %149 = arith.addf %144, %148 : vector<32x128xf32>
    %150 = vector.extract_strided_slice %121 {offsets = [0, 768], sizes = [32, 128], strides = [1, 1]} : vector<32x1024xf32> to vector<32x128xf32>
    %c29_i32 = arith.constant 29 : i32
    %151 = tpu.dynamic_rotate %150 by %c29_i32 dim 0 : vector<32x128xf32>, i32 -> vector<32x128xf32>
    %152 = vector.broadcast %8 : vector<32x1xf32> to vector<32x128xf32>
    %153 = arith.mulf %151, %152 : vector<32x128xf32>
    %154 = arith.addf %149, %153 : vector<32x128xf32>
    %c0_40 = arith.constant 0 : index
    %c0_41 = arith.constant 0 : index
    %155 = vector.load %arg13[%c0_40, %c0_41] : memref<1x128xf32, #tpu.memory_space<vmem>>, vector<1x128xf32>
    %156 = vector.broadcast %155 : vector<1x128xf32> to vector<32x128xf32>
    %157 = arith.addf %154, %156 : vector<32x128xf32>
    %c0_42 = arith.constant 0 : index
    %c0_43 = arith.constant 0 : index
    %158 = vector.load %arg14[%c0_42, %c0_43] : memref<1x128xf32, #tpu.memory_space<vmem>>, vector<1x128xf32>
    %159 = vector.broadcast %158 : vector<1x128xf32> to vector<32x128xf32>
    %160 = arith.mulf %157, %159 : vector<32x128xf32>
    %c0_44 = arith.constant 0 : index
    %c0_45 = arith.constant 0 : index
    %161 = vector.load %arg15[%c0_44, %c0_45] : memref<1x128xf32, #tpu.memory_space<vmem>>, vector<1x128xf32>
    %162 = vector.broadcast %161 : vector<1x128xf32> to vector<32x128xf32>
    %163 = arith.addf %160, %162 : vector<32x128xf32>
    %cst_46 = arith.constant 0.000000e+00 : f32
    %164 = vector.broadcast %cst_46 : f32 to vector<32x128xf32>
    %165 = arith.maximumf %163, %164 : vector<32x128xf32>
    %166 = vector.extract_strided_slice %121 {offsets = [0, 896], sizes = [32, 128], strides = [1, 1]} : vector<32x1024xf32> to vector<32x128xf32>
    %c0_47 = arith.constant 0 : index
    %c0_48 = arith.constant 0 : index
    %167 = vector.load %arg16[%c0_47, %c0_48] : memref<1x128xf32, #tpu.memory_space<vmem>>, vector<1x128xf32>
    %168 = vector.broadcast %167 : vector<1x128xf32> to vector<32x128xf32>
    %169 = arith.addf %166, %168 : vector<32x128xf32>
    %170 = arith.addf %165, %169 : vector<32x128xf32>
    %171 = vector.shape_cast %170 : vector<32x128xf32> to vector<2x16x128xf32>
    %c0_49 = arith.constant 0 : index
    %c0_50 = arith.constant 0 : index
    %c0_51 = arith.constant 0 : index
    %172 = vector.load %arg17[%c0_49, %c0_50, %c0_51] : memref<2x16x128xf32, #tpu.memory_space<vmem>>, vector<2x16x128xf32>
    tpu.vector_store %arg17[%c0_49, %c0_50, %c0_51], %171 {strides = array<i32>} : memref<2x16x128xf32, #tpu.memory_space<vmem>>, vector<2x16x128xf32>,
    return
  }
  func.func @transform_0(%arg0: i32) -> (i32, i32, i32) {
    %c0_i32 = arith.constant 0 : i32
    %c0_i32_0 = arith.constant 0 : i32
    %c0_i32_1 = arith.constant 0 : i32
    return %arg0, %c0_i32, %c0_i32_0 : i32, i32, i32
  }
  func.func @transform_1(%arg0: i32) -> (i32, i32) {
    %c0_i32 = arith.constant 0 : i32
    %c0_i32_0 = arith.constant 0 : i32
    %c0_i32_1 = arith.constant 0 : i32
    return %c0_i32, %c0_i32_0 : i32, i32
  }
  func.func @transform_2(%arg0: i32) -> (i32, i32) {
    %c0_i32 = arith.constant 0 : i32
    %c0_i32_0 = arith.constant 0 : i32
    %c0_i32_1 = arith.constant 0 : i32
    return %c0_i32, %c0_i32_0 : i32, i32
  }
  func.func @transform_3(%arg0: i32) -> (i32, i32) {
    %c0_i32 = arith.constant 0 : i32
    %c0_i32_0 = arith.constant 0 : i32
    %c0_i32_1 = arith.constant 0 : i32
    return %c0_i32, %c0_i32_0 : i32, i32
  }
  func.func @transform_4(%arg0: i32) -> (i32, i32) {
    %c0_i32 = arith.constant 0 : i32
    %c0_i32_0 = arith.constant 0 : i32
    %c0_i32_1 = arith.constant 0 : i32
    return %c0_i32, %c0_i32_0 : i32, i32
  }
  func.func @transform_5(%arg0: i32) -> (i32, i32) {
    %c0_i32 = arith.constant 0 : i32
    %c0_i32_0 = arith.constant 0 : i32
    %c0_i32_1 = arith.constant 0 : i32
    return %c0_i32, %c0_i32_0 : i32, i32
  }
  func.func @transform_6(%arg0: i32) -> (i32, i32) {
    %c0_i32 = arith.constant 0 : i32
    %c0_i32_0 = arith.constant 0 : i32
    %c0_i32_1 = arith.constant 0 : i32
    return %c0_i32, %c0_i32_0 : i32, i32
  }
  func.func @transform_7(%arg0: i32) -> (i32, i32) {
    %c0_i32 = arith.constant 0 : i32
    %c0_i32_0 = arith.constant 0 : i32
    %c0_i32_1 = arith.constant 0 : i32
    return %c0_i32, %c0_i32_0 : i32, i32
  }
  func.func @transform_8(%arg0: i32) -> (i32, i32) {
    %c0_i32 = arith.constant 0 : i32
    %c0_i32_0 = arith.constant 0 : i32
    %c0_i32_1 = arith.constant 0 : i32
    return %c0_i32, %c0_i32_0 : i32, i32
  }
  func.func @transform_9(%arg0: i32) -> (i32, i32) {
    %c0_i32 = arith.constant 0 : i32
    %c0_i32_0 = arith.constant 0 : i32
    %c0_i32_1 = arith.constant 0 : i32
    return %c0_i32, %c0_i32_0 : i32, i32
  }
  func.func @transform_10(%arg0: i32) -> (i32, i32) {
    %c0_i32 = arith.constant 0 : i32
    %c0_i32_0 = arith.constant 0 : i32
    %c0_i32_1 = arith.constant 0 : i32
    return %c0_i32, %c0_i32_0 : i32, i32
  }
  func.func @transform_11(%arg0: i32) -> (i32, i32) {
    %c0_i32 = arith.constant 0 : i32
    %c0_i32_0 = arith.constant 0 : i32
    %c0_i32_1 = arith.constant 0 : i32
    return %c0_i32, %c0_i32_0 : i32, i32
  }
  func.func @transform_12(%arg0: i32) -> (i32, i32) {
    %c0_i32 = arith.constant 0 : i32
    %c0_i32_0 = arith.constant 0 : i32
    %c0_i32_1 = arith.constant 0 : i32
    return %c0_i32, %c0_i32_0 : i32, i32
  }
  func.func @transform_13(%arg0: i32) -> (i32, i32) {
    %c0_i32 = arith.constant 0 : i32
    %c0_i32_0 = arith.constant 0 : i32
    %c0_i32_1 = arith.constant 0 : i32
    return %c0_i32, %c0_i32_0 : i32, i32
  }
  func.func @transform_14(%arg0: i32) -> (i32, i32) {
    %c0_i32 = arith.constant 0 : i32
    %c0_i32_0 = arith.constant 0 : i32
    %c0_i32_1 = arith.constant 0 : i32
    return %c0_i32, %c0_i32_0 : i32, i32
  }
  func.func @transform_15(%arg0: i32) -> (i32, i32) {
    %c0_i32 = arith.constant 0 : i32
    %c0_i32_0 = arith.constant 0 : i32
    %c0_i32_1 = arith.constant 0 : i32
    return %c0_i32, %c0_i32_0 : i32, i32
  }
  func.func @transform_16(%arg0: i32) -> (i32, i32, i32) {
    %c0_i32 = arith.constant 0 : i32
    %c0_i32_0 = arith.constant 0 : i32
    %c0_i32_1 = arith.constant 0 : i32
    return %arg0, %c0_i32, %c0_i32_0 : i32, i32, i32
  }
}

</mosaic_0001>

<bundles_post_ra>
// kernel: mult_scale_conv1d.1
= control target key start
LH: loop header
LB: loop body
LE: loop exit
PB: predicated region body
PF: predicated region fallthrough
CT: control target
= control target key end

     0   :  { %s7044_s0 = inlined_call_operand.vmem [shape: bf16[2,16,128], index: 0, kind: input, shape index: {}]   ;;  %s7045_s1 = inlined_call_operand.hbm [shape: bf16[128,1024], index: 1, kind: input, shape index: {}]   ;;  %s7046_s2 = inlined_call_operand.vmem [shape: f32[1,256], index: 2, kind: input, shape index: {}]   ;;  %s7047_s3 = inlined_call_operand.vmem [shape: f32[1,256], index: 3, kind: input, shape index: {}]   ;;  %s7048_s4 = inlined_call_operand.vmem [shape: f32[1,256], index: 4, kind: input, shape index: {}]   ;;  %s7049_s5 = inlined_call_operand.vmem [shape: f32[1,256], index: 5, kind: input, shape index: {}]   ;;  %s7050_s6 = inlined_call_operand.hbm [shape: bf16[256,1536], index: 6, kind: input, shape index: {}]   ;;  %s7051_s7 = inlined_call_operand.vmem [shape: f32[1,256], index: 7, kind: input, shape index: {}]   ;;  %s7052_s8 = inlined_call_operand.vmem [shape: f32[1,256], index: 8, kind: input, shape index: {}]   ;;  %s7053_s9 = inlined_call_operand.vmem [shape: f32[1,256], index: 9, kind: input, shape index: {}]   ;;  %s7054_s10 = inlined_call_operand.vmem [shape: f32[1,256], index: 10, kind: input, shape index: {}]   ;;  %s7055_s11 = inlined_call_operand.hbm [shape: bf16[256,1024], index: 11, kind: input, shape index: {}]   ;;  %s7056_s12 = inlined_call_operand.vmem [shape: f32[1,128], index: 12, kind: input, shape index: {}]   ;;  %s7057_s13 = inlined_call_operand.vmem [shape: f32[1,128], index: 13, kind: input, shape index: {}]   ;;  %s7058_s14 = inlined_call_operand.vmem [shape: f32[1,128], index: 14, kind: input, shape index: {}]   ;;  %s7059_s15 = inlined_call_operand.vmem [shape: f32[1,128], index: 15, kind: input, shape index: {}]   ;;  %s7060_s16 = inlined_call_operand.hbm [shape: f32[2,16,128], index: 16, kind: output, shape index: {}]  }
   0x1   :  { %7065 = sst [smem:[#allocation12_spill]] %s7044_s0 }
   0x2   :  { %21 = vsyncpa [#allocation3], 0 }
   0x3   :  { %22 = vsyncpa [#allocation6], 0  ;;  %s51_s23 = sshll.u32 %s7050_s6, 4  ;;  %s52_s23 = int_to_ptr.hbm [resolvable:$true] %s51_s23 }
   0x4   :  { %23 = vsyncpa [#allocation4], 0  ;;  %s5979_s24 = smov [#allocation5]   ;;  %s30_s28 = sshll.u32 %s7045_s1, 4  ;;  %s31_s28 = int_to_ptr.hbm [resolvable:$true] %s30_s28 }
   0x5   :  { %s53_s25 = sshll.u32 %s5979_s24, 4  ;;  %s5980_s29 = smov 768   ;;  %s54_s25 = int_to_ptr.vmem [resolvable:$true] %s53_s25 }
   0x6   :  { %s5981_s30 = smov 48   ;;  %s5982_s0 = smov [#allocation2]  }
   0x7   :  { %59 = dma.hbm_to_vmem [thread:$0]  %s52_s23, 24576, %s54_s25, [#allocation6], %s5980_s29, %s5980_s29, %s5981_s30  }
   0x8   :  { %s32_s17 = sshll.u32 %s5982_s0, 4  ;;  %s5983_s18 = smov 512   ;;  %s33_s17 = int_to_ptr.vmem [resolvable:$true] %s32_s17 }
   0x9   :  { %s5984_s19 = smov 32   ;;  %s72_s21 = sshll.u32 %s7055_s11, 4  ;;  %s73_s21 = int_to_ptr.hbm [resolvable:$true] %s72_s21 }
   0xa   :  { %38 = dma.hbm_to_vmem [thread:$0]  %s31_s28, 8192, %s33_s17, [#allocation3], %s5983_s18, %s5983_s18, %s5984_s19  }
   0xb   :  { %s5985_s22 = smov [#allocation7]  }
   0xc   :  { %s74_s24 = sshll.u32 %s5985_s22, 4  ;;  %s75_s24 = int_to_ptr.vmem [resolvable:$true] %s74_s24 }
   0xd   :  { %80 = dma.hbm_to_vmem [thread:$0]  %s73_s21, 16384, %s75_s24, [#allocation6], %s5983_s18, %s5983_s18, %s5984_s19  }
   0xe   :  { %5973 = dma.done.wait [#allocation3], 8192  }
   0xf   :  { %5974 = vsyncadd [#allocation3], 4294959104 }
  0x10   :  { %5975 = dma.done.wait [#allocation6], 40960  }
  0x11   :  { %5976 = vsyncadd [#allocation6], 4294926336  ;;  %v4166_v0 = vld [vmem:[#allocation2 + $0x1c0] sm:$0xf]  ;;  %v5534_v2 = vld [vmem:[#allocation2 + $0x1c4] sm:$0xf] }
  0x12   :  { %v5538_v1 = vld [vmem:[#allocation2 + $0x1dc] sm:$0xf0]  ;;  %v4168_v4 = vld [vmem:[#allocation2 + $0x1e0] sm:$0xf0]  ;;  %v4174_v5 = vld [vmem:[#allocation2 + $0x1c8] sm:$0xf] }
  0x13   :  { %v4167_v3 = vor.u32 %v5538_v1, %v4166_v0  ;;  %v5539_v6 = vld [vmem:[#allocation2 + $0x1e4] sm:$0xf0]  ;;  %v4171_v7 = vor.u32 %v5534_v2, %v4168_v4  ;;  %v5535_v9 = vld [vmem:[#allocation2 + $0x1cc] sm:$0xf]  ;;  %v4134_v11 = vld [vmem:[#allocation2 + $0x180] sm:$0xf] }
  0x14   :  { %v4175_v8 = vor.u32 %v5539_v6, %v4174_v5  ;;  %v4176_v10 = vld [vmem:[#allocation2 + $0x1e8] sm:$0xf0]  ;;  %v5530_v13 = vld [vmem:[#allocation2 + $0x19c] sm:$0xf0]  ;;  %v5526_v14 = vld [vmem:[#allocation2 + $0x184] sm:$0xf] }
  0x15   :  { %564 = vmatpush.bf16.msra.mxu0 %v4167_v3  ;;  %v4179_v12 = vor.u32 %v5535_v9, %v4176_v10  ;;  %v4136_v15 = vld [vmem:[#allocation2 + $0x1a0] sm:$0xf0]  ;;  %583 = vmatpush.bf16.msra.mxu1 %v4171_v7  ;;  %v4135_v16 = vor.u32 %v5530_v13, %v4134_v11  ;;  %v4142_v18 = vld [vmem:[#allocation2 + $0x188] sm:$0xf]  ;;  %v5527_v20 = vld [vmem:[#allocation2 + $0x18c] sm:$0xf] }
  0x16   :  { %602 = vmatpush.bf16.msra.mxu2 %v4175_v8  ;;  %v4139_v17 = vor.u32 %v5526_v14, %v4136_v15  ;;  %v5531_v19 = vld [vmem:[#allocation2 + $0x1a4] sm:$0xf0]  ;;  %v4144_v22 = vld [vmem:[#allocation2 + $0x1a8] sm:$0xf0]  ;;  %v4102_v23 = vld [vmem:[#allocation2 + $0x140] sm:$0xf] }
  0x17   :  { %621 = vmatpush.bf16.msra.mxu3 %v4179_v12  ;;  %v4143_v21 = vor.u32 %v5531_v19, %v4142_v18  ;;  %v5522_v24 = vld [vmem:[#allocation2 + $0x15c] sm:$0xf0]  ;;  %v4147_v25 = vor.u32 %v5527_v20, %v4144_v22  ;;  %v5518_v26 = vld [vmem:[#allocation2 + $0x144] sm:$0xf]  ;;  %v4110_v28 = vld [vmem:[#allocation2 + $0x148] sm:$0xf] }
  0x18   :  { %v4104_v27 = vld [vmem:[#allocation2 + $0x160] sm:$0xf0]  ;;  %v4103_v29 = vor.u32 %v5522_v24, %v4102_v23  ;;  %v5523_v30 = vld [vmem:[#allocation2 + $0x164] sm:$0xf0]  ;;  %v5519_v31 = vld [vmem:[#allocation2 + $0x14c] sm:$0xf] }
  0x19   :  { %565 = vmatpush.bf16.msra.mxu0 %v4135_v16  ;;  %v4112_v32 = vld [vmem:[#allocation2 + $0x168] sm:$0xf0]  ;;  %584 = vmatpush.bf16.msra.mxu1 %v4139_v17  ;;  %v4107_v33 = vor.u32 %v5518_v26, %v4104_v27  ;;  %v4111_v34 = vor.u32 %v5523_v30, %v4110_v28  ;;  %v4070_v35 = vld [vmem:[#allocation2 + $0x100] sm:$0xf]  ;;  %v5510_v37 = vld [vmem:[#allocation2 + $0x104] sm:$0xf] }
  0x1a   :  { %603 = vmatpush.bf16.msra.mxu2 %v4143_v21  ;;  %v5514_v36 = vld [vmem:[#allocation2 + $0x11c] sm:$0xf0]  ;;  %v4115_v38 = vor.u32 %v5519_v31, %v4112_v32  ;;  %v4072_v39 = vld [vmem:[#allocation2 + $0x120] sm:$0xf0]  ;;  %v4078_v40 = vld [vmem:[#allocation2 + $0x108] sm:$0xf] }
  0x1b   :  { %622 = vmatpush.bf16.msra.mxu3 %v4147_v25  ;;  %v5515_v41 = vld [vmem:[#allocation2 + $0x124] sm:$0xf0]  ;;  %v5511_v42 = vld [vmem:[#allocation2 + $0x10c] sm:$0xf]  ;;  %v4071_v44 = vor.u32 %v5514_v36, %v4070_v35  ;;  %v4075_v45 = vor.u32 %v5510_v37, %v4072_v39  ;;  %v4038_v47 = vld [vmem:[#allocation2 + $0xc0] sm:$0xf] }
  0x1c   :  { %v4080_v43 = vld [vmem:[#allocation2 + $0x128] sm:$0xf0]  ;;  %v4079_v46 = vor.u32 %v5515_v41, %v4078_v40  ;;  %v5506_v48 = vld [vmem:[#allocation2 + $0xdc] sm:$0xf0]  ;;  %v5502_v49 = vld [vmem:[#allocation2 + $0xc4] sm:$0xf] }
  0x1d   :  { %566 = vmatpush.bf16.msra.mxu0 %v4103_v29  ;;  %585 = vmatpush.bf16.msra.mxu1 %v4107_v33  ;;  %v4083_v50 = vor.u32 %v5511_v42, %v4080_v43  ;;  %v4040_v51 = vld [vmem:[#allocation2 + $0xe0] sm:$0xf0]  ;;  %v4046_v52 = vld [vmem:[#allocation2 + $0xc8] sm:$0xf]  ;;  %v5503_v54 = vld [vmem:[#allocation2 + $0xcc] sm:$0xf]  ;;  %v4039_v56 = vor.u32 %v5506_v48, %v4038_v47 }
  0x1e   :  { %604 = vmatpush.bf16.msra.mxu2 %v4111_v34  ;;  %v5507_v53 = vld [vmem:[#allocation2 + $0xe4] sm:$0xf0]  ;;  %v4048_v55 = vld [vmem:[#allocation2 + $0xe8] sm:$0xf0]  ;;  %v4043_v57 = vor.u32 %v5502_v49, %v4040_v51  ;;  %v4006_v59 = vld [vmem:[#allocation2 + $0x80] sm:$0xf] }
  0x1f   :  { %623 = vmatpush.bf16.msra.mxu3 %v4115_v38  ;;  %v4047_v58 = vor.u32 %v5507_v53, %v4046_v52  ;;  %v5498_v60 = vld [vmem:[#allocation2 + $0x9c] sm:$0xf0]  ;;  %v5494_v61 = vld [vmem:[#allocation2 + $0x84] sm:$0xf]  ;;  %v4051_v62 = vor.u32 %v5503_v54, %v4048_v55  ;;  %v4014_v0 = vld [vmem:[#allocation2 + $0x88] sm:$0xf] }
  0x20   :  { %v4008_v63 = vld [vmem:[#allocation2 + $0xa0] sm:$0xf0]  ;;  %v5499_v1 = vld [vmem:[#allocation2 + $0xa4] sm:$0xf0]  ;;  %v5495_v2 = vld [vmem:[#allocation2 + $0x8c] sm:$0xf]  ;;  %v4007_v4 = vor.u32 %v5498_v60, %v4006_v59 }
  0x21   :  { %567 = vmatpush.bf16.msra.mxu0 %v4071_v44  ;;  %586 = vmatpush.bf16.msra.mxu1 %v4075_v45  ;;  %v4016_v3 = vld [vmem:[#allocation2 + $0xa8] sm:$0xf0]  ;;  %v4011_v5 = vor.u32 %v5494_v61, %v4008_v63  ;;  %v4015_v6 = vor.u32 %v5499_v1, %v4014_v0  ;;  %v3974_v7 = vld [vmem:[#allocation2 + $0x40] sm:$0xf]  ;;  %v5486_v9 = vld [vmem:[#allocation2 + $0x44] sm:$0xf] }
  0x22   :  { %605 = vmatpush.bf16.msra.mxu2 %v4079_v46  ;;  %v5490_v8 = vld [vmem:[#allocation2 + $0x5c] sm:$0xf0]  ;;  %v4019_v10 = vor.u32 %v5495_v2, %v4016_v3  ;;  %v3976_v11 = vld [vmem:[#allocation2 + $0x60] sm:$0xf0]  ;;  %v3982_v12 = vld [vmem:[#allocation2 + $0x48] sm:$0xf] }
  0x23   :  { %624 = vmatpush.bf16.msra.mxu3 %v4083_v50  ;;  %v5491_v13 = vld [vmem:[#allocation2 + $0x64] sm:$0xf0]  ;;  %v5487_v14 = vld [vmem:[#allocation2 + $0x4c] sm:$0xf]  ;;  %v3975_v16 = vor.u32 %v5490_v8, %v3974_v7  ;;  %v3942_v17 = vld [vmem:[#allocation2] sm:$0xf]  ;;  %v3979_v18 = vor.u32 %v5486_v9, %v3976_v11 }
  0x24   :  { %v3984_v15 = vld [vmem:[#allocation2 + $0x68] sm:$0xf0]  ;;  %v3983_v19 = vor.u32 %v5491_v13, %v3982_v12  ;;  %v5482_v20 = vld [vmem:[#allocation2 + $0x1c] sm:$0xf0]  ;;  %v5478_v21 = vld [vmem:[#allocation2 + $0x4] sm:$0xf] }
  0x25   :  { %568 = vmatpush.bf16.msra.mxu0 %v4039_v56  ;;  %587 = vmatpush.bf16.msra.mxu1 %v4043_v57  ;;  %v3944_v22 = vld [vmem:[#allocation2 + $0x20] sm:$0xf0]  ;;  %v3987_v23 = vor.u32 %v5487_v14, %v3984_v15  ;;  %v3950_v24 = vld [vmem:[#allocation2 + $0x8] sm:$0xf]  ;;  %v5479_v26 = vld [vmem:[#allocation2 + $0xc] sm:$0xf]  ;;  %v3943_v30 = vor.u32 %v5482_v20, %v3942_v17 }
  0x26   :  { %606 = vmatpush.bf16.msra.mxu2 %v4047_v58  ;;  %v5483_v25 = vld [vmem:[#allocation2 + $0x24] sm:$0xf0]  ;;  %v3952_v27 = vld [vmem:[#allocation2 + $0x28] sm:$0xf0]  ;;  %v4182_v28 = vld [vmem:[#allocation2 + $0x1d0] sm:$0xf]  ;;  %v3947_v33 = vor.u32 %v5478_v21, %v3944_v22 }
  0x27   :  { %625 = vmatpush.bf16.msra.mxu3 %v4051_v62  ;;  %v5540_v29 = vld [vmem:[#allocation2 + $0x1ec] sm:$0xf0]  ;;  %v5536_v31 = vld [vmem:[#allocation2 + $0x1d4] sm:$0xf]  ;;  %v3951_v34 = vor.u32 %v5483_v25, %v3950_v24  ;;  %s7066_s23 = sld [smem:[#allocation12_spill]]  ;;  %v3955_v36 = vor.u32 %v5479_v26, %v3952_v27  ;;  %s3912_s25 = sshll.u32 %s7060_s16, 4  ;;  %s3913_s25 = int_to_ptr.hbm [resolvable:$true] %s3912_s25 }
  0x28   :  { %v4184_v32 = vld [vmem:[#allocation2 + $0x1f0] sm:$0xf0]  ;;  %v4183_v37 = vor.u32 %v5540_v29, %v4182_v28  ;;  %v4150_v38 = vld [vmem:[#allocation2 + $0x190] sm:$0xf]  ;;  %v4190_v39 = vld [vmem:[#allocation2 + $0x1d8] sm:$0xf] }
  0x29   :  { %569 = vmatpush.bf16.msra.mxu0 %v4007_v4  ;;  %588 = vmatpush.bf16.msra.mxu1 %v4011_v5  ;;  %v5541_v40 = vld [vmem:[#allocation2 + $0x1f4] sm:$0xf0]  ;;  %v4187_v41 = vor.u32 %v5536_v31, %v4184_v32  ;;  %v5532_v42 = vld [vmem:[#allocation2 + $0x1ac] sm:$0xf0]  ;;  %v5537_v43 = vld [vmem:[#allocation2 + $0x1dc] sm:$0xf] }
  0x2a   :  { %607 = vmatpush.bf16.msra.mxu2 %v4015_v6  ;;  %v4192_v44 = vld [vmem:[#allocation2 + $0x1f8] sm:$0xf0]  ;;  %v5528_v45 = vld [vmem:[#allocation2 + $0x194] sm:$0xf]  ;;  %v4191_v47 = vor.u32 %v5541_v40, %v4190_v39  ;;  %v4151_v48 = vor.u32 %v5532_v42, %v4150_v38  ;;  %v4118_v49 = vld [vmem:[#allocation2 + $0x150] sm:$0xf] }
  0x2b   :  { %626 = vmatpush.bf16.msra.mxu3 %v4019_v10  ;;  %v4152_v46 = vld [vmem:[#allocation2 + $0x1b0] sm:$0xf0]  ;;  %v4195_v50 = vor.u32 %v5537_v43, %v4192_v44  ;;  %v4158_v51 = vld [vmem:[#allocation2 + $0x198] sm:$0xf]  ;;  %v5524_v54 = vld [vmem:[#allocation2 + $0x16c] sm:$0xf0] }
  0x2c   :  { %v5533_v52 = vld [vmem:[#allocation2 + $0x1b4] sm:$0xf0]  ;;  %v4155_v53 = vor.u32 %v5528_v45, %v4152_v46  ;;  %v5529_v55 = vld [vmem:[#allocation2 + $0x19c] sm:$0xf]  ;;  %v5520_v57 = vld [vmem:[#allocation2 + $0x154] sm:$0xf]  ;;  %v4119_v60 = vor.u32 %v5524_v54, %v4118_v49 }
  0x2d   :  { %570 = vmatpush.bf16.msra.mxu0 %v3975_v16  ;;  %589 = vmatpush.bf16.msra.mxu1 %v3979_v18  ;;  %v6087_v35 = vld [vmem:[%s7066_s23] sm:$0xff]  ;;  %v4160_v56 = vld [vmem:[#allocation2 + $0x1b8] sm:$0xf0]  ;;  %v4120_v58 = vld [vmem:[#allocation2 + $0x170] sm:$0xf0]  ;;  %v4159_v59 = vor.u32 %v5533_v52, %v4158_v51  ;;  %s5988_s26 = smov 128  }
  0x2e   :  { %608 = vmatpush.bf16.msra.mxu2 %v3983_v19  ;;  %v4086_v61 = vld [vmem:[#allocation2 + $0x110] sm:$0xf]  ;;  %v4163_v62 = vor.u32 %v5529_v55, %v4160_v56  ;;  %v4126_v63 = vld [vmem:[#allocation2 + $0x158] sm:$0xf]  ;;  %v4123_v1 = vor.u32 %v5520_v57, %v4120_v58  ;;  %v5521_v3 = vld [vmem:[#allocation2 + $0x15c] sm:$0xf] }
  0x2f   :  { %627 = vmatpush.bf16.msra.mxu3 %v3987_v23  ;;  %v5525_v0 = vld [vmem:[#allocation2 + $0x174] sm:$0xf0]  ;;  %v5516_v2 = vld [vmem:[#allocation2 + $0x12c] sm:$0xf0]  ;;  %v4128_v4 = vld [vmem:[#allocation2 + $0x178] sm:$0xf0] }
  0x30   :  { %v5512_v5 = vld [vmem:[#allocation2 + $0x114] sm:$0xf]  ;;  %v4054_v7 = vld [vmem:[#allocation2 + $0xd0] sm:$0xf]  ;;  %v4127_v8 = vor.u32 %v5525_v0, %v4126_v63  ;;  %v4087_v9 = vor.u32 %v5516_v2, %v4086_v61  ;;  %v4131_v11 = vor.u32 %v5521_v3, %v4128_v4  ;;  %v4094_v12 = vld [vmem:[#allocation2 + $0x118] sm:$0xf] }
  0x31   :  { %571 = vmatpush.bf16.msra.mxu0 %v3943_v30  ;;  %590 = vmatpush.bf16.msra.mxu1 %v3947_v33  ;;  %v4088_v6 = vld [vmem:[#allocation2 + $0x130] sm:$0xf0]  ;;  %v5508_v10 = vld [vmem:[#allocation2 + $0xec] sm:$0xf0]  ;;  %v5517_v13 = vld [vmem:[#allocation2 + $0x134] sm:$0xf0] }
  0x32   :  { %609 = vmatpush.bf16.msra.mxu2 %v3951_v34  ;;  %v4091_v14 = vor.u32 %v5512_v5, %v4088_v6  ;;  %v5504_v15 = vld [vmem:[#allocation2 + $0xd4] sm:$0xf]  ;;  %v5513_v16 = vld [vmem:[#allocation2 + $0x11c] sm:$0xf]  ;;  %v6096_v19 = vld [vmem:[%s7066_s23 + $0x8] sm:$0xff]  ;;  %v4095_v20 = vor.u32 %v5517_v13, %v4094_v12  ;;  %v4055_v21 = vor.u32 %v5508_v10, %v4054_v7  ;;  %s5989_s27 = smov 8  }
  0x33   :  { %628 = vmatpush.bf16.msra.mxu3 %v3955_v36  ;;  %v4096_v17 = vld [vmem:[#allocation2 + $0x138] sm:$0xf0]  ;;  %v4056_v18 = vld [vmem:[#allocation2 + $0xf0] sm:$0xf0]  ;;  %v4022_v22 = vld [vmem:[#allocation2 + $0x90] sm:$0xf] }
  0x34   :  { %572 = vmatmul.bf16.vlgmr.msra.gmra.mxu0 %v6087_v35  ;;  %591 = vmatmul.bf16.vlgmr.msra.gmra.mxu1 %v6087_v35  ;;  %v4099_v23 = vor.u32 %v5513_v16, %v4096_v17  ;;  %v4062_v24 = vld [vmem:[#allocation2 + $0xd8] sm:$0xf]  ;;  %v4059_v26 = vor.u32 %v5504_v15, %v4056_v18  ;;  %v5500_v27 = vld [vmem:[#allocation2 + $0xac] sm:$0xf0]  ;;  %v5505_v28 = vld [vmem:[#allocation2 + $0xdc] sm:$0xf] }
  0x35   :  { %640 = vmatpush.bf16.msrb.mxu0 %v4183_v37  ;;  %659 = vmatpush.bf16.msrb.mxu1 %v4187_v41  ;;  %v5509_v25 = vld [vmem:[#allocation2 + $0xf4] sm:$0xf0]  ;;  %v4064_v29 = vld [vmem:[#allocation2 + $0xf8] sm:$0xf0]  ;;  %v5496_v30 = vld [vmem:[#allocation2 + $0x94] sm:$0xf]  ;;  %v4023_v33 = vor.u32 %v5500_v27, %v4022_v22 }
  0x36   :  { %610 = vmatmul.bf16.vlgmr.msra.gmra.mxu2 %v6087_v35  ;;  %629 = vmatmul.bf16.vlgmr.msra.gmra.mxu3 %v6087_v35  ;;  %v4024_v31 = vld [vmem:[#allocation2 + $0xb0] sm:$0xf0]  ;;  %v4063_v32 = vor.u32 %v5509_v25, %v4062_v24  ;;  %v3990_v34 = vld [vmem:[#allocation2 + $0x50] sm:$0xf]  ;;  %v4067_v36 = vor.u32 %v5505_v28, %v4064_v29  ;;  %v4030_v37 = vld [vmem:[#allocation2 + $0x98] sm:$0xf] }
  0x37   :  { %678 = vmatpush.bf16.msrb.mxu2 %v4191_v47  ;;  %697 = vmatpush.bf16.msrb.mxu3 %v4195_v50  ;;  %v5501_v38 = vld [vmem:[#allocation2 + $0xb4] sm:$0xf0]  ;;  %v4027_v39 = vor.u32 %v5496_v30, %v4024_v31  ;;  %v5492_v40 = vld [vmem:[#allocation2 + $0x6c] sm:$0xf0]  ;;  %v5497_v41 = vld [vmem:[#allocation2 + $0x9c] sm:$0xf] }
  0x38   :  { %v4032_v42 = vld [vmem:[#allocation2 + $0xb8] sm:$0xf0]  ;;  %v5488_v43 = vld [vmem:[#allocation2 + $0x54] sm:$0xf]  ;;  %v4031_v45 = vor.u32 %v5501_v38, %v4030_v37  ;;  %v3991_v46 = vor.u32 %v5492_v40, %v3990_v34  ;;  %v3958_v47 = vld [vmem:[#allocation2 + $0x10] sm:$0xf] }
  0x39   :  { %641 = vmatpush.bf16.msrb.mxu0 %v4151_v48  ;;  %660 = vmatpush.bf16.msrb.mxu1 %v4155_v53  ;;  %v3992_v44 = vld [vmem:[#allocation2 + $0x70] sm:$0xf0]  ;;  %v4035_v48 = vor.u32 %v5497_v41, %v4032_v42  ;;  %v3998_v49 = vld [vmem:[#allocation2 + $0x58] sm:$0xf]  ;;  %v5484_v52 = vld [vmem:[#allocation2 + $0x2c] sm:$0xf0] }
  0x3a   :  { %v5493_v50 = vld [vmem:[#allocation2 + $0x74] sm:$0xf0]  ;;  %v3995_v51 = vor.u32 %v5488_v43, %v3992_v44  ;;  %v5489_v53 = vld [vmem:[#allocation2 + $0x5c] sm:$0xf]  ;;  %v5480_v55 = vld [vmem:[#allocation2 + $0x14] sm:$0xf]  ;;  %v3959_v58 = vor.u32 %v5484_v52, %v3958_v47 }
  0x3b   :  { %679 = vmatpush.bf16.msrb.mxu2 %v4159_v59  ;;  %698 = vmatpush.bf16.msrb.mxu3 %v4163_v62  ;;  %v4000_v54 = vld [vmem:[#allocation2 + $0x78] sm:$0xf0]  ;;  %v3960_v56 = vld [vmem:[#allocation2 + $0x30] sm:$0xf0]  ;;  %v3999_v57 = vor.u32 %v5493_v50, %v3998_v49  ;;  %v5485_v61 = vld [vmem:[#allocation2 + $0x34] sm:$0xf0] }
  0x3c   :  { %v4003_v59 = vor.u32 %v5489_v53, %v4000_v54  ;;  %v3963_v62 = vor.u32 %v5480_v55, %v3960_v56  ;;  %v5481_v63 = vld [vmem:[#allocation2 + $0x1c] sm:$0xf]  ;;  %v5626_v5 = vld [vmem:[#allocation5 + $0x2a4] sm:$0xf]  ;;  %v4536_v6 = vld [vmem:[#allocation5 + $0x2d0] sm:$0xf0] }
  0x3d   :  { %642 = vmatpush.bf16.msrb.mxu0 %v4119_v60  ;;  %661 = vmatpush.bf16.msrb.mxu1 %v4123_v1  ;;  %v3966_v60 = vld [vmem:[#allocation2 + $0x18] sm:$0xf]  ;;  %v3968_v0 = vld [vmem:[#allocation2 + $0x38] sm:$0xf0]  ;;  %v4539_v7 = vor.u32 %v5626_v5, %v4536_v6  ;;  %v4534_v10 = vld [vmem:[#allocation5 + $0x2a0] sm:$0xf] }
  0x3e   :  { %v3967_v1 = vor.u32 %v5485_v61, %v3966_v60  ;;  %v3971_v2 = vor.u32 %v5481_v63, %v3968_v0  ;;  %v4918_v12 = vld [vmem:[#allocation5 + $0x5a0] sm:$0xf]  ;;  %v5728_v13 = vld [vmem:[#allocation5 + $0x5cc] sm:$0xf0]  ;;  %v4872_v24 = vld [vmem:[#allocation5 + $0x570] sm:$0xf0] }
  0x3f   :  { %680 = vmatpush.bf16.msrb.mxu2 %v4127_v8  ;;  %699 = vmatpush.bf16.msrb.mxu3 %v4131_v11  ;;  %v5722_v8 = vld [vmem:[#allocation5 + $0x5a4] sm:$0xf]  ;;  %v4919_v15 = vor.u32 %v5728_v13, %v4918_v12  ;;  %v4486_v25 = vld [vmem:[#allocation5 + $0x240] sm:$0xf]  ;;  %v5620_v27 = vld [vmem:[#allocation5 + $0x26c] sm:$0xf0] }
  0x40   :  { %v4870_v28 = vld [vmem:[#allocation5 + $0x540] sm:$0xf]  ;;  %v4487_v29 = vor.u32 %v5620_v27, %v4486_v25  ;;  %v5716_v30 = vld [vmem:[#allocation5 + $0x56c] sm:$0xf0]  ;;  %v5698_v34 = vld [vmem:[#allocation5 + $0x4e4] sm:$0xf] }
  0x41   :  { %643 = vmatpush.bf16.msrb.mxu0 %v4087_v9  ;;  %662 = vmatpush.bf16.msrb.mxu1 %v4091_v14  ;;  %v4920_v9 = vld [vmem:[#allocation5 + $0x5d0] sm:$0xf0]  ;;  %v4871_v31 = vor.u32 %v5716_v30, %v4870_v28  ;;  %v5608_v41 = vld [vmem:[#allocation5 + $0x20c] sm:$0xf0]  ;;  %v4822_v44 = vld [vmem:[#allocation5 + $0x4e0] sm:$0xf] }
  0x42   :  { %v4923_v11 = vor.u32 %v5722_v8, %v4920_v9  ;;  %v4824_v38 = vld [vmem:[#allocation5 + $0x510] sm:$0xf0]  ;;  %v5590_v49 = vld [vmem:[#allocation5 + $0x184] sm:$0xf]  ;;  %v5692_v60 = vld [vmem:[#allocation5 + $0x4ac] sm:$0xf0] }
  0x43   :  { %681 = vmatpush.bf16.msrb.mxu2 %v4095_v20  ;;  %700 = vmatpush.bf16.msrb.mxu3 %v4099_v23  ;;  %v4488_v20 = vld [vmem:[#allocation5 + $0x270] sm:$0xf0]  ;;  %v4827_v40 = vor.u32 %v5698_v34, %v4824_v38  ;;  %v5686_v53 = vld [vmem:[#allocation5 + $0x484] sm:$0xf]  ;;  %v790_v34 = vld [vmem:[%s7046_s2] sm:$0x3] }
  0x44   :  { %577 = vmatmul.bf16.gmra.mxu0 %v6096_v19  ;;  %596 = vmatmul.bf16.gmra.mxu1 %v6096_v19  ;;  %v4392_v52 = vld [vmem:[#allocation5 + $0x1b0] sm:$0xf0]  ;;  %v5578_v63 = vld [vmem:[#allocation5 + $0x124] sm:$0xf]  ;;  %v5668_v38 = vld [vmem:[#allocation5 + $0x3ec] sm:$0xf0] }
  0x45   :  { %644 = vmatpush.bf16.msrb.mxu0 %v4055_v21  ;;  %663 = vmatpush.bf16.msrb.mxu1 %v4059_v26  ;;  %v5710_v21 = vld [vmem:[#allocation5 + $0x544] sm:$0xf]  ;;  %v4395_v54 = vor.u32 %v5590_v49, %v4392_v52  ;;  %v4776_v55 = vld [vmem:[#allocation5 + $0x4b0] sm:$0xf0]  ;;  %v4246_v49 = vld [vmem:[#allocation5 + $0x60] sm:$0xf] }
  0x46   :  { %615 = vmatmul.bf16.gmra.mxu2 %v6096_v19  ;;  %634 = vmatmul.bf16.gmra.mxu3 %v6096_v19  ;;  %v4875_v26 = vor.u32 %v5710_v21, %v4872_v24  ;;  %v4779_v56 = vor.u32 %v5686_v53, %v4776_v55  ;;  %v4344_v0 = vld [vmem:[#allocation5 + $0x150] sm:$0xf0]  ;;  %v5674_v6 = vld [vmem:[#allocation5 + $0x424] sm:$0xf]  ;;  %v5560_v52 = vld [vmem:[#allocation5 + $0x8c] sm:$0xf0] }
  0x47   :  { %682 = vmatpush.bf16.msrb.mxu2 %v4063_v32  ;;  %701 = vmatpush.bf16.msrb.mxu3 %v4067_v36  ;;  %v5602_v32 = vld [vmem:[#allocation5 + $0x1e4] sm:$0xf]  ;;  %v101_v36 = vlaneseq  ;;  %v4347_v5 = vor.u32 %v5578_v63, %v4344_v0  ;;  %v4680_v28 = vld [vmem:[#allocation5 + $0x3f0] sm:$0xf0]  ;;  %v6155_v53 = vperm.slane %v790_v34, 0 }
  0x48   :  { %v5662_v27 = vld [vmem:[#allocation5 + $0x3c4] sm:$0xf] }
  0x49   :  { %645 = vmatpush.bf16.msrb.mxu0 %v4023_v33  ;;  %664 = vmatpush.bf16.msrb.mxu1 %v4027_v39  ;;  %v4440_v33 = vld [vmem:[#allocation5 + $0x210] sm:$0xf0]  ;;  %v4438_v39 = vld [vmem:[#allocation5 + $0x1e0] sm:$0xf]  ;;  %v6128_v50 = vshrl.u32 %v101_v36, 7 }
  0x4a   :  { %v4443_v37 = vor.u32 %v5602_v32, %v4440_v33  ;;  %v4439_v43 = vor.u32 %v5608_v41, %v4438_v39  ;;  %v4294_v32 = vld [vmem:[#allocation5 + $0xc0] sm:$0xf]  ;;  %v5572_v33 = vld [vmem:[#allocation5 + $0xec] sm:$0xf0]  ;;  %v5554_v41 = vld [vmem:[#allocation5 + $0x64] sm:$0xf] }
  0x4b   :  { %683 = vmatpush.bf16.msrb.mxu2 %v4031_v45  ;;  %702 = vmatpush.bf16.msrb.mxu3 %v4035_v48  ;;  %v5704_v45 = vld [vmem:[#allocation5 + $0x50c] sm:$0xf0]  ;;  %vm134_vm0 = vcmp.ge.s32.totalorder %v6128_v50, 1  ;;  %vm724_vm1 = vcmp.lt.s32.totalorder %v6128_v50, 1  ;;  %v4295_v36 = vor.u32 %v5572_v33, %v4294_v32  ;;  %v804_v39 = vld [vmem:[%s7047_s3] sm:$0x3] }
  0x4c   :  { %v4823_v48 = vor.u32 %v5704_v45, %v4822_v44  ;;  %v5650_v44 = vld [vmem:[#allocation5 + $0x364] sm:$0xf]  ;;  %vm765_vm2 = vcmp.lt.s32.totalorder %v6128_v50, 7  ;;  %v840_v33 = vld [vmem:[%s7049_s5] sm:$0x3]  ;;  %vm2482_vm4 = vcmp.lt.s32.totalorder %v6128_v50, 2 }
  0x4d   :  { %646 = vmatpush.bf16.msrb.mxu0 %v3991_v46  ;;  %665 = vmatpush.bf16.msrb.mxu1 %v3995_v51  ;;  %v5542_v0 = vld [vmem:[#allocation5 + $0x4] sm:$0xf]  ;;  %vm144_vm5 = vcmp.ge.s32.totalorder %v6128_v50, 2  ;;  %vm2587_vm6 = vcmp.lt.s32.totalorder %v6128_v50, 6  ;;  %vm3764_vm8 = vcmp.lt.s32.totalorder %v6128_v50, 3  ;;  %vm154_vm9 = vcmp.ge.s32.totalorder %v6128_v50, 3 }
  0x4e   :  { %vm3849_vm10 = vcmp.lt.s32.totalorder %v6128_v50, 5 }
  0x4f   :  { %684 = vmatpush.bf16.msrb.mxu2 %v3999_v57  ;;  %703 = vmatpush.bf16.msrb.mxu3 %v4003_v59  ;;  %v4390_v57 = vld [vmem:[#allocation5 + $0x180] sm:$0xf] }
  0x50   :  { %v4774_v59 = vld [vmem:[#allocation5 + $0x480] sm:$0xf] }
  0x51   :  { %647 = vmatpush.bf16.msrb.mxu0 %v3959_v58  ;;  %666 = vmatpush.bf16.msrb.mxu1 %v3963_v62  ;;  %v5596_v58 = vld [vmem:[#allocation5 + $0x1ac] sm:$0xf0]  ;;  %v4775_v62 = vor.u32 %v5692_v60, %v4774_v59  ;;  %v6164_v60 = vld [vmem:[%s7048_s4] sm:$0x3] }
  0x52   :  { %v4391_v61 = vor.u32 %v5596_v58, %v4390_v57  ;;  %v5656_v57 = vld [vmem:[#allocation5 + $0x38c] sm:$0xf0] }
  0x53   :  { %685 = vmatpush.bf16.msrb.mxu2 %v3967_v1  ;;  %704 = vmatpush.bf16.msrb.mxu3 %v3971_v2  ;;  %v7062_v1 = vmov 0.0  }
  0x54   :  { %648 = vmatmul.bf16.vlgmr.msrb.gmra.mxu0 %v6087_v35  ;;  %667 = vmatmul.bf16.vlgmr.msrb.gmra.mxu1 %v6087_v35  ;;  %v6134_v2 = vsel %vm134_vm0, 1.0, %v7062_v1 }
  0x55   :  { %2037 = vmatpush.bf16.msra.mxu1 %v4919_v15  ;;  %v5680_v15 = vld [vmem:[#allocation5 + $0x44c] sm:$0xf0] }
  0x56   :  { %686 = vmatmul.bf16.vlgmr.msrb.gmra.mxu2 %v6087_v35  ;;  %705 = vmatmul.bf16.vlgmr.msrb.gmra.mxu3 %v6087_v35  ;;  %v5632_v35 = vld [vmem:[#allocation5 + $0x2cc] sm:$0xf0] }
  0x57   :  { %2056 = vmatpush.bf16.msra.mxu2 %v4539_v7  ;;  %v4535_v14 = vor.u32 %v5632_v35, %v4534_v10  ;;  %2075 = vmatpush.bf16.msra.mxu3 %v4923_v11  ;;  %v4728_v7 = vld [vmem:[#allocation5 + $0x450] sm:$0xf0]  ;;  %v4342_v10 = vld [vmem:[#allocation5 + $0x120] sm:$0xf]  ;;  %v5584_v11 = vld [vmem:[#allocation5 + $0x14c] sm:$0xf0] }
  0x58   :  { %v4731_v9 = vor.u32 %v5674_v6, %v4728_v7  ;;  %v4726_v35 = vld [vmem:[#allocation5 + $0x420] sm:$0xf]  ;;  %v5638_v6 = vld [vmem:[#allocation5 + $0x304] sm:$0xf] }
  0x59   :  { %2018 = vmatpush.bf16.msra.mxu0 %v4535_v14  ;;  %2038 = vmatpush.bf16.msra.mxu1 %v4871_v31  ;;  %v4343_v14 = vor.u32 %v5584_v11, %v4342_v10  ;;  %v4727_v25 = vor.u32 %v5680_v15, %v4726_v35  ;;  %v4683_v31 = vor.u32 %v5662_v27, %v4680_v28  ;;  %v6173_v10 = vperm.slane %v804_v39, 0  ;;  %v4198_v15 = vld [vmem:[#allocation5] sm:$0xf]  ;;  %v5548_v27 = vld [vmem:[#allocation5 + $0x2c] sm:$0xf0] }
  0x5a   :  { %v6175_v11 = vperm.slane %v804_v39, 1  ;;  %v4582_v28 = vld [vmem:[#allocation5 + $0x300] sm:$0xf] }
  0x5b   :  { %2076 = vmatpush.bf16.msra.mxu3 %v4875_v26 }
  0x5d   :  { %2019 = vmatpush.bf16.msra.mxu0 %v4487_v29  ;;  %2039 = vmatpush.bf16.msra.mxu1 %v4823_v48  ;;  %v4632_v48 = vld [vmem:[#allocation5 + $0x390] sm:$0xf0] }
  0x5e   :  { %v4635_v55 = vor.u32 %v5650_v44, %v4632_v48  ;;  %v4542_v48 = vld [vmem:[#allocation5 + $0x2a8] sm:$0xf] }
  0x5f   :  { %2077 = vmatpush.bf16.msra.mxu3 %v4827_v40 }
  0x61   :  { %2020 = vmatpush.bf16.msra.mxu0 %v4439_v43  ;;  %2040 = vmatpush.bf16.msra.mxu1 %v4775_v62  ;;  %v4248_v43 = vld [vmem:[#allocation5 + $0x90] sm:$0xf0] }
  0x62   :  { %v4251_v45 = vor.u32 %v5554_v41, %v4248_v43  ;;  %v4544_v41 = vld [vmem:[#allocation5 + $0x2d8] sm:$0xf0]  ;;  %v5723_v43 = vld [vmem:[#allocation5 + $0x5ac] sm:$0xf] }
  0x63   :  { %2078 = vmatpush.bf16.msra.mxu3 %v4779_v56  ;;  %v4630_v56 = vld [vmem:[#allocation5 + $0x360] sm:$0xf] }
  0x64   :  { %653 = vmatmul.bf16.gmra.mxu0 %v6096_v19  ;;  %672 = vmatmul.bf16.gmra.mxu1 %v6096_v19  ;;  %v4631_v62 = vor.u32 %v5656_v57, %v4630_v56 }
  0x65   :  { %2021 = vmatpush.bf16.msra.mxu0 %v4391_v61  ;;  %2041 = vmatpush.bf16.msra.mxu1 %v4727_v25  ;;  %v4247_v61 = vor.u32 %v5560_v52, %v4246_v49  ;;  %v6181_v25 = vperm.slane %v6164_v60, 0  ;;  %v5633_v49 = vld [vmem:[#allocation5 + $0x2d4] sm:$0xf0] }
  0x66   :  { %691 = vmatmul.bf16.gmra.mxu2 %v6096_v19  ;;  %710 = vmatmul.bf16.gmra.mxu3 %v6096_v19  ;;  %v5614_v19 = vld [vmem:[#allocation5 + $0x244] sm:$0xf]  ;;  %v4543_v57 = vor.u32 %v5633_v49, %v4542_v48  ;;  %v5621_v49 = vld [vmem:[#allocation5 + $0x274] sm:$0xf0] }
  0x67   :  { %v4491_v23 = vor.u32 %v5614_v19, %v4488_v20  ;;  %v5566_v19 = vld [vmem:[#allocation5 + $0xc4] sm:$0xf]  ;;  %v4296_v20 = vld [vmem:[#allocation5 + $0xf0] sm:$0xf0]  ;;  %2079 = vmatpush.bf16.msra.mxu3 %v4731_v9 }
  0x68   :  { %v4299_v26 = vor.u32 %v5566_v19, %v4296_v20 }
  0x69   :  { %2057 = vmatpush.bf16.msra.mxu2 %v4491_v23  ;;  %2022 = vmatpush.bf16.msra.mxu0 %v4343_v14  ;;  %v4584_v14 = vld [vmem:[#allocation5 + $0x330] sm:$0xf0] }
  0x6b   :  { %2080 = vmatpush.bf16.msra.mxu3 %v4683_v31 }
  0x6d   :  { %2058 = vmatpush.bf16.msra.mxu2 %v4443_v37  ;;  %v4678_v37 = vld [vmem:[#allocation5 + $0x3c0] sm:$0xf]  ;;  %2023 = vmatpush.bf16.msra.mxu0 %v4295_v36  ;;  %v4199_v36 = vor.u32 %v5548_v27, %v4198_v15  ;;  %v5615_v15 = vld [vmem:[#allocation5 + $0x24c] sm:$0xf] }
  0x6e   :  { %v4679_v40 = vor.u32 %v5668_v38, %v4678_v37  ;;  %v5644_v37 = vld [vmem:[#allocation5 + $0x32c] sm:$0xf0]  ;;  %v5711_v27 = vld [vmem:[#allocation5 + $0x54c] sm:$0xf] }
  0x6f   :  { %2081 = vmatpush.bf16.msra.mxu3 %v4635_v55  ;;  %v4583_v39 = vor.u32 %v5644_v37, %v4582_v28  ;;  %v6203_v55 = vperm.slane %v840_v33, 0 }
  0x70   :  { %2042 = vmatpush.bf16.msra.mxu1 %v4679_v40  ;;  %v5627_v40 = vld [vmem:[#allocation5 + $0x2ac] sm:$0xf] }
  0x71   :  { %2059 = vmatpush.bf16.msra.mxu2 %v4395_v54  ;;  %v6157_v54 = vperm.slane %v790_v34, 1  ;;  %v6194_v34 = vadd.s32 8, %v6128_v50  ;;  %2024 = vmatpush.bf16.msra.mxu0 %v4247_v61  ;;  %v4547_v44 = vor.u32 %v5627_v40, %v4544_v41  ;;  %v4926_v61 = vld [vmem:[#allocation5 + $0x5a8] sm:$0xf] }
  0x72   :  { %v4494_v40 = vld [vmem:[#allocation5 + $0x248] sm:$0xf] }
  0x73   :  { %vm127_vm3 = vcmp.lt.s32.totalorder %v6194_v34, 15  ;;  %vm117_vm7 = vcmp.lt.s32.totalorder %v6194_v34, 14  ;;  %vm107_vm11 = vcmp.lt.s32.totalorder %v6194_v34, 13 }
  0x74   :  { %2043 = vmatpush.bf16.msra.mxu1 %v4631_v62  ;;  %v5729_v62 = vld [vmem:[#allocation5 + $0x5d4] sm:$0xf0] }
  0x75   :  { %2060 = vmatpush.bf16.msra.mxu2 %v4347_v5  ;;  %v4200_v5 = vld [vmem:[#allocation5 + $0x30] sm:$0xf0]  ;;  %2025 = vmatpush.bf16.msra.mxu0 %v4199_v36 }
  0x76   :  { %v4203_v35 = vor.u32 %v5542_v0, %v4200_v5  ;;  %v6206_v5 = vperm.slane %v840_v33, 1 }
  0x78   :  { %2044 = vmatpush.bf16.msra.mxu1 %v4583_v39  ;;  %v4880_v39 = vld [vmem:[#allocation5 + $0x578] sm:$0xf0] }
  0x79   :  { %2061 = vmatpush.bf16.msra.mxu2 %v4299_v26  ;;  %v4587_v26 = vor.u32 %v5638_v6, %v4584_v14  ;;  %v4927_v6 = vor.u32 %v5729_v62, %v4926_v61  ;;  %2094 = vmatpush.bf16.msrb.mxu0 %v4543_v57  ;;  %v4883_v48 = vor.u32 %v5711_v27, %v4880_v39  ;;  %v5717_v62 = vld [vmem:[#allocation5 + $0x574] sm:$0xf0]  ;;  %v5603_v27 = vld [vmem:[#allocation5 + $0x1ec] sm:$0xf] }
  0x7b   :  { %2082 = vmatpush.bf16.msra.mxu3 %v4587_v26  ;;  %v4496_v26 = vld [vmem:[#allocation5 + $0x278] sm:$0xf0] }
  0x7c   :  { %2113 = vmatpush.bf16.msrb.mxu1 %v4927_v6 }
  0x7d   :  { %2062 = vmatpush.bf16.msra.mxu2 %v4251_v45  ;;  %v4928_v45 = vld [vmem:[#allocation5 + $0x5d8] sm:$0xf0] }
  0x7e   :  { %v4931_v56 = vor.u32 %v5723_v43, %v4928_v45 }
  0x80   :  { %2151 = vmatpush.bf16.msrb.mxu3 %v4931_v56  ;;  %v4878_v56 = vld [vmem:[#allocation5 + $0x548] sm:$0xf] }
  0x81   :  { %2063 = vmatpush.bf16.msra.mxu2 %v4203_v35 }
  0x84   :  { %2152 = vmatpush.bf16.msrb.mxu3 %v4883_v48 }
  0x85   :  { %2132 = vmatpush.bf16.msrb.mxu2 %v4547_v44 }
  0xb1   :  { %v6110_v3 = vpop.f32.mrf.mxu0  ;;  %v6112_v4 = vpop.f32.mrf.mxu1 }
  0xb2   :  { %v716_v21 = vrot.slane %v6110_v3, 7  ;;  %v717_v23 = vrot.slane %v6112_v4, 7  ;;  %v5597_v4 = vld [vmem:[#allocation5 + $0x1b4] sm:$0xf0] }
  0xb9   :  { %v6114_v16 = vpop.f32.mrf.mxu2  ;;  %v6116_v17 = vpop.f32.mrf.mxu3 }
  0xba   :  { %v6118_v18 = vpop.f32.mrf.mxu0  ;;  %v6120_v22 = vpop.f32.mrf.mxu1 }
  0xbb   :  { %v718_v29 = vrot.slane %v6118_v18, 7  ;;  %v719_v30 = vrot.slane %v6120_v22, 7 }
  0xbd   :  { %v730_v3 = vsel %vm724_vm1, %v717_v23, %v719_v30 }
  0xc1   :  { %v6122_v42 = vpop.f32.mrf.mxu2  ;;  %v6124_v46 = vpop.f32.mrf.mxu3 }
  0xc2   :  { %v6126_v47 = vpop.f32.mrf.mxu0  ;;  %v6130_v51 = vpop.f32.mrf.mxu1 }
  0xc3   :  { %v720_v19 = vrot.slane %v6126_v47, 7  ;;  %v721_v31 = vrot.slane %v6130_v51, 7 }
  0xc5   :  { %v727_v35 = vsel %vm724_vm1, %v718_v29, %v720_v19  ;;  %v728_v28 = vsel %vm724_vm1, %v719_v30, %v721_v31 }
  0xc6   :  { %v737_v39 = vmul.f32 %v6134_v2, %v727_v35  ;;  %v5705_v35 = vld [vmem:[#allocation5 + $0x514] sm:$0xf0]  ;;  %v738_v18 = vmul.f32 %v6134_v2, %v728_v28 }
  0xc9   :  { %v6136_v8 = vpop.f32.mrf.mxu2  ;;  %v6138_v12 = vpop.f32.mrf.mxu3 }
  0xca   :  { %v6140_v13 = vpop.f32.mrf.mxu0  ;;  %v6144_v24 = vpop.f32.mrf.mxu1 }
  0xcb   :  { %v722_v58 = vrot.slane %v6140_v13, 7  ;;  %v723_v59 = vrot.slane %v6144_v24, 7 }
  0xcd   :  { %v731_v32 = vsel %vm724_vm1, %v722_v58, %v716_v21  ;;  %v732_v38 = vsel %vm724_vm1, %v723_v59, %v717_v23  ;;  %v6273_v23 = vadd.f32 %v737_v39, %v6136_v8  ;;  %v726_v47 = vsel %vm724_vm1, %v721_v31, %v723_v59  ;;  %v4352_v31 = vld [vmem:[#allocation5 + $0x158] sm:$0xf0] }
  0xce   :  { %v733_v52 = vmul.f32 %v6134_v2, %v731_v32  ;;  %v734_v0 = vmul.f32 %v6134_v2, %v732_v38  ;;  %v4499_v38 = vor.u32 %v5615_v15, %v4496_v26  ;;  %v4879_v26 = vor.u32 %v5717_v62, %v4878_v56 }
  0xd0   :  { %v749_v43 = vadd.f32 %v733_v52, %v6114_v16  ;;  %v750_v61 = vadd.f32 %v734_v0, %v6116_v17  ;;  %v6244_v16 = vsel %vm127_vm3, 1.0, %v7062_v1  ;;  %v4495_v52 = vor.u32 %v5621_v49, %v4494_v40  ;;  %2133 = vmatpush.bf16.msrb.mxu2 %v4499_v38  ;;  %v4448_v17 = vld [vmem:[#allocation5 + $0x218] sm:$0xf0]  ;;  %v5699_v0 = vld [vmem:[#allocation5 + $0x4ec] sm:$0xf]  ;;  %2114 = vmatpush.bf16.msrb.mxu1 %v4879_v26 }
  0xd1   :  { %v6169_v7 = vpop.f32.mrf.mxu2  ;;  %v6178_v20 = vpop.f32.mrf.mxu3  ;;  %v4451_v40 = vor.u32 %v5603_v27, %v4448_v17  ;;  %v4832_v49 = vld [vmem:[#allocation5 + $0x518] sm:$0xf0]  ;;  %v729_v38 = vsel %vm724_vm1, %v716_v21, %v718_v29  ;;  %v752_v26 = vadd.f32 %v730_v3, %v6124_v46  ;;  %v4734_v3 = vld [vmem:[#allocation5 + $0x428] sm:$0xf] }
  0xd2   :  { %v6166_v63 = vpop.f32.mrf.mxu0  ;;  %v6171_v9 = vpop.f32.mrf.mxu1  ;;  %2095 = vmatpush.bf16.msrb.mxu0 %v4495_v52  ;;  %v4835_v56 = vor.u32 %v5699_v0, %v4832_v49  ;;  %v751_v52 = vadd.f32 %v729_v38, %v6122_v42  ;;  %v4400_v29 = vld [vmem:[#allocation5 + $0x1b8] sm:$0xf0]  ;;  %v4398_v42 = vld [vmem:[#allocation5 + $0x188] sm:$0xf] }
  0xd3   :  { %v757_v32 = vrot.slane %v6166_v63, 1  ;;  %v7064_v41 = vrot.slane %v6171_v9, 1  ;;  %v4782_v0 = vld [vmem:[#allocation5 + $0x488] sm:$0xf]  ;;  %v4399_v8 = vor.u32 %v5597_v4, %v4398_v42  ;;  %v5663_v4 = vld [vmem:[#allocation5 + $0x3cc] sm:$0xf] }
  0xd4   :  { %2134 = vmatpush.bf16.msrb.mxu2 %v4451_v40  ;;  %2153 = vmatpush.bf16.msrb.mxu3 %v4835_v56  ;;  %v725_v40 = vsel %vm724_vm1, %v720_v19, %v722_v58  ;;  %v5579_v19 = vld [vmem:[#allocation5 + $0x12c] sm:$0xf]  ;;  %v4640_v63 = vld [vmem:[#allocation5 + $0x398] sm:$0xf0] }
  0xd5   :  { %v4355_v38 = vor.u32 %v5579_v19, %v4352_v31 }
  0xd9   :  { %v6227_v37 = vpop.f32.mrf.mxu2  ;;  %v6232_v45 = vpop.f32.mrf.mxu3 }
  0xda   :  { %v6215_v14 = vpop.f32.mrf.mxu0  ;;  %v6225_v36 = vpop.f32.mrf.mxu1  ;;  %v6328_v56 = vadd.f32 %v6206_v5, %v6232_v45 }
  0xdb   :  { %v759_v33 = vrot.slane %v6215_v14, 1  ;;  %v760_v44 = vrot.slane %v6225_v36, 1  ;;  %v6316_v14 = vadd.f32 %v726_v47, %v6178_v20  ;;  %v4736_v36 = vld [vmem:[#allocation5 + $0x458] sm:$0xf0]  ;;  %v4686_v47 = vld [vmem:[#allocation5 + $0x3c8] sm:$0xf] }
  0xdd   :  { %v770_v57 = vsel %vm765_vm2, %v757_v32, %v759_v33  ;;  %v771_v15 = vsel %vm765_vm2, %v7064_v41, %v760_v44  ;;  %v4830_v41 = vld [vmem:[#allocation5 + $0x4e8] sm:$0xf] }
  0xde   :  { %v782_v6 = vadd.f32 %v770_v57, %v749_v43  ;;  %v783_v1 = vadd.f32 %v771_v15, %v750_v61  ;;  %v4446_v43 = vld [vmem:[#allocation5 + $0x1e8] sm:$0xf]  ;;  %v5609_v57 = vld [vmem:[#allocation5 + $0x214] sm:$0xf0]  ;;  %v5591_v61 = vld [vmem:[#allocation5 + $0x18c] sm:$0xf]  ;;  %v4831_v21 = vor.u32 %v5705_v35, %v4830_v41 }
  0xdf   :  { %v4447_v62 = vor.u32 %v5609_v57, %v4446_v43  ;;  %v4784_v15 = vld [vmem:[#allocation5 + $0x4b8] sm:$0xf0]  ;;  %v4403_v22 = vor.u32 %v5591_v61, %v4400_v29  ;;  %v6287_v43 = vadd.f32 %v738_v18, %v6138_v12  ;;  %v6290_v57 = vadd.f32 %v725_v40, %v6169_v7  ;;  %v4350_v35 = vld [vmem:[#allocation5 + $0x128] sm:$0xf]  ;;  %v5585_v61 = vld [vmem:[#allocation5 + $0x154] sm:$0xf0] }
  0xe0   :  { %v796_v48 = vadd.f32 %v6155_v53, %v782_v6  ;;  %v5687_v6 = vld [vmem:[#allocation5 + $0x48c] sm:$0xf]  ;;  %v797_v27 = vadd.f32 %v6157_v54, %v783_v1  ;;  %v5693_v1 = vld [vmem:[#allocation5 + $0x4b4] sm:$0xf0]  ;;  %2115 = vmatpush.bf16.msrb.mxu1 %v4831_v21  ;;  %v6306_v7 = vperm.slane %v6164_v60, 1 }
  0xe1   :  { %2096 = vmatpush.bf16.msrb.mxu0 %v4447_v62  ;;  %v4787_v46 = vor.u32 %v5687_v6, %v4784_v15  ;;  %v4783_v39 = vor.u32 %v5693_v1, %v4782_v0  ;;  %v689_v58 = vpop.f32.mrf.mxu2  ;;  %v708_v59 = vpop.f32.mrf.mxu3  ;;  %2135 = vmatpush.bf16.msrb.mxu2 %v4403_v22  ;;  %v4351_v6 = vor.u32 %v5585_v61, %v4350_v35  ;;  %v5681_v15 = vld [vmem:[#allocation5 + $0x454] sm:$0xf0]  ;;  %v4688_v0 = vld [vmem:[#allocation5 + $0x3f8] sm:$0xf0]  ;;  %v7067_v35 = vrot.slane %v6171_v9, 1 }
  0xe2   :  { %v6270_v17 = vpop.f32.mrf.mxu0  ;;  %v810_v30 = vmul.f32 %v6173_v10, %v796_v48  ;;  %v6277_v41 = vpop.f32.mrf.mxu1  ;;  %v811_v12 = vmul.f32 %v6175_v11, %v797_v27  ;;  %v5675_v48 = vld [vmem:[#allocation5 + $0x42c] sm:$0xf]  ;;  %v848_v21 = vadd.f32 %v6203_v55, %v689_v58  ;;  %v6332_v29 = vadd.f32 %v6206_v5, %v708_v59  ;;  %v4304_v27 = vld [vmem:[#allocation5 + $0xf8] sm:$0xf0] }
  0xe3   :  { %v761_v28 = vrot.slane %v6270_v17, 1  ;;  %v762_v49 = vrot.slane %v6277_v41, 1  ;;  %2154 = vmatpush.bf16.msrb.mxu3 %v4787_v46  ;;  %v4739_v20 = vor.u32 %v5675_v48, %v4736_v36  ;;  %v4735_v42 = vor.u32 %v5681_v15, %v4734_v3 }
  0xe4   :  { %v6319_v60 = vadd.f32 %v6181_v25, %v810_v30  ;;  %2116 = vmatpush.bf16.msrb.mxu1 %v4783_v39  ;;  %v825_v22 = vadd.f32 %v6306_v7, %v811_v12  ;;  %v5573_v39 = vld [vmem:[#allocation5 + $0xf4] sm:$0xf0]  ;;  %v4691_v12 = vor.u32 %v5663_v4, %v4688_v0  ;;  %v4638_v0 = vld [vmem:[#allocation5 + $0x368] sm:$0xf] }
  0xe5   :  { %v768_v13 = vsel %vm765_vm2, %v759_v33, %v761_v28  ;;  %v769_v51 = vsel %vm765_vm2, %v760_v44, %v762_v49  ;;  %2097 = vmatpush.bf16.msrb.mxu0 %v4399_v8  ;;  %v6324_v44 = vadd.f32 %v6203_v55, %v6227_v37  ;;  %v5567_v37 = vld [vmem:[#allocation5 + $0xcc] sm:$0xf]  ;;  %2136 = vmatpush.bf16.msrb.mxu2 %v4355_v38  ;;  %v5561_v4 = vld [vmem:[#allocation5 + $0x94] sm:$0xf0] }
  0xe6   :  { %v776_v24 = vmul.f32 %v6244_v16, %v768_v13  ;;  %v777_v33 = vmul.f32 %v6244_v16, %v769_v51  ;;  %v832_v30 = vmax.f32 %v6319_v60, 0.0  ;;  %v4307_v8 = vor.u32 %v5567_v37, %v4304_v27  ;;  %v5669_v51 = vld [vmem:[#allocation5 + $0x3f4] sm:$0xf0] }
  0xe7   :  { %2155 = vmatpush.bf16.msrb.mxu3 %v4739_v20  ;;  %v4687_v60 = vor.u32 %v5669_v51, %v4686_v47  ;;  %v833_v20 = vmax.f32 %v825_v22, 0.0  ;;  %v4592_v47 = vld [vmem:[#allocation5 + $0x338] sm:$0xf0]  ;;  %v5645_v51 = vld [vmem:[#allocation5 + $0x334] sm:$0xf0] }
  0xe8   :  { %v784_v62 = vadd.f32 %v776_v24, %v751_v52  ;;  %v785_v18 = vadd.f32 %v777_v33, %v752_v26  ;;  %v4302_v26 = vld [vmem:[#allocation5 + $0xc8] sm:$0xf]  ;;  %2117 = vmatpush.bf16.msrb.mxu1 %v4735_v42  ;;  %v5555_v33 = vld [vmem:[#allocation5 + $0x6c] sm:$0xf]  ;;  %v854_v9 = vadd.f32 %v6324_v44, %v832_v30 }
  0xe9   :  { %2098 = vmatpush.bf16.msrb.mxu0 %v4351_v6  ;;  %v4303_v24 = vor.u32 %v5573_v39, %v4302_v26  ;;  %2137 = vmatpush.bf16.msrb.mxu2 %v4307_v8  ;;  %v6366_v15 = vpop.f32.mrf.mxu3  ;;  %v5657_v26 = vld [vmem:[#allocation5 + $0x394] sm:$0xf0]  ;;  %v5543_v30 = vld [vmem:[#allocation5 + $0xc] sm:$0xf] }
  0xea   :  { %v798_v45 = vadd.f32 %v6155_v53, %v784_v62  ;;  %v656_v52 = vpop.f32.mrf.mxu0  ;;  %v799_v46 = vadd.f32 %v6157_v54, %v785_v18  ;;  %v675_v40 = vpop.f32.mrf.mxu1  ;;  %v5651_v62 = vld [vmem:[#allocation5 + $0x36c] sm:$0xf] }
  0xeb   :  { %v763_v1 = vrot.slane %v656_v52, 1  ;;  %v764_v58 = vrot.slane %v675_v40, 1  ;;  %2156 = vmatpush.bf16.msrb.mxu3 %v4691_v12  ;;  %v4643_v22 = vor.u32 %v5651_v62, %v4640_v63  ;;  %v4208_v40 = vld [vmem:[#allocation5 + $0x38] sm:$0xf0]  ;;  %v5639_v8 = vld [vmem:[#allocation5 + $0x30c] sm:$0xf]  ;;  %v4639_v12 = vor.u32 %v5657_v26, %v4638_v0 }
  0xec   :  { %v812_v13 = vmul.f32 %v6173_v10, %v798_v45  ;;  %v813_v59 = vmul.f32 %v6175_v11, %v799_v46  ;;  %2118 = vmatpush.bf16.msrb.mxu1 %v4687_v60  ;;  %v855_v46 = vadd.f32 %v6328_v56, %v833_v20  ;;  %v4206_v56 = vld [vmem:[#allocation5 + $0x8] sm:$0xf]  ;;  %v4550_v63 = vld [vmem:[#allocation5 + $0x2b0] sm:$0xf]  ;;  %v5634_v20 = vld [vmem:[#allocation5 + $0x2dc] sm:$0xf0] }
  0xed   :  { %v766_v19 = vsel %vm765_vm2, %v761_v28, %v763_v1  ;;  %v772_v31 = vsel %vm765_vm2, %v763_v1, %v757_v32  ;;  %v767_v17 = vsel %vm765_vm2, %v762_v49, %v764_v58  ;;  %v4256_v28 = vld [vmem:[#allocation5 + $0x98] sm:$0xf0]  ;;  %v773_v61 = vsel %vm765_vm2, %v764_v58, %v7067_v35  ;;  %2099 = vmatpush.bf16.msrb.mxu0 %v4303_v24  ;;  %v4590_v24 = vld [vmem:[#allocation5 + $0x308] sm:$0xf]  ;;  %v4886_v0 = vld [vmem:[#allocation5 + $0x550] sm:$0xf] }
  0xee   :  { %v826_v38 = vadd.f32 %v6181_v25, %v812_v13  ;;  %v780_v48 = vmul.f32 %v6244_v16, %v772_v31  ;;  %v786_v36 = vadd.f32 %v766_v19, %v6273_v23  ;;  %v827_v32 = vadd.f32 %v6306_v7, %v813_v59  ;;  %v6361_v23 = vpop.f32.mrf.mxu2  ;;  %v5549_v13 = vld [vmem:[#allocation5 + $0x34] sm:$0xf0]  ;;  %v5628_v19 = vld [vmem:[#allocation5 + $0x2b4] sm:$0xf]  ;;  %v4552_v31 = vld [vmem:[#allocation5 + $0x2e0] sm:$0xf0] }
  0xef   :  { %v787_v3 = vadd.f32 %v767_v17, %v6287_v43  ;;  %v781_v18 = vmul.f32 %v6244_v16, %v773_v61  ;;  %v4259_v27 = vor.u32 %v5555_v33, %v4256_v28  ;;  %v4254_v43 = vld [vmem:[#allocation5 + $0x68] sm:$0xf]  ;;  %2157 = vmatpush.bf16.msrb.mxu3 %v4643_v22  ;;  %v4595_v33 = vor.u32 %v5639_v8, %v4592_v47  ;;  %v4934_v61 = vld [vmem:[#allocation5 + $0x5b0] sm:$0xf]  ;;  %v5718_v26 = vld [vmem:[#allocation5 + $0x57c] sm:$0xf0] }
  0xf0   :  { %v834_v41 = vmax.f32 %v826_v38, 0.0  ;;  %v788_v49 = vadd.f32 %v780_v48, %v6290_v57  ;;  %v800_v6 = vadd.f32 %v6155_v53, %v786_v36  ;;  %v835_v37 = vmax.f32 %v827_v32, 0.0  ;;  %v5724_v48 = vld [vmem:[#allocation5 + $0x5b4] sm:$0xf]  ;;  %v4936_v36 = vld [vmem:[#allocation5 + $0x5e0] sm:$0xf0]  ;;  %2119 = vmatpush.bf16.msrb.mxu1 %v4639_v12 }
  0xf1   :  { %v789_v52 = vadd.f32 %v781_v18, %v6316_v14  ;;  %v801_v44 = vadd.f32 %v6157_v54, %v787_v3  ;;  %2138 = vmatpush.bf16.msrb.mxu2 %v4259_v27  ;;  %v4255_v58 = vor.u32 %v5561_v4, %v4254_v43  ;;  %v4207_v38 = vor.u32 %v5549_v13, %v4206_v56  ;;  %v5730_v3 = vld [vmem:[#allocation5 + $0x5dc] sm:$0xf0]  ;;  %v713_v18 = vpop.f32.mrf.mxu3  ;;  %v5712_v27 = vld [vmem:[#allocation5 + $0x554] sm:$0xf]  ;;  %v4840_v8 = vld [vmem:[#allocation5 + $0x520] sm:$0xf0] }
  0xf2   :  { %v856_v45 = vadd.f32 %v848_v21, %v834_v41  ;;  %v814_v42 = vmul.f32 %v6173_v10, %v800_v6  ;;  %v802_v57 = vadd.f32 %v6155_v53, %v788_v49  ;;  %v857_v1 = vadd.f32 %v6332_v29, %v835_v37  ;;  %v5616_v41 = vld [vmem:[#allocation5 + $0x254] sm:$0xf]  ;;  %v4504_v37 = vld [vmem:[#allocation5 + $0x280] sm:$0xf0]  ;;  %v4454_v47 = vld [vmem:[#allocation5 + $0x1f0] sm:$0xf] }
  0xf3   :  { %v803_v39 = vadd.f32 %v6157_v54, %v789_v52  ;;  %v4211_v54 = vor.u32 %v5543_v30, %v4208_v40  ;;  %v815_v60 = vmul.f32 %v6175_v11, %v801_v44  ;;  %2100 = vmatpush.bf16.msrb.mxu0 %v4255_v58  ;;  %v4591_v28 = vor.u32 %v5645_v51, %v4590_v24  ;;  %v4502_v52 = vld [vmem:[#allocation5 + $0x250] sm:$0xf]  ;;  %v5700_v40 = vld [vmem:[#allocation5 + $0x4f4] sm:$0xf]  ;;  %v5610_v56 = vld [vmem:[#allocation5 + $0x21c] sm:$0xf0] }
  0xf4   :  { %v6375_v21 = vpack.c.bf16 %v856_v45, %v854_v9  ;;  %v6378_v14 = vadd.f32 %v6181_v25, %v814_v42  ;;  %v816_v53 = vmul.f32 %v6173_v10, %v802_v57  ;;  %v6382_v29 = vpack.c.bf16 %v857_v1, %v855_v46  ;;  %2158 = vmatpush.bf16.msrb.mxu3 %v4595_v33  ;;  %v4888_v45 = vld [vmem:[#allocation5 + $0x580] sm:$0xf0]  ;;  %v5622_v42 = vld [vmem:[#allocation5 + $0x27c] sm:$0xf0]  ;;  %v5604_v46 = vld [vmem:[#allocation5 + $0x1f4] sm:$0xf] }
  0xf5   :  { %v817_v10 = vmul.f32 %v6175_v11, %v803_v39  ;;  %v4555_v62 = vor.u32 %v5628_v19, %v4552_v31  ;;  %2139 = vmatpush.bf16.msrb.mxu2 %v4211_v54  ;;  %v4939_v11 = vor.u32 %v5724_v48, %v4936_v36  ;;  %v4551_v35 = vor.u32 %v5634_v20, %v4550_v63  ;;  %v4838_v13 = vld [vmem:[#allocation5 + $0x4f0] sm:$0xf]  ;;  %v5706_v51 = vld [vmem:[#allocation5 + $0x51c] sm:$0xf0]  ;;  %v4408_v54 = vld [vmem:[#allocation5 + $0x1c0] sm:$0xf0] }
  0xf6   :  { %2026 = vmatmul.bf16.vlgmr.msra.gmra.mxu0 %v6375_v21  ;;  %2064 = vmatmul.bf16.vlgmr.msra.gmra.mxu2 %v6375_v21  ;;  %v6387_v59 = vadd.f32 %v6181_v25, %v816_v53  ;;  %v836_v17 = vmax.f32 %v6378_v14, 0.0  ;;  %v694_v32 = vpop.f32.mrf.mxu2  ;;  %v4935_v9 = vor.u32 %v5730_v3, %v4934_v61  ;;  %v829_v22 = vadd.f32 %v6306_v7, %v815_v60  ;;  %v4792_v60 = vld [vmem:[#allocation5 + $0x4c0] sm:$0xf0]  ;;  %v4406_v33 = vld [vmem:[#allocation5 + $0x190] sm:$0xf] }
  0xf7   :  { %2045 = vmatmul.bf16.vlgmr.msra.gmra.mxu1 %v6382_v29  ;;  %2083 = vmatmul.bf16.vlgmr.msra.gmra.mxu3 %v6382_v29  ;;  %v831_v25 = vadd.f32 %v6306_v7, %v817_v10  ;;  %v4507_v43 = vor.u32 %v5616_v41, %v4504_v37  ;;  %v852_v57 = vadd.f32 %v6203_v55, %v694_v32  ;;  %v4456_v7 = vld [vmem:[#allocation5 + $0x220] sm:$0xf0]  ;;  %v5592_v10 = vld [vmem:[#allocation5 + $0x194] sm:$0xf]  ;;  %v5598_v48 = vld [vmem:[#allocation5 + $0x1bc] sm:$0xf0] }
  0xf8   :  { %v838_v49 = vmax.f32 %v6387_v59, 0.0  ;;  %2227 = vmatpush.bf16.msra.mxu3 %v4939_v11  ;;  %2101 = vmatpush.bf16.msrb.mxu0 %v4207_v38  ;;  %v4891_v4 = vor.u32 %v5712_v27, %v4888_v45  ;;  %v853_v1 = vadd.f32 %v6206_v5, %v713_v18  ;;  %v4503_v44 = vor.u32 %v5622_v42, %v4502_v52  ;;  %v5580_v14 = vld [vmem:[#allocation5 + $0x134] sm:$0xf]  ;;  %v4358_v61 = vld [vmem:[#allocation5 + $0x130] sm:$0xf] }
  0xf9   :  { %v839_v6 = vmax.f32 %v831_v25, 0.0  ;;  %2208 = vmatpush.bf16.msra.mxu2 %v4555_v62  ;;  %2120 = vmatpush.bf16.msrb.mxu1 %v4591_v28  ;;  %v4887_v30 = vor.u32 %v5718_v26, %v4886_v0  ;;  %v850_v53 = vadd.f32 %v6203_v55, %v6361_v23  ;;  %v4459_v39 = vor.u32 %v5604_v46, %v4456_v7  ;;  %v5688_v23 = vld [vmem:[#allocation5 + $0x494] sm:$0xf]  ;;  %v5586_v3 = vld [vmem:[#allocation5 + $0x15c] sm:$0xf0] }
  0xfa   :  { %v837_v58 = vmax.f32 %v829_v22, 0.0  ;;  %v851_v12 = vadd.f32 %v6206_v5, %v6366_v15  ;;  %v4843_v24 = vor.u32 %v5700_v40, %v4840_v8  ;;  %v860_v59 = vadd.f32 %v852_v57, %v838_v49  ;;  %v4790_v5 = vld [vmem:[#allocation5 + $0x490] sm:$0xf]  ;;  %v5694_v15 = vld [vmem:[#allocation5 + $0x4bc] sm:$0xf0] }
  0xfb   :  { %v861_v19 = vadd.f32 %v853_v1, %v839_v6  ;;  %v4455_v31 = vor.u32 %v5610_v56, %v4454_v47  ;;  %v4839_v55 = vor.u32 %v5706_v51, %v4838_v13  ;;  %v858_v38 = vadd.f32 %v850_v53, %v836_v17  ;;  %v4360_v17 = vld [vmem:[#allocation5 + $0x160] sm:$0xf0]  ;;  %v5676_v11 = vld [vmem:[#allocation5 + $0x434] sm:$0xf]  ;;  %v4742_v18 = vld [vmem:[#allocation5 + $0x430] sm:$0xf] }
  0xfc   :  { %2170 = vmatpush.bf16.msra.mxu0 %v4551_v35  ;;  %2228 = vmatpush.bf16.msra.mxu3 %v4891_v4  ;;  %v859_v36 = vadd.f32 %v851_v12, %v837_v58  ;;  %v4411_v28 = vor.u32 %v5592_v10, %v4408_v54  ;;  %v4795_v62 = vor.u32 %v5688_v23, %v4792_v60  ;;  %v4744_v35 = vld [vmem:[#allocation5 + $0x460] sm:$0xf0]  ;;  %v5682_v6 = vld [vmem:[#allocation5 + $0x45c] sm:$0xf0]  ;;  %v4310_v52 = vld [vmem:[#allocation5 + $0xd0] sm:$0xf] }
  0xfd   :  { %2189 = vmatpush.bf16.msra.mxu1 %v4935_v9  ;;  %2209 = vmatpush.bf16.msra.mxu2 %v4507_v43  ;;  %v6405_v25 = vpack.c.bf16 %v860_v59, %v858_v38  ;;  %v4407_v20 = vor.u32 %v5598_v48, %v4406_v33  ;;  %v4791_v32 = vor.u32 %v5694_v15, %v4790_v5  ;;  %v5568_v9 = vld [vmem:[#allocation5 + $0xd4] sm:$0xf]  ;;  %v4312_v22 = vld [vmem:[#allocation5 + $0x100] sm:$0xf0]  ;;  %v5574_v42 = vld [vmem:[#allocation5 + $0xfc] sm:$0xf0] }
  0xfe   :  { %v6407_v63 = vpack.c.bf16 %v861_v19, %v859_v36  ;;  %v4363_v41 = vor.u32 %v5580_v14, %v4360_v17  ;;  %v4747_v49 = vor.u32 %v5676_v11, %v4744_v35  ;;  %v4359_v37 = vor.u32 %v5586_v3, %v4358_v61  ;;  %v5664_v43 = vld [vmem:[#allocation5 + $0x3d4] sm:$0xf]  ;;  %v4696_v45 = vld [vmem:[#allocation5 + $0x400] sm:$0xf0]  ;;  %v4694_v57 = vld [vmem:[#allocation5 + $0x3d0] sm:$0xf] }
  0xff   :  { %v4743_v27 = vor.u32 %v5682_v6, %v4742_v18  ;;  %v5670_v4 = vld [vmem:[#allocation5 + $0x3fc] sm:$0xf0]  ;;  %v4315_v0 = vor.u32 %v5568_v9, %v4312_v22  ;;  %v4699_v26 = vor.u32 %v5664_v43, %v4696_v45  ;;  %v5556_v46 = vld [vmem:[#allocation5 + $0x74] sm:$0xf]  ;;  %v4264_v1 = vld [vmem:[#allocation5 + $0xa0] sm:$0xf0] }
 0x100   :  { %2171 = vmatpush.bf16.msra.mxu0 %v4503_v44  ;;  %2229 = vmatpush.bf16.msra.mxu3 %v4843_v24  ;;  %v4311_v44 = vor.u32 %v5574_v42, %v4310_v52  ;;  %v5652_v7 = vld [vmem:[#allocation5 + $0x374] sm:$0xf]  ;;  %v4648_v40 = vld [vmem:[#allocation5 + $0x3a0] sm:$0xf0]  ;;  %v4262_v8 = vld [vmem:[#allocation5 + $0x70] sm:$0xf]  ;;  %v4267_v56 = vor.u32 %v5556_v46, %v4264_v1 }
 0x101   :  { %2190 = vmatpush.bf16.msra.mxu1 %v4887_v30  ;;  %2210 = vmatpush.bf16.msra.mxu2 %v4459_v39  ;;  %v4695_v30 = vor.u32 %v5670_v4, %v4694_v57  ;;  %v5562_v53 = vld [vmem:[#allocation5 + $0x9c] sm:$0xf0]  ;;  %v4646_v39 = vld [vmem:[#allocation5 + $0x370] sm:$0xf]  ;;  %v4651_v13 = vor.u32 %v5652_v7, %v4648_v40  ;;  %v5544_v58 = vld [vmem:[#allocation5 + $0x14] sm:$0xf] }
 0x102   :  { %v5658_v47 = vld [vmem:[#allocation5 + $0x39c] sm:$0xf0]  ;;  %v4216_v12 = vld [vmem:[#allocation5 + $0x40] sm:$0xf0]  ;;  %v4263_v24 = vor.u32 %v5562_v53, %v4262_v8  ;;  %v5640_v59 = vld [vmem:[#allocation5 + $0x314] sm:$0xf] }
 0x103   :  { %v4647_v51 = vor.u32 %v5658_v47, %v4646_v39  ;;  %v4600_v10 = vld [vmem:[#allocation5 + $0x340] sm:$0xf0]  ;;  %v4214_v54 = vld [vmem:[#allocation5 + $0x10] sm:$0xf]  ;;  %v5550_v19 = vld [vmem:[#allocation5 + $0x3c] sm:$0xf0]  ;;  %v4219_v23 = vor.u32 %v5544_v58, %v4216_v12 }
 0x104   :  { %2172 = vmatpush.bf16.msra.mxu0 %v4455_v31  ;;  %2230 = vmatpush.bf16.msra.mxu3 %v4795_v62  ;;  %v4598_v31 = vld [vmem:[#allocation5 + $0x310] sm:$0xf]  ;;  %v4603_v60 = vor.u32 %v5640_v59, %v4600_v10  ;;  %v4215_v33 = vor.u32 %v5550_v19, %v4214_v54  ;;  %v5629_v48 = vld [vmem:[#allocation5 + $0x2bc] sm:$0xf]  ;;  %v4560_v5 = vld [vmem:[#allocation5 + $0x2e8] sm:$0xf0] }
 0x105   :  { %2191 = vmatpush.bf16.msra.mxu1 %v4839_v55  ;;  %2211 = vmatpush.bf16.msra.mxu2 %v4411_v28  ;;  %v5646_v55 = vld [vmem:[#allocation5 + $0x33c] sm:$0xf0]  ;;  %v5725_v15 = vld [vmem:[#allocation5 + $0x5bc] sm:$0xf]  ;;  %v4563_v36 = vor.u32 %v5629_v48, %v4560_v5  ;;  %v4944_v28 = vld [vmem:[#allocation5 + $0x5e8] sm:$0xf0] }
 0x106   :  { %2031 = vmatmul.bf16.gmra.mxu0 %v6405_v25  ;;  %2069 = vmatmul.bf16.gmra.mxu2 %v6405_v25  ;;  %v4599_v38 = vor.u32 %v5646_v55, %v4598_v31  ;;  %v4558_v62 = vld [vmem:[#allocation5 + $0x2b8] sm:$0xf]  ;;  %v5731_v11 = vld [vmem:[#allocation5 + $0x5e4] sm:$0xf0]  ;;  %v5617_v35 = vld [vmem:[#allocation5 + $0x25c] sm:$0xf] }
 0x107   :  { %2050 = vmatmul.bf16.gmra.mxu1 %v6407_v63  ;;  %2088 = vmatmul.bf16.gmra.mxu3 %v6407_v63  ;;  %v4942_v17 = vld [vmem:[#allocation5 + $0x5b8] sm:$0xf]  ;;  %v4512_v3 = vld [vmem:[#allocation5 + $0x288] sm:$0xf0]  ;;  %v5719_v43 = vld [vmem:[#allocation5 + $0x584] sm:$0xf0] }
 0x108   :  { %2173 = vmatpush.bf16.msra.mxu0 %v4407_v20  ;;  %2231 = vmatpush.bf16.msra.mxu3 %v4747_v49  ;;  %v5635_v20 = vld [vmem:[#allocation5 + $0x2e4] sm:$0xf0]  ;;  %v4943_v61 = vor.u32 %v5731_v11, %v4942_v17  ;;  %v4896_v49 = vld [vmem:[#allocation5 + $0x588] sm:$0xf0]  ;;  %v4515_v18 = vor.u32 %v5617_v35, %v4512_v3  ;;  %v4510_v9 = vld [vmem:[#allocation5 + $0x258] sm:$0xf] }
 0x109   :  { %2192 = vmatpush.bf16.msra.mxu1 %v4791_v32  ;;  %2212 = vmatpush.bf16.msra.mxu2 %v4363_v41  ;;  %v4947_v32 = vor.u32 %v5725_v15, %v4944_v28  ;;  %v4559_v14 = vor.u32 %v5635_v20, %v4558_v62  ;;  %v5713_v41 = vld [vmem:[#allocation5 + $0x55c] sm:$0xf]  ;;  %v4464_v52 = vld [vmem:[#allocation5 + $0x228] sm:$0xf0]  ;;  %v4846_v46 = vld [vmem:[#allocation5 + $0x4f8] sm:$0xf] }
 0x10a   :  { %v4899_v6 = vor.u32 %v5713_v41, %v4896_v49  ;;  %v5605_v45 = vld [vmem:[#allocation5 + $0x1fc] sm:$0xf]  ;;  %v4848_v4 = vld [vmem:[#allocation5 + $0x528] sm:$0xf0]  ;;  %v5707_v1 = vld [vmem:[#allocation5 + $0x524] sm:$0xf0] }
 0x10b   :  { %v5701_v57 = vld [vmem:[#allocation5 + $0x4fc] sm:$0xf]  ;;  %v4847_v40 = vor.u32 %v5707_v1, %v4846_v46  ;;  %v4416_v53 = vld [vmem:[#allocation5 + $0x1c8] sm:$0xf0]  ;;  %v4798_v58 = vld [vmem:[#allocation5 + $0x498] sm:$0xf] }
 0x10c   :  { %2174 = vmatpush.bf16.msra.mxu0 %v4359_v37  ;;  %2232 = vmatpush.bf16.msra.mxu3 %v4699_v26  ;;  %v5623_v37 = vld [vmem:[#allocation5 + $0x284] sm:$0xf0]  ;;  %v5593_v8 = vld [vmem:[#allocation5 + $0x19c] sm:$0xf]  ;;  %v4800_v47 = vld [vmem:[#allocation5 + $0x4c8] sm:$0xf0] }
 0x10d   :  { %2193 = vmatpush.bf16.msra.mxu1 %v4743_v27  ;;  %2213 = vmatpush.bf16.msra.mxu2 %v4315_v0  ;;  %v4894_v27 = vld [vmem:[#allocation5 + $0x558] sm:$0xf]  ;;  %v4511_v22 = vor.u32 %v5623_v37, %v4510_v9  ;;  %v5611_v26 = vld [vmem:[#allocation5 + $0x224] sm:$0xf0]  ;;  %v5689_v39 = vld [vmem:[#allocation5 + $0x49c] sm:$0xf] }
 0x10e   :  { %v4895_v42 = vor.u32 %v5719_v43, %v4894_v27  ;;  %v4462_v0 = vld [vmem:[#allocation5 + $0x1f8] sm:$0xf]  ;;  %v5695_v12 = vld [vmem:[#allocation5 + $0x4c4] sm:$0xf0]  ;;  %v5581_v54 = vld [vmem:[#allocation5 + $0x13c] sm:$0xf] }
 0x10f   :  { %v4463_v7 = vor.u32 %v5611_v26, %v4462_v0  ;;  %v4799_v10 = vor.u32 %v5695_v12, %v4798_v58  ;;  %v4368_v19 = vld [vmem:[#allocation5 + $0x168] sm:$0xf0]  ;;  %v5677_v31 = vld [vmem:[#allocation5 + $0x43c] sm:$0xf]  ;;  %v4750_v48 = vld [vmem:[#allocation5 + $0x438] sm:$0xf] }
 0x110   :  { %2175 = vmatpush.bf16.msra.mxu0 %v4311_v44  ;;  %2233 = vmatpush.bf16.msra.mxu3 %v4651_v13  ;;  %v4467_v44 = vor.u32 %v5605_v45, %v4464_v52  ;;  %v5599_v13 = vld [vmem:[#allocation5 + $0x1c4] sm:$0xf0]  ;;  %v4752_v55 = vld [vmem:[#allocation5 + $0x468] sm:$0xf0]  ;;  %v5569_v15 = vld [vmem:[#allocation5 + $0xdc] sm:$0xf] }
 0x111   :  { %2194 = vmatpush.bf16.msra.mxu1 %v4695_v30  ;;  %2214 = vmatpush.bf16.msra.mxu2 %v4267_v56  ;;  %v4851_v30 = vor.u32 %v5701_v57, %v4848_v4  ;;  %v4414_v56 = vld [vmem:[#allocation5 + $0x198] sm:$0xf]  ;;  %v5683_v5 = vld [vmem:[#allocation5 + $0x464] sm:$0xf0]  ;;  %v4320_v62 = vld [vmem:[#allocation5 + $0x108] sm:$0xf0] }
 0x112   :  { %v4415_v59 = vor.u32 %v5599_v13, %v4414_v56  ;;  %v4751_v28 = vor.u32 %v5683_v5, %v4750_v48  ;;  %v5665_v20 = vld [vmem:[#allocation5 + $0x3dc] sm:$0xf]  ;;  %v5575_v17 = vld [vmem:[#allocation5 + $0x104] sm:$0xf0]  ;;  %v4702_v11 = vld [vmem:[#allocation5 + $0x3d8] sm:$0xf] }
 0x113   :  { %v5671_v35 = vld [vmem:[#allocation5 + $0x404] sm:$0xf0]  ;;  %v5557_v41 = vld [vmem:[#allocation5 + $0x7c] sm:$0xf]  ;;  %v4272_v49 = vld [vmem:[#allocation5 + $0xa8] sm:$0xf0] }
 0x114   :  { %2176 = vmatpush.bf16.msra.mxu0 %v4263_v24  ;;  %2234 = vmatpush.bf16.msra.mxu3 %v4603_v60  ;;  %v4419_v24 = vor.u32 %v5593_v8, %v4416_v53  ;;  %v5587_v60 = vld [vmem:[#allocation5 + $0x164] sm:$0xf0]  ;;  %v5653_v9 = vld [vmem:[#allocation5 + $0x37c] sm:$0xf]  ;;  %v4656_v37 = vld [vmem:[#allocation5 + $0x3a8] sm:$0xf0]  ;;  %v4275_v52 = vor.u32 %v5557_v41, %v4272_v49 }
 0x115   :  { %2195 = vmatpush.bf16.msra.mxu1 %v4647_v51  ;;  %2215 = vmatpush.bf16.msra.mxu2 %v4219_v23  ;;  %v4803_v51 = vor.u32 %v5689_v39, %v4800_v47  ;;  %v4366_v23 = vld [vmem:[#allocation5 + $0x138] sm:$0xf]  ;;  %v5659_v45 = vld [vmem:[#allocation5 + $0x3a4] sm:$0xf0]  ;;  %v5545_v57 = vld [vmem:[#allocation5 + $0x1c] sm:$0xf] }
 0x116   :  { %2102 = vmatmul.bf16.vlgmr.msrb.gmra.mxu0 %v6375_v21  ;;  %2140 = vmatmul.bf16.vlgmr.msrb.gmra.mxu2 %v6375_v21  ;;  %v4270_v27 = vld [vmem:[#allocation5 + $0x78] sm:$0xf]  ;;  %v4224_v4 = vld [vmem:[#allocation5 + $0x48] sm:$0xf0]  ;;  %v5641_v46 = vld [vmem:[#allocation5 + $0x31c] sm:$0xf] }
 0x117   :  { %2121 = vmatmul.bf16.vlgmr.msrb.gmra.mxu1 %v6382_v29  ;;  %2159 = vmatmul.bf16.vlgmr.msrb.gmra.mxu3 %v6382_v29  ;;  %v4654_v43 = vld [vmem:[#allocation5 + $0x378] sm:$0xf]  ;;  %v4608_v1 = vld [vmem:[#allocation5 + $0x348] sm:$0xf0]  ;;  %v4227_v8 = vor.u32 %v5545_v57, %v4224_v4  ;;  %v5630_v56 = vld [vmem:[#allocation5 + $0x2c4] sm:$0xf] }
 0x118   :  { %2177 = vmatpush.bf16.msra.mxu0 %v4215_v33  ;;  %2303 = vmatpush.bf16.msrb.mxu3 %v4947_v32  ;;  %v4371_v33 = vor.u32 %v5581_v54, %v4368_v19  ;;  %v4704_v32 = vld [vmem:[#allocation5 + $0x408] sm:$0xf0]  ;;  %v4655_v26 = vor.u32 %v5659_v45, %v4654_v43  ;;  %v4611_v53 = vor.u32 %v5641_v46, %v4608_v1  ;;  %v4568_v13 = vld [vmem:[#allocation5 + $0x2f0] sm:$0xf0]  ;;  %v5726_v58 = vld [vmem:[#allocation5 + $0x5c4] sm:$0xf] }
 0x119   :  { %2196 = vmatpush.bf16.msra.mxu1 %v4599_v38  ;;  %2284 = vmatpush.bf16.msrb.mxu2 %v4563_v36  ;;  %v4755_v38 = vor.u32 %v5677_v31, %v4752_v55  ;;  %v4367_v36 = vor.u32 %v5587_v60, %v4366_v23  ;;  %v4707_v3 = vor.u32 %v5665_v20, %v4704_v32  ;;  %v4950_v19 = vld [vmem:[#allocation5 + $0x5c0] sm:$0xf]  ;;  %v5732_v31 = vld [vmem:[#allocation5 + $0x5ec] sm:$0xf0]  ;;  %v5618_v55 = vld [vmem:[#allocation5 + $0x264] sm:$0xf] }
 0x11a   :  { %v4571_v12 = vor.u32 %v5630_v56, %v4568_v13  ;;  %v4951_v23 = vor.u32 %v5732_v31, %v4950_v19  ;;  %v4520_v60 = vld [vmem:[#allocation5 + $0x290] sm:$0xf0]  ;;  %v5720_v20 = vld [vmem:[#allocation5 + $0x58c] sm:$0xf0]  ;;  %v5606_v32 = vld [vmem:[#allocation5 + $0x204] sm:$0xf] }
 0x11b   :  { %v4523_v48 = vor.u32 %v5618_v55, %v4520_v60  ;;  %v4854_v41 = vld [vmem:[#allocation5 + $0x500] sm:$0xf]  ;;  %v5708_v49 = vld [vmem:[#allocation5 + $0x52c] sm:$0xf0]  ;;  %v5690_v43 = vld [vmem:[#allocation5 + $0x4a4] sm:$0xf] }
 0x11c   :  { %2246 = vmatpush.bf16.msrb.mxu0 %v4559_v14  ;;  %2304 = vmatpush.bf16.msrb.mxu3 %v4899_v6  ;;  %v4318_v14 = vld [vmem:[#allocation5 + $0xd8] sm:$0xf]  ;;  %v4703_v6 = vor.u32 %v5671_v35, %v4702_v11  ;;  %v5702_v11 = vld [vmem:[#allocation5 + $0x504] sm:$0xf]  ;;  %v4856_v35 = vld [vmem:[#allocation5 + $0x530] sm:$0xf0] }
 0x11d   :  { %2265 = vmatpush.bf16.msrb.mxu1 %v4943_v61  ;;  %2285 = vmatpush.bf16.msrb.mxu2 %v4515_v18  ;;  %v4323_v61 = vor.u32 %v5569_v15, %v4320_v62  ;;  %v4319_v18 = vor.u32 %v5575_v17, %v4318_v14  ;;  %v4518_v15 = vld [vmem:[#allocation5 + $0x260] sm:$0xf]  ;;  %v4472_v14 = vld [vmem:[#allocation5 + $0x230] sm:$0xf0]  ;;  %v5696_v4 = vld [vmem:[#allocation5 + $0x4cc] sm:$0xf0] }
 0x11e   :  { %v4808_v45 = vld [vmem:[#allocation5 + $0x4d0] sm:$0xf0]  ;;  %v4806_v57 = vld [vmem:[#allocation5 + $0x4a0] sm:$0xf]  ;;  %v5684_v13 = vld [vmem:[#allocation5 + $0x46c] sm:$0xf0] }
 0x11f   :  { %v4807_v1 = vor.u32 %v5696_v4, %v4806_v57  ;;  %v4758_v56 = vld [vmem:[#allocation5 + $0x440] sm:$0xf]  ;;  %v5576_v19 = vld [vmem:[#allocation5 + $0x10c] sm:$0xf0]  ;;  %v5727_v57 = vld [vmem:[#allocation5 + $0x5cc] sm:$0xf] }
 0x120   :  { %2247 = vmatpush.bf16.msrb.mxu0 %v4511_v22  ;;  %2305 = vmatpush.bf16.msrb.mxu3 %v4851_v30  ;;  %v5563_v22 = vld [vmem:[#allocation5 + $0xa4] sm:$0xf0]  ;;  %v4710_v31 = vld [vmem:[#allocation5 + $0x3e0] sm:$0xf]  ;;  %v5672_v55 = vld [vmem:[#allocation5 + $0x40c] sm:$0xf0] }
 0x121   :  { %2266 = vmatpush.bf16.msrb.mxu1 %v4895_v42  ;;  %2286 = vmatpush.bf16.msrb.mxu2 %v4467_v44  ;;  %v4659_v42 = vor.u32 %v5653_v9, %v4656_v37  ;;  %v4271_v0 = vor.u32 %v5563_v22, %v4270_v27  ;;  %v4222_v44 = vld [vmem:[#allocation5 + $0x18] sm:$0xf]  ;;  %v5551_v30 = vld [vmem:[#allocation5 + $0x44] sm:$0xf0]  ;;  %v4855_v37 = vor.u32 %v5708_v49, %v4854_v41  ;;  %v5594_v27 = vld [vmem:[#allocation5 + $0x1a4] sm:$0xf] }
 0x122   :  { %v4223_v39 = vor.u32 %v5551_v30, %v4222_v44  ;;  %v4424_v22 = vld [vmem:[#allocation5 + $0x1d0] sm:$0xf0]  ;;  %v5582_v44 = vld [vmem:[#allocation5 + $0x144] sm:$0xf] }
 0x123   :  { %v4376_v30 = vld [vmem:[#allocation5 + $0x170] sm:$0xf0]  ;;  %v5642_v41 = vld [vmem:[#allocation5 + $0x324] sm:$0xf] }
 0x124   :  { %2248 = vmatpush.bf16.msrb.mxu0 %v4463_v7  ;;  %2306 = vmatpush.bf16.msrb.mxu3 %v4803_v51  ;;  %v4606_v7 = vld [vmem:[#allocation5 + $0x318] sm:$0xf]  ;;  %v4566_v51 = vld [vmem:[#allocation5 + $0x2c0] sm:$0xf]  ;;  %v4616_v49 = vld [vmem:[#allocation5 + $0x350] sm:$0xf0] }
 0x125   :  { %2267 = vmatpush.bf16.msrb.mxu1 %v4847_v40  ;;  %2287 = vmatpush.bf16.msrb.mxu2 %v4419_v24  ;;  %v5647_v40 = vld [vmem:[#allocation5 + $0x344] sm:$0xf0]  ;;  %v4952_v24 = vld [vmem:[#allocation5 + $0x5f0] sm:$0xf0] }
 0x126   :  { %2107 = vmatmul.bf16.gmra.mxu0 %v6405_v25  ;;  %2145 = vmatmul.bf16.gmra.mxu2 %v6405_v25  ;;  %v4607_v47 = vor.u32 %v5647_v40, %v4606_v7  ;;  %v5678_v7 = vld [vmem:[#allocation5 + $0x444] sm:$0xf]  ;;  %v4760_v40 = vld [vmem:[#allocation5 + $0x470] sm:$0xf0] }
 0x127   :  { %2126 = vmatmul.bf16.gmra.mxu1 %v6407_v63  ;;  %2164 = vmatmul.bf16.gmra.mxu3 %v6407_v63 }
 0x128   :  { %2249 = vmatpush.bf16.msrb.mxu0 %v4415_v59  ;;  %2307 = vmatpush.bf16.msrb.mxu3 %v4755_v38  ;;  %v5636_v59 = vld [vmem:[#allocation5 + $0x2ec] sm:$0xf0]  ;;  %v4904_v38 = vld [vmem:[#allocation5 + $0x590] sm:$0xf0] }
 0x129   :  { %2268 = vmatpush.bf16.msrb.mxu1 %v4799_v10  ;;  %2288 = vmatpush.bf16.msrb.mxu2 %v4371_v33  ;;  %v4955_v10 = vor.u32 %v5726_v58, %v4952_v24  ;;  %v4567_v54 = vor.u32 %v5636_v59, %v4566_v51  ;;  %v5714_v33 = vld [vmem:[#allocation5 + $0x564] sm:$0xf]  ;;  %v4759_v24 = vor.u32 %v5684_v13, %v4758_v56  ;;  %v4328_v51 = vld [vmem:[#allocation5 + $0x110] sm:$0xf0]  ;;  %v4912_v56 = vld [vmem:[#allocation5 + $0x598] sm:$0xf0] }
 0x12a   :  { %v4907_v5 = vor.u32 %v5714_v33, %v4904_v38  ;;  %v5570_v58 = vld [vmem:[#allocation5 + $0xe4] sm:$0xf]  ;;  %v4280_v38 = vld [vmem:[#allocation5 + $0xb0] sm:$0xf0]  ;;  %v4526_v13 = vld [vmem:[#allocation5 + $0x268] sm:$0xf] }
 0x12b   :  { %v5666_v59 = vld [vmem:[#allocation5 + $0x3e4] sm:$0xf] }
 0x12c   :  { %2250 = vmatpush.bf16.msrb.mxu0 %v4367_v36  ;;  %2308 = vmatpush.bf16.msrb.mxu3 %v4707_v3  ;;  %v5624_v36 = vld [vmem:[#allocation5 + $0x28c] sm:$0xf0]  ;;  %v5558_v33 = vld [vmem:[#allocation5 + $0x84] sm:$0xf] }
 0x12d   :  { %2269 = vmatpush.bf16.msrb.mxu1 %v4751_v28  ;;  %2289 = vmatpush.bf16.msrb.mxu2 %v4323_v61  ;;  %v4902_v28 = vld [vmem:[#allocation5 + $0x560] sm:$0xf]  ;;  %v4519_v62 = vor.u32 %v5624_v36, %v4518_v15  ;;  %v5612_v3 = vld [vmem:[#allocation5 + $0x22c] sm:$0xf0]  ;;  %v5654_v15 = vld [vmem:[#allocation5 + $0x384] sm:$0xf] }
 0x12e   :  { %v4903_v17 = vor.u32 %v5720_v20, %v4902_v28  ;;  %v4470_v61 = vld [vmem:[#allocation5 + $0x200] sm:$0xf]  ;;  %v4664_v36 = vld [vmem:[#allocation5 + $0x3b0] sm:$0xf0] }
 0x12f   :  { %v4471_v9 = vor.u32 %v5612_v3, %v4470_v61  ;;  %v4278_v28 = vld [vmem:[#allocation5 + $0x80] sm:$0xf]  ;;  %v4232_v3 = vld [vmem:[#allocation5 + $0x50] sm:$0xf0] }
 0x130   :  { %2251 = vmatpush.bf16.msrb.mxu0 %v4319_v18  ;;  %2309 = vmatpush.bf16.msrb.mxu3 %v4659_v42  ;;  %v4475_v18 = vor.u32 %v5606_v32, %v4472_v14  ;;  %v5600_v42 = vld [vmem:[#allocation5 + $0x1cc] sm:$0xf0]  ;;  %v4662_v20 = vld [vmem:[#allocation5 + $0x380] sm:$0xf]  ;;  %v4283_v14 = vor.u32 %v5558_v33, %v4280_v38  ;;  %v5613_v33 = vld [vmem:[#allocation5 + $0x234] sm:$0xf0] }
 0x131   :  { %2270 = vmatpush.bf16.msrb.mxu1 %v4703_v6  ;;  %2290 = vmatpush.bf16.msrb.mxu2 %v4275_v52  ;;  %v4859_v6 = vor.u32 %v5702_v11, %v4856_v35  ;;  %v4422_v52 = vld [vmem:[#allocation5 + $0x1a0] sm:$0xf]  ;;  %v5660_v32 = vld [vmem:[#allocation5 + $0x3ac] sm:$0xf0]  ;;  %v5546_v11 = vld [vmem:[#allocation5 + $0x24] sm:$0xf] }
 0x132   :  { %v4423_v46 = vor.u32 %v5600_v42, %v4422_v52  ;;  %v4663_v61 = vor.u32 %v5660_v32, %v4662_v20  ;;  %v5631_v52 = vld [vmem:[#allocation5 + $0x2cc] sm:$0xf]  ;;  %v4576_v42 = vld [vmem:[#allocation5 + $0x2f8] sm:$0xf0] }
 0x133   :  { %v4579_v4 = vor.u32 %v5631_v52, %v4576_v42  ;;  %v5691_v20 = vld [vmem:[#allocation5 + $0x4ac] sm:$0xf]  ;;  %v4816_v32 = vld [vmem:[#allocation5 + $0x4d8] sm:$0xf0]  ;;  %v4766_v52 = vld [vmem:[#allocation5 + $0x448] sm:$0xf] }
 0x134   :  { %2252 = vmatpush.bf16.msrb.mxu0 %v4271_v0  ;;  %2310 = vmatpush.bf16.msrb.mxu3 %v4611_v53  ;;  %v4427_v0 = vor.u32 %v5594_v27, %v4424_v22  ;;  %v5588_v53 = vld [vmem:[#allocation5 + $0x16c] sm:$0xf0]  ;;  %v4235_v27 = vor.u32 %v5546_v11, %v4232_v3  ;;  %v4619_v22 = vor.u32 %v5642_v41, %v4616_v49  ;;  %v5697_v3 = vld [vmem:[#allocation5 + $0x4d4] sm:$0xf0] }
 0x135   :  { %2271 = vmatpush.bf16.msrb.mxu1 %v4655_v26  ;;  %2291 = vmatpush.bf16.msrb.mxu2 %v4227_v8  ;;  %v4811_v26 = vor.u32 %v5690_v43, %v4808_v45  ;;  %v4374_v8 = vld [vmem:[#allocation5 + $0x140] sm:$0xf]  ;;  %v5685_v42 = vld [vmem:[#allocation5 + $0x474] sm:$0xf0] }
 0x136   :  { %2178 = vmatmul.bf16.vlgmr.msra.gmra.mxu0 %v6375_v21  ;;  %2216 = vmatmul.bf16.vlgmr.msra.gmra.mxu2 %v6375_v21 }
 0x137   :  { %2197 = vmatmul.bf16.vlgmr.msra.gmra.mxu1 %v6382_v29  ;;  %2235 = vmatmul.bf16.vlgmr.msra.gmra.mxu3 %v6382_v29 }
 0x138   :  { %2253 = vmatpush.bf16.msrb.mxu0 %v4223_v39  ;;  %2379 = vmatpush.bf16.msra.mxu3 %v4955_v10  ;;  %v4379_v39 = vor.u32 %v5582_v44, %v4376_v30  ;;  %v4712_v10 = vld [vmem:[#allocation5 + $0x410] sm:$0xf0]  ;;  %v4958_v30 = vld [vmem:[#allocation5 + $0x5c8] sm:$0xf] }
 0x139   :  { %2272 = vmatpush.bf16.msrb.mxu1 %v4607_v47  ;;  %2360 = vmatpush.bf16.msra.mxu2 %v4571_v12  ;;  %v4763_v47 = vor.u32 %v5678_v7, %v4760_v40  ;;  %v4375_v12 = vor.u32 %v5588_v53, %v4374_v8  ;;  %v4715_v60 = vor.u32 %v5666_v59, %v4712_v10  ;;  %v5733_v7 = vld [vmem:[#allocation5 + $0x5f4] sm:$0xf0]  ;;  %v5619_v8 = vld [vmem:[#allocation5 + $0x26c] sm:$0xf]  ;;  %v4528_v53 = vld [vmem:[#allocation5 + $0x298] sm:$0xf0] }
 0x13a   :  { %v4959_v40 = vor.u32 %v5733_v7, %v4958_v30  ;;  %v5721_v59 = vld [vmem:[#allocation5 + $0x594] sm:$0xf0] }
 0x13b   :  { %v5577_v30 = vld [vmem:[#allocation5 + $0x114] sm:$0xf0] }
 0x13c   :  { %2322 = vmatpush.bf16.msra.mxu0 %v4567_v54  ;;  %2380 = vmatpush.bf16.msra.mxu3 %v4907_v5  ;;  %v4326_v54 = vld [vmem:[#allocation5 + $0xe0] sm:$0xf]  ;;  %v4711_v5 = vor.u32 %v5672_v55, %v4710_v31  ;;  %v5703_v31 = vld [vmem:[#allocation5 + $0x50c] sm:$0xf] }
 0x13d   :  { %2341 = vmatpush.bf16.msra.mxu1 %v4951_v23  ;;  %2361 = vmatpush.bf16.msra.mxu2 %v4523_v48  ;;  %v4331_v23 = vor.u32 %v5570_v58, %v4328_v51  ;;  %v4327_v48 = vor.u32 %v5576_v19, %v4326_v54  ;;  %v5625_v58 = vld [vmem:[#allocation5 + $0x294] sm:$0xf0]  ;;  %v4910_v51 = vld [vmem:[#allocation5 + $0x568] sm:$0xf]  ;;  %v5607_v54 = vld [vmem:[#allocation5 + $0x20c] sm:$0xf] }
 0x13e   :  { %v4911_v10 = vor.u32 %v5721_v59, %v4910_v51  ;;  %v4480_v19 = vld [vmem:[#allocation5 + $0x238] sm:$0xf0]  ;;  %v5565_v51 = vld [vmem:[#allocation5 + $0xb4] sm:$0xf0] }
 0x13f   :  { %v4483_v55 = vor.u32 %v5607_v54, %v4480_v19  ;;  %v4670_v54 = vld [vmem:[#allocation5 + $0x388] sm:$0xf]  ;;  %v5661_v19 = vld [vmem:[#allocation5 + $0x3b4] sm:$0xf0] }
 0x140   :  { %2323 = vmatpush.bf16.msra.mxu0 %v4519_v62  ;;  %2381 = vmatpush.bf16.msra.mxu3 %v4859_v6  ;;  %v5564_v62 = vld [vmem:[#allocation5 + $0xac] sm:$0xf0] }
 0x141   :  { %2342 = vmatpush.bf16.msra.mxu1 %v4903_v17  ;;  %2362 = vmatpush.bf16.msra.mxu2 %v4475_v18  ;;  %v4667_v17 = vor.u32 %v5654_v15, %v4664_v36  ;;  %v4279_v35 = vor.u32 %v5564_v62, %v4278_v28  ;;  %v4230_v18 = vld [vmem:[#allocation5 + $0x20] sm:$0xf]  ;;  %v5552_v6 = vld [vmem:[#allocation5 + $0x4c] sm:$0xf0]  ;;  %v5709_v15 = vld [vmem:[#allocation5 + $0x534] sm:$0xf0] }
 0x142   :  { %v4231_v43 = vor.u32 %v5552_v6, %v4230_v18  ;;  %v5595_v28 = vld [vmem:[#allocation5 + $0x1ac] sm:$0xf]  ;;  %v4432_v62 = vld [vmem:[#allocation5 + $0x1d8] sm:$0xf0] }
 0x143   :  { %v4435_v11 = vor.u32 %v5595_v28, %v4432_v62  ;;  %v5583_v18 = vld [vmem:[#allocation5 + $0x14c] sm:$0xf]  ;;  %v4384_v6 = vld [vmem:[#allocation5 + $0x178] sm:$0xf0] }
 0x144   :  { %2324 = vmatpush.bf16.msra.mxu0 %v4471_v9  ;;  %2382 = vmatpush.bf16.msra.mxu3 %v4811_v26  ;;  %v4614_v9 = vld [vmem:[#allocation5 + $0x320] sm:$0xf]  ;;  %v4574_v26 = vld [vmem:[#allocation5 + $0x2c8] sm:$0xf] }
 0x145   :  { %2343 = vmatpush.bf16.msra.mxu1 %v4855_v37  ;;  %2363 = vmatpush.bf16.msra.mxu2 %v4427_v0  ;;  %v5648_v37 = vld [vmem:[#allocation5 + $0x34c] sm:$0xf0]  ;;  %v4960_v0 = vld [vmem:[#allocation5 + $0x5f8] sm:$0xf0] }
 0x146   :  { %2183 = vmatmul.bf16.gmra.mxu0 %v6405_v25  ;;  %2221 = vmatmul.bf16.gmra.mxu2 %v6405_v25  ;;  %v4615_v45 = vor.u32 %v5648_v37, %v4614_v9  ;;  %v5679_v9 = vld [vmem:[#allocation5 + $0x44c] sm:$0xf]  ;;  %v4768_v37 = vld [vmem:[#allocation5 + $0x478] sm:$0xf0] }
 0x147   :  { %2202 = vmatmul.bf16.gmra.mxu1 %v6407_v63  ;;  %2240 = vmatmul.bf16.gmra.mxu3 %v6407_v63 }
 0x148   :  { %2325 = vmatpush.bf16.msra.mxu0 %v4423_v46  ;;  %2383 = vmatpush.bf16.msra.mxu3 %v4763_v47  ;;  %v5637_v46 = vld [vmem:[#allocation5 + $0x2f4] sm:$0xf0]  ;;  %v4531_v47 = vor.u32 %v5619_v8, %v4528_v53  ;;  %v4718_v8 = vld [vmem:[#allocation5 + $0x3e8] sm:$0xf] }
 0x149   :  { %2344 = vmatpush.bf16.msra.mxu1 %v4807_v1  ;;  %2364 = vmatpush.bf16.msra.mxu2 %v4379_v39  ;;  %v4963_v1 = vor.u32 %v5727_v57, %v4960_v0  ;;  %v4575_v44 = vor.u32 %v5637_v46, %v4574_v26  ;;  %v5715_v39 = vld [vmem:[#allocation5 + $0x56c] sm:$0xf]  ;;  %v4336_v26 = vld [vmem:[#allocation5 + $0x118] sm:$0xf0]  ;;  %v5673_v53 = vld [vmem:[#allocation5 + $0x414] sm:$0xf0] }
 0x14a   :  { %v5571_v0 = vld [vmem:[#allocation5 + $0xec] sm:$0xf] }
 0x14b   :  { %v5667_v46 = vld [vmem:[#allocation5 + $0x3ec] sm:$0xf]  ;;  %v4339_v7 = vor.u32 %v5571_v0, %v4336_v26 }
 0x14c   :  { %2326 = vmatpush.bf16.msra.mxu0 %v4375_v12  ;;  %2384 = vmatpush.bf16.msra.mxu3 %v4715_v60  ;;  %v4915_v12 = vor.u32 %v5715_v39, %v4912_v56  ;;  %v4478_v60 = vld [vmem:[#allocation5 + $0x208] sm:$0xf]  ;;  %v5559_v56 = vld [vmem:[#allocation5 + $0x8c] sm:$0xf] }
 0x14d   :  { %2345 = vmatpush.bf16.msra.mxu1 %v4759_v24  ;;  %2365 = vmatpush.bf16.msra.mxu2 %v4331_v23  ;;  %v4527_v24 = vor.u32 %v5625_v58, %v4526_v13  ;;  %v4864_v23 = vld [vmem:[#allocation5 + $0x538] sm:$0xf0]  ;;  %v5655_v58 = vld [vmem:[#allocation5 + $0x38c] sm:$0xf] }
 0x14e   :  { %v4867_v38 = vor.u32 %v5703_v31, %v4864_v23  ;;  %v4288_v13 = vld [vmem:[#allocation5 + $0xb8] sm:$0xf0]  ;;  %v5547_v23 = vld [vmem:[#allocation5 + $0x2c] sm:$0xf] }
 0x14f   :  { %v4291_v59 = vor.u32 %v5559_v56, %v4288_v13 }
 0x150   :  { %2327 = vmatpush.bf16.msra.mxu0 %v4327_v48  ;;  %2385 = vmatpush.bf16.msra.mxu3 %v4667_v17  ;;  %v4479_v48 = vor.u32 %v5613_v33, %v4478_v60  ;;  %v5601_v17 = vld [vmem:[#allocation5 + $0x1d4] sm:$0xf0]  ;;  %v4240_v60 = vld [vmem:[#allocation5 + $0x58] sm:$0xf0]  ;;  %v5643_v33 = vld [vmem:[#allocation5 + $0x32c] sm:$0xf] }
 0x151   :  { %2346 = vmatpush.bf16.msra.mxu1 %v4711_v5  ;;  %2366 = vmatpush.bf16.msra.mxu2 %v4283_v14  ;;  %v4862_v5 = vld [vmem:[#allocation5 + $0x508] sm:$0xf]  ;;  %v4243_v28 = vor.u32 %v5547_v23, %v4240_v60 }
 0x152   :  { %v4863_v36 = vor.u32 %v5709_v15, %v4862_v5  ;;  %v4430_v14 = vld [vmem:[#allocation5 + $0x1a8] sm:$0xf]  ;;  %v5553_v15 = vld [vmem:[#allocation5 + $0x54] sm:$0xf0] }
 0x153   :  { %v4431_v41 = vor.u32 %v5601_v17, %v4430_v14  ;;  %v4238_v5 = vld [vmem:[#allocation5 + $0x28] sm:$0xf] }
 0x154   :  { %2328 = vmatpush.bf16.msra.mxu0 %v4279_v35  ;;  %2386 = vmatpush.bf16.msra.mxu3 %v4619_v22  ;;  %v4819_v35 = vor.u32 %v5691_v20, %v4816_v32  ;;  %v5589_v22 = vld [vmem:[#allocation5 + $0x174] sm:$0xf0]  ;;  %v4622_v20 = vld [vmem:[#allocation5 + $0x328] sm:$0xf]  ;;  %v4239_v17 = vor.u32 %v5553_v15, %v4238_v5 }
 0x155   :  { %2347 = vmatpush.bf16.msra.mxu1 %v4663_v61  ;;  %2367 = vmatpush.bf16.msra.mxu2 %v4235_v27  ;;  %v4814_v61 = vld [vmem:[#allocation5 + $0x4a8] sm:$0xf]  ;;  %v5649_v32 = vld [vmem:[#allocation5 + $0x354] sm:$0xf0] }
 0x156   :  { %2254 = vmatmul.bf16.vlgmr.msrb.gmra.mxu0 %v6375_v21  ;;  %2292 = vmatmul.bf16.vlgmr.msrb.gmra.mxu2 %v6375_v21  ;;  %v4815_v49 = vor.u32 %v5697_v3, %v4814_v61  ;;  %v4382_v27 = vld [vmem:[#allocation5 + $0x148] sm:$0xf] }
 0x157   :  { %2273 = vmatmul.bf16.vlgmr.msrb.gmra.mxu1 %v6382_v29  ;;  %2311 = vmatmul.bf16.vlgmr.msrb.gmra.mxu3 %v6382_v29  ;;  %v4383_v57 = vor.u32 %v5589_v22, %v4382_v27 }
 0x158   :  { %2329 = vmatpush.bf16.msra.mxu0 %v4231_v43  ;;  %2455 = vmatpush.bf16.msrb.mxu3 %v4963_v1  ;;  %v4387_v43 = vor.u32 %v5583_v18, %v4384_v6  ;;  %v4720_v1 = vld [vmem:[#allocation5 + $0x418] sm:$0xf0] }
 0x159   :  { %2348 = vmatpush.bf16.msra.mxu1 %v4615_v45  ;;  %2436 = vmatpush.bf16.msrb.mxu2 %v4579_v4  ;;  %v4771_v45 = vor.u32 %v5679_v9, %v4768_v37  ;;  %v4767_v4 = vor.u32 %v5685_v42, %v4766_v52 }
 0x15c   :  { %2398 = vmatpush.bf16.msrb.mxu0 %v4575_v44  ;;  %2456 = vmatpush.bf16.msrb.mxu3 %v4915_v12  ;;  %v4334_v44 = vld [vmem:[#allocation5 + $0xe8] sm:$0xf]  ;;  %v4672_v12 = vld [vmem:[#allocation5 + $0x3b8] sm:$0xf0] }
 0x15d   :  { %2417 = vmatpush.bf16.msrb.mxu1 %v4959_v40  ;;  %2437 = vmatpush.bf16.msrb.mxu2 %v4531_v47  ;;  %v4723_v40 = vor.u32 %v5667_v46, %v4720_v1  ;;  %v4335_v39 = vor.u32 %v5577_v30, %v4334_v44  ;;  %v4719_v47 = vor.u32 %v5673_v53, %v4718_v8 }
 0x160   :  { %2399 = vmatpush.bf16.msrb.mxu0 %v4527_v24  ;;  %2457 = vmatpush.bf16.msrb.mxu3 %v4867_v38  ;;  %v4286_v24 = vld [vmem:[#allocation5 + $0x88] sm:$0xf] }
 0x161   :  { %2418 = vmatpush.bf16.msrb.mxu1 %v4911_v10  ;;  %2438 = vmatpush.bf16.msrb.mxu2 %v4483_v55  ;;  %v4675_v10 = vor.u32 %v5655_v58, %v4672_v12  ;;  %v4287_v31 = vor.u32 %v5565_v51, %v4286_v24  ;;  %v4671_v55 = vor.u32 %v5661_v19, %v4670_v54 }
 0x164   :  { %2400 = vmatpush.bf16.msrb.mxu0 %v4479_v48  ;;  %2458 = vmatpush.bf16.msrb.mxu3 %v4819_v35  ;;  %v4624_v48 = vld [vmem:[#allocation5 + $0x358] sm:$0xf0] }
 0x165   :  { %2419 = vmatpush.bf16.msrb.mxu1 %v4863_v36  ;;  %2439 = vmatpush.bf16.msrb.mxu2 %v4435_v11  ;;  %v4627_v62 = vor.u32 %v5643_v33, %v4624_v48  ;;  %v4623_v11 = vor.u32 %v5649_v32, %v4622_v20 }
 0x166   :  { %2259 = vmatmul.bf16.gmra.mxu0 %v6405_v25  ;;  %2297 = vmatmul.bf16.gmra.mxu2 %v6405_v25 }
 0x167   :  { %2278 = vmatmul.bf16.gmra.mxu1 %v6407_v63  ;;  %2316 = vmatmul.bf16.gmra.mxu3 %v6407_v63 }
 0x168   :  { %2401 = vmatpush.bf16.msrb.mxu0 %v4431_v41  ;;  %2459 = vmatpush.bf16.msrb.mxu3 %v4771_v45 }
 0x169   :  { %2420 = vmatpush.bf16.msrb.mxu1 %v4815_v49  ;;  %2440 = vmatpush.bf16.msrb.mxu2 %v4387_v43 }
 0x16c   :  { %2402 = vmatpush.bf16.msrb.mxu0 %v4383_v57  ;;  %2460 = vmatpush.bf16.msrb.mxu3 %v4723_v40 }
 0x16d   :  { %2421 = vmatpush.bf16.msrb.mxu1 %v4767_v4  ;;  %2441 = vmatpush.bf16.msrb.mxu2 %v4339_v7 }
 0x170   :  { %2403 = vmatpush.bf16.msrb.mxu0 %v4335_v39  ;;  %2461 = vmatpush.bf16.msrb.mxu3 %v4675_v10 }
 0x171   :  { %2422 = vmatpush.bf16.msrb.mxu1 %v4719_v47  ;;  %2442 = vmatpush.bf16.msrb.mxu2 %v4291_v59 }
 0x173   :  { %v2027_v38 = vpop.f32.mrf.mxu0 }
 0x174   :  { %v2046_v36 = vpop.f32.mrf.mxu1  ;;  %2404 = vmatpush.bf16.msrb.mxu0 %v4287_v31  ;;  %2462 = vmatpush.bf16.msrb.mxu3 %v4627_v62 }
 0x175   :  { %v6437_v14 = vadd.f32 %v2046_v36, %v2027_v38  ;;  %2423 = vmatpush.bf16.msrb.mxu1 %v4671_v55  ;;  %2443 = vmatpush.bf16.msrb.mxu2 %v4243_v28  ;;  %v7068_v38 = vmov 0.0  }
 0x176   :  { %2330 = vmatmul.bf16.vlgmr.msra.gmra.mxu0 %v6375_v21  ;;  %2368 = vmatmul.bf16.vlgmr.msra.gmra.mxu2 %v6375_v21  ;;  %v6477_v48 = vsel %vm144_vm5, 1.0, %v7068_v38 }
 0x177   :  { %2349 = vmatmul.bf16.vlgmr.msra.gmra.mxu1 %v6382_v29  ;;  %2387 = vmatmul.bf16.vlgmr.msra.gmra.mxu3 %v6382_v29  ;;  %v2474_v56 = vrot.slane %v6437_v14, 6 }
 0x178   :  { %2405 = vmatpush.bf16.msrb.mxu0 %v4239_v17 }
 0x179   :  { %v2065_v35 = vpop.f32.mrf.mxu2  ;;  %2424 = vmatpush.bf16.msrb.mxu1 %v4623_v11 }
 0x17a   :  { %v2084_v61 = vpop.f32.mrf.mxu3 }
 0x17b   :  { %v6443_v3 = vadd.f32 %v2084_v61, %v2065_v35  ;;  %v2029_v41 = vpop.f32.mrf.mxu0 }
 0x17c   :  { %v2048_v49 = vpop.f32.mrf.mxu1 }
 0x17d   :  { %v2049_v1 = vadd.f32 %v2048_v49, %v2029_v41  ;;  %v2475_v31 = vrot.slane %v6443_v3, 6 }
 0x17f   :  { %v2476_v53 = vrot.slane %v2049_v1, 6 }
 0x181   :  { %v2067_v18 = vpop.f32.mrf.mxu2 }
 0x182   :  { %v2086_v6 = vpop.f32.mrf.mxu3 }
 0x183   :  { %v2032_v9 = vpop.f32.mrf.mxu0  ;;  %v2087_v47 = vadd.f32 %v2086_v6, %v2067_v18 }
 0x184   :  { %v2051_v37 = vpop.f32.mrf.mxu1 }
 0x185   :  { %v6445_v27 = vadd.f32 %v2051_v37, %v2032_v9  ;;  %v2477_v24 = vrot.slane %v2087_v47, 6 }
 0x186   :  { %2335 = vmatmul.bf16.gmra.mxu0 %v6405_v25  ;;  %2373 = vmatmul.bf16.gmra.mxu2 %v6405_v25 }
 0x187   :  { %2354 = vmatmul.bf16.gmra.mxu1 %v6407_v63  ;;  %2392 = vmatmul.bf16.gmra.mxu3 %v6407_v63  ;;  %v2478_v10 = vrot.slane %v6445_v27, 6  ;;  %v2488_v5 = vsel %vm2482_vm4, %v2475_v31, %v2477_v24 }
 0x189   :  { %v2070_v22 = vpop.f32.mrf.mxu2  ;;  %v2485_v15 = vsel %vm2482_vm4, %v2476_v53, %v2478_v10 }
 0x18a   :  { %v2089_v43 = vpop.f32.mrf.mxu3  ;;  %v2495_v11 = vmul.f32 %v6477_v48, %v2485_v15 }
 0x18b   :  { %v6451_v45 = vadd.f32 %v2089_v43, %v2070_v22  ;;  %v2034_v52 = vpop.f32.mrf.mxu0 }
 0x18c   :  { %v2053_v42 = vpop.f32.mrf.mxu1 }
 0x18d   :  { %v2054_v36 = vadd.f32 %v2053_v42, %v2034_v52 }
 0x18f   :  { %v2480_v61 = vrot.slane %v2054_v36, 6 }
 0x191   :  { %v2072_v57 = vpop.f32.mrf.mxu2  ;;  %v2489_v27 = vsel %vm2482_vm4, %v2480_v61, %v2474_v56 }
 0x192   :  { %v2091_v4 = vpop.f32.mrf.mxu3  ;;  %v2491_v1 = vmul.f32 %v6477_v48, %v2489_v27 }
 0x193   :  { %v2103_v0 = vpop.f32.mrf.mxu0  ;;  %v2092_v6 = vadd.f32 %v2091_v4, %v2072_v57  ;;  %v2483_v57 = vsel %vm2482_vm4, %v2478_v10, %v2480_v61 }
 0x194   :  { %v2122_v26 = vpop.f32.mrf.mxu1 }
 0x195   :  { %v6453_v46 = vadd.f32 %v2122_v26, %v2103_v0  ;;  %v2481_v42 = vrot.slane %v2092_v6, 6 }
 0x196   :  { %2406 = vmatmul.bf16.vlgmr.msrb.gmra.mxu0 %v6375_v21  ;;  %2444 = vmatmul.bf16.vlgmr.msrb.gmra.mxu2 %v6375_v21 }
 0x197   :  { %2425 = vmatmul.bf16.vlgmr.msrb.gmra.mxu1 %v6382_v29  ;;  %2463 = vmatmul.bf16.vlgmr.msrb.gmra.mxu3 %v6382_v29  ;;  %v2507_v21 = vrot.slane %v6453_v46, 7  ;;  %v2487_v29 = vsel %vm2482_vm4, %v2474_v56, %v2476_v53  ;;  %v2490_v47 = vsel %vm2482_vm4, %v2481_v42, %v2475_v31 }
 0x199   :  { %v2141_v44 = vpop.f32.mrf.mxu2 }
 0x19a   :  { %v2160_v30 = vpop.f32.mrf.mxu3 }
 0x19b   :  { %v6459_v7 = vadd.f32 %v2160_v30, %v2141_v44  ;;  %v2105_v40 = vpop.f32.mrf.mxu0 }
 0x19c   :  { %v2124_v8 = vpop.f32.mrf.mxu1 }
 0x19d   :  { %v2125_v39 = vadd.f32 %v2124_v8, %v2105_v40  ;;  %v2508_v23 = vrot.slane %v6459_v7, 7 }
 0x19f   :  { %v2509_v13 = vrot.slane %v2125_v39, 7 }
 0x1a1   :  { %v2143_v58 = vpop.f32.mrf.mxu2  ;;  %v2519_v12 = vsel %vm724_vm1, %v2507_v21, %v2509_v13 }
 0x1a2   :  { %v2162_v51 = vpop.f32.mrf.mxu3  ;;  %v6468_v59 = vadd.f32 %v2519_v12, %v2487_v29 }
 0x1a3   :  { %v2163_v54 = vadd.f32 %v2162_v51, %v2143_v58  ;;  %v2108_v19 = vpop.f32.mrf.mxu0 }
 0x1a4   :  { %v2127_v55 = vpop.f32.mrf.mxu1 }
 0x1a5   :  { %v2510_v60 = vrot.slane %v2163_v54, 7  ;;  %v2128_v33 = vadd.f32 %v2127_v55, %v2108_v19 }
 0x1a6   :  { %2411 = vmatmul.bf16.gmra.mxu0 %v6405_v25  ;;  %2449 = vmatmul.bf16.gmra.mxu2 %v6405_v25  ;;  %v2479_v25 = vrot.slane %v6451_v45, 6 }
 0x1a7   :  { %v2511_v28 = vrot.slane %v2128_v33, 7  ;;  %2430 = vmatmul.bf16.gmra.mxu1 %v6407_v63  ;;  %2468 = vmatmul.bf16.gmra.mxu3 %v6407_v63  ;;  %v2520_v62 = vsel %vm724_vm1, %v2508_v23, %v2510_v60 }
 0x1a8   :  { %v6487_v20 = vadd.f32 %v2520_v62, %v2488_v5  ;;  %v2486_v18 = vsel %vm2482_vm4, %v2477_v24, %v2479_v25  ;;  %v2484_v29 = vsel %vm2482_vm4, %v2479_v25, %v2481_v42  ;;  %v2492_v24 = vmul.f32 %v6477_v48, %v2490_v47  ;;  %v5794_v42 = vld [vmem:[#allocation7 + $0x1dc] sm:$0xf0] }
 0x1a9   :  { %v2517_v32 = vsel %vm724_vm1, %v2509_v13, %v2511_v28  ;;  %v2146_v14 = vpop.f32.mrf.mxu2  ;;  %v2496_v45 = vmul.f32 %v6477_v48, %v2486_v18  ;;  %v5446_v47 = vld [vmem:[#allocation7 + $0x3c0] sm:$0xf] }
 0x1aa   :  { %v2165_v17 = vpop.f32.mrf.mxu3  ;;  %v2527_v35 = vmul.f32 %v6134_v2, %v2517_v32 }
 0x1ab   :  { %v2166_v3 = vadd.f32 %v2165_v17, %v2146_v14  ;;  %v2110_v41 = vpop.f32.mrf.mxu0 }
 0x1ac   :  { %v2129_v63 = vpop.f32.mrf.mxu1  ;;  %v2535_v49 = vadd.f32 %v2527_v35, %v2495_v11 }
 0x1ad   :  { %v2512_v9 = vrot.slane %v2166_v3, 7  ;;  %v2130_v37 = vadd.f32 %v2129_v63, %v2110_v41 }
 0x1af   :  { %v2518_v22 = vsel %vm724_vm1, %v2510_v60, %v2512_v9  ;;  %v2513_v43 = vrot.slane %v2130_v37, 7 }
 0x1b0   :  { %v2528_v52 = vmul.f32 %v6134_v2, %v2518_v22 }
 0x1b1   :  { %v2521_v0 = vsel %vm724_vm1, %v2513_v43, %v2507_v21  ;;  %v2148_v26 = vpop.f32.mrf.mxu2  ;;  %v2515_v4 = vsel %vm724_vm1, %v2511_v28, %v2513_v43 }
 0x1b2   :  { %v2167_v46 = vpop.f32.mrf.mxu3  ;;  %v2523_v44 = vmul.f32 %v6134_v2, %v2521_v0  ;;  %v2536_v30 = vadd.f32 %v2528_v52, %v2496_v45  ;;  %v6510_v7 = vadd.f32 %v2515_v4, %v2483_v57  ;;  %v5190_v52 = vld [vmem:[#allocation7 + $0x1c0] sm:$0xf]  ;;  %v5790_v0 = vld [vmem:[#allocation7 + $0x1c4] sm:$0xf] }
 0x1b3   :  { %v2168_v40 = vadd.f32 %v2167_v46, %v2148_v26  ;;  %v2179_v8 = vpop.f32.mrf.mxu0  ;;  %v5191_v26 = vor.u32 %v5794_v42, %v5190_v52  ;;  %v5192_v57 = vld [vmem:[#allocation7 + $0x1e0] sm:$0xf0]  ;;  %v5158_v46 = vld [vmem:[#allocation7 + $0x180] sm:$0xf] }
 0x1b4   :  { %v2198_v53 = vpop.f32.mrf.mxu1  ;;  %v2531_v39 = vadd.f32 %v2523_v44, %v2491_v1  ;;  %v5195_v4 = vor.u32 %v5790_v0, %v5192_v57  ;;  %v5786_v1 = vld [vmem:[#allocation7 + $0x19c] sm:$0xf0]  ;;  %v5416_v52 = vld [vmem:[#allocation7 + $0x3a0] sm:$0xf0] }
 0x1b5   :  { %v2514_v56 = vrot.slane %v2168_v40, 7  ;;  %v2199_v21 = vadd.f32 %v2198_v53, %v2179_v8  ;;  %3456 = vmatpush.bf16.msra.mxu0 %v5191_v26  ;;  %v5782_v40 = vld [vmem:[#allocation7 + $0x184] sm:$0xf]  ;;  %v5094_v0 = vld [vmem:[#allocation7 + $0x100] sm:$0xf] }
 0x1b6   :  { %3494 = vmatpush.bf16.msra.mxu2 %v5195_v4  ;;  %v5160_v8 = vld [vmem:[#allocation7 + $0x1a0] sm:$0xf0]  ;;  %v5770_v26 = vld [vmem:[#allocation7 + $0x11c] sm:$0xf0] }
 0x1b7   :  { %v2522_v13 = vsel %vm724_vm1, %v2514_v56, %v2508_v23  ;;  %v6516_v58 = vadd.f32 %v2531_v39, %v2199_v21  ;;  %v2516_v12 = vsel %vm724_vm1, %v2512_v9, %v2514_v56  ;;  %v5163_v39 = vor.u32 %v5782_v40, %v5160_v8  ;;  %v5858_v56 = vld [vmem:[#allocation7 + $0x3dc] sm:$0xf0]  ;;  %v5766_v57 = vld [vmem:[#allocation7 + $0x104] sm:$0xf] }
 0x1b8   :  { %v2524_v51 = vmul.f32 %v6134_v2, %v2522_v13  ;;  %v6524_v10 = vadd.f32 %v2516_v12, %v2484_v29  ;;  %v5447_v13 = vor.u32 %v5858_v56, %v5446_v47  ;;  %v5854_v29 = vld [vmem:[#allocation7 + $0x3c4] sm:$0xf]  ;;  %v5842_v47 = vld [vmem:[#allocation7 + $0x35c] sm:$0xf0] }
 0x1b9   :  { %v2217_v54 = vpop.f32.mrf.mxu2  ;;  %v5448_v12 = vld [vmem:[#allocation7 + $0x3e0] sm:$0xf0] }
 0x1ba   :  { %v2236_v19 = vpop.f32.mrf.mxu3  ;;  %v2532_v31 = vadd.f32 %v2524_v51, %v2492_v24  ;;  %3495 = vmatpush.bf16.msra.mxu2 %v5163_v39  ;;  %v5451_v51 = vor.u32 %v5854_v29, %v5448_v12  ;;  %3475 = vmatpush.bf16.msra.mxu1 %v5447_v13  ;;  %v5382_v39 = vld [vmem:[#allocation7 + $0x340] sm:$0xf]  ;;  %v5838_v56 = vld [vmem:[#allocation7 + $0x344] sm:$0xf] }
 0x1bb   :  { %v2237_v55 = vadd.f32 %v2236_v19, %v2217_v54  ;;  %v6526_v60 = vpop.f32.mrf.mxu0  ;;  %v5126_v54 = vld [vmem:[#allocation7 + $0x140] sm:$0xf]  ;;  %v5383_v29 = vor.u32 %v5842_v47, %v5382_v39  ;;  %v5384_v12 = vld [vmem:[#allocation7 + $0x360] sm:$0xf0] }
 0x1bc   :  { %v6528_v23 = vpop.f32.mrf.mxu1  ;;  %v5778_v19 = vld [vmem:[#allocation7 + $0x15c] sm:$0xf0]  ;;  %3513 = vmatpush.bf16.msra.mxu3 %v5451_v51  ;;  %v5032_v47 = vld [vmem:[#allocation7 + $0xa0] sm:$0xf0] }
 0x1bd   :  { %v6530_v33 = vadd.f32 %v2532_v31, %v2237_v55  ;;  %v5774_v31 = vld [vmem:[#allocation7 + $0x144] sm:$0xf]  ;;  %v5127_v55 = vor.u32 %v5778_v19, %v5126_v54  ;;  %v5762_v54 = vld [vmem:[#allocation7 + $0xdc] sm:$0xf0] }
 0x1be   :  { %v5758_v19 = vld [vmem:[#allocation7 + $0xc4] sm:$0xf] }
 0x1c1   :  { %v6532_v5 = vpop.f32.mrf.mxu2 }
 0x1c2   :  { %v6534_v15 = vpop.f32.mrf.mxu3 }
 0x1c3   :  { %v2184_v36 = vpop.f32.mrf.mxu0 }
 0x1c4   :  { %v2203_v28 = vpop.f32.mrf.mxu1 }
 0x1c5   :  { %v2204_v62 = vadd.f32 %v2203_v28, %v2184_v36  ;;  %v5128_v36 = vld [vmem:[#allocation7 + $0x160] sm:$0xf0] }
 0x1c6   :  { %v5131_v28 = vor.u32 %v5774_v31, %v5128_v36 }
 0x1c7   :  { %v6536_v25 = vadd.f32 %v2535_v49, %v2204_v62  ;;  %v5414_v62 = vld [vmem:[#allocation7 + $0x380] sm:$0xf] }
 0x1c8   :  { %3496 = vmatpush.bf16.msra.mxu2 %v5131_v28 }
 0x1c9   :  { %v2222_v32 = vpop.f32.mrf.mxu2 }
 0x1ca   :  { %v2241_v14 = vpop.f32.mrf.mxu3 }
 0x1cb   :  { %v2242_v17 = vadd.f32 %v2241_v14, %v2222_v32  ;;  %v6538_v11 = vpop.f32.mrf.mxu0  ;;  %v5850_v32 = vld [vmem:[#allocation7 + $0x39c] sm:$0xf0]  ;;  %v5846_v14 = vld [vmem:[#allocation7 + $0x384] sm:$0xf] }
 0x1cc   :  { %v6540_v35 = vpop.f32.mrf.mxu1  ;;  %v5419_v42 = vor.u32 %v5846_v14, %v5416_v52  ;;  %v5834_v52 = vld [vmem:[#allocation7 + $0x31c] sm:$0xf0] }
 0x1cd   :  { %v6542_v61 = vadd.f32 %v2536_v30, %v2242_v17  ;;  %v5159_v30 = vor.u32 %v5786_v1, %v5158_v46  ;;  %v5415_v17 = vor.u32 %v5850_v32, %v5414_v62  ;;  %v5095_v1 = vor.u32 %v5770_v26, %v5094_v0  ;;  %v5064_v62 = vld [vmem:[#allocation7 + $0xe0] sm:$0xf0]  ;;  %v6594_v32 = vld [vmem:[%s7051_s7] sm:$0x3] }
 0x1ce   :  { %3514 = vmatpush.bf16.msra.mxu3 %v5419_v42  ;;  %v5067_v14 = vor.u32 %v5758_v19, %v5064_v62  ;;  %v5352_v42 = vld [vmem:[#allocation7 + $0x320] sm:$0xf0]  ;;  %v5030_v26 = vld [vmem:[#allocation7 + $0x80] sm:$0xf] }
 0x1cf   :  { %3457 = vmatpush.bf16.msra.mxu0 %v5159_v30  ;;  %3476 = vmatpush.bf16.msra.mxu1 %v5415_v17  ;;  %v5096_v30 = vld [vmem:[#allocation7 + $0x120] sm:$0xf0]  ;;  %v5350_v17 = vld [vmem:[#allocation7 + $0x300] sm:$0xf] }
 0x1d0   :  { %v5099_v8 = vor.u32 %v5766_v57, %v5096_v30  ;;  %v5754_v57 = vld [vmem:[#allocation7 + $0x9c] sm:$0xf0]  ;;  %v5320_v62 = vld [vmem:[#allocation7 + $0x2e0] sm:$0xf0] }
 0x1d1   :  { %v6544_v3 = vpop.f32.mrf.mxu2  ;;  %v5031_v39 = vor.u32 %v5754_v57, %v5030_v26  ;;  %v5000_v57 = vld [vmem:[#allocation7 + $0x60] sm:$0xf0] }
 0x1d2   :  { %v6546_v41 = vpop.f32.mrf.mxu3  ;;  %3497 = vmatpush.bf16.msra.mxu2 %v5099_v8 }
 0x1d3   :  { %v2255_v63 = vpop.f32.mrf.mxu0  ;;  %3458 = vmatpush.bf16.msra.mxu0 %v5127_v55  ;;  %3477 = vmatpush.bf16.msra.mxu1 %v5383_v29 }
 0x1d4   :  { %v2274_v18 = vpop.f32.mrf.mxu1 }
 0x1d5   :  { %v6572_v4 = vadd.f32 %v2274_v18, %v2255_v63  ;;  %v5387_v63 = vor.u32 %v5838_v56, %v5384_v12  ;;  %v5062_v18 = vld [vmem:[#allocation7 + $0xc0] sm:$0xf] }
 0x1d6   :  { %v5063_v28 = vor.u32 %v5762_v54, %v5062_v18  ;;  %3498 = vmatpush.bf16.msra.mxu2 %v5067_v14  ;;  %v5318_v12 = vld [vmem:[#allocation7 + $0x2c0] sm:$0xf]  ;;  %v5822_v18 = vld [vmem:[#allocation7 + $0x2c4] sm:$0xf]  ;;  %v2201_v14 = vadd.f32 %v6528_v23, %v6526_v60 }
 0x1d7   :  { %3459 = vmatpush.bf16.msra.mxu0 %v5095_v1  ;;  %v2547_v31 = vrot.slane %v6572_v4, 1  ;;  %3515 = vmatpush.bf16.msra.mxu3 %v5387_v63  ;;  %v5750_v1 = vld [vmem:[#allocation7 + $0x84] sm:$0xf]  ;;  %v5826_v63 = vld [vmem:[#allocation7 + $0x2dc] sm:$0xf0] }
 0x1d8   :  { %v5035_v29 = vor.u32 %v5750_v1, %v5032_v47  ;;  %v5742_v23 = vld [vmem:[#allocation7 + $0x44] sm:$0xf]  ;;  %v5818_v47 = vld [vmem:[#allocation7 + $0x29c] sm:$0xf0]  ;;  %v5136_v4 = vld [vmem:[#allocation7 + $0x168] sm:$0xf0] }
 0x1d9   :  { %v6548_v6 = vpop.f32.mrf.mxu2  ;;  %v5003_v1 = vor.u32 %v5742_v23, %v5000_v57  ;;  %v5254_v57 = vld [vmem:[#allocation7 + $0x240] sm:$0xf] }
 0x1da   :  { %v6550_v9 = vpop.f32.mrf.mxu3  ;;  %3499 = vmatpush.bf16.msra.mxu2 %v5035_v29  ;;  %v5814_v29 = vld [vmem:[#allocation7 + $0x284] sm:$0xf] }
 0x1db   :  { %v6552_v49 = vpop.f32.mrf.mxu0  ;;  %v6585_v55 = vadd.f32 %v6550_v9, %v6548_v6  ;;  %v6603_v9 = vld [vmem:[%s7052_s8] sm:$0x3]  ;;  %3460 = vmatpush.bf16.msra.mxu0 %v5063_v28  ;;  %v6617_v28 = vperm.slane %v6594_v32, 0 }
 0x1dc   :  { %v6554_v37 = vpop.f32.mrf.mxu1 }
 0x1dd   :  { %v6589_v36 = vadd.f32 %v6554_v37, %v6552_v49  ;;  %v5351_v49 = vor.u32 %v5834_v52, %v5350_v17  ;;  %v5830_v37 = vld [vmem:[#allocation7 + $0x304] sm:$0xf]  ;;  %v2548_v30 = vrot.slane %v6585_v55, 1  ;;  %v6628_v52 = vld [vmem:[%s7053_s9] sm:$0x3] }
 0x1de   :  { %v5355_v0 = vor.u32 %v5830_v37, %v5352_v42  ;;  %v4998_v37 = vld [vmem:[#allocation7 + $0x40] sm:$0xf]  ;;  %3500 = vmatpush.bf16.msra.mxu2 %v5003_v1 }
 0x1df   :  { %v2549_v8 = vrot.slane %v6589_v36, 1  ;;  %3478 = vmatpush.bf16.msra.mxu1 %v5351_v49  ;;  %3461 = vmatpush.bf16.msra.mxu0 %v5031_v39  ;;  %v5323_v49 = vor.u32 %v5822_v18, %v5320_v62  ;;  %v5746_v42 = vld [vmem:[#allocation7 + $0x5c] sm:$0xf0]  ;;  %v5288_v18 = vld [vmem:[#allocation7 + $0x2a0] sm:$0xf0]  ;;  %v2239_v62 = vadd.f32 %v6534_v15, %v6532_v5  ;;  %v2206_v15 = vadd.f32 %v6540_v35, %v6538_v11 }
 0x1e0   :  { %3516 = vmatpush.bf16.msra.mxu3 %v5355_v0  ;;  %v4999_v60 = vor.u32 %v5746_v42, %v4998_v37  ;;  %v5286_v39 = vld [vmem:[#allocation7 + $0x280] sm:$0xf]  ;;  %v4968_v5 = vld [vmem:[#allocation7 + $0x20] sm:$0xf0] }
 0x1e1   :  { %v6556_v27 = vpop.f32.mrf.mxu2  ;;  %v4966_v37 = vld [vmem:[#allocation7] sm:$0xf] }
 0x1e2   :  { %v6558_v22 = vpop.f32.mrf.mxu3  ;;  %v5738_v42 = vld [vmem:[#allocation7 + $0x1c] sm:$0xf0] }
 0x1e3   :  { %v6560_v43 = vpop.f32.mrf.mxu0  ;;  %v6598_v6 = vadd.f32 %v6558_v22, %v6556_v27  ;;  %3462 = vmatpush.bf16.msra.mxu0 %v4999_v60  ;;  %v2244_v60 = vadd.f32 %v6546_v41, %v6544_v3  ;;  %v5810_v1 = vld [vmem:[#allocation7 + $0x25c] sm:$0xf0] }
 0x1e4   :  { %v6562_v45 = vpop.f32.mrf.mxu1  ;;  %3517 = vmatpush.bf16.msra.mxu3 %v5323_v49  ;;  %v5291_v49 = vor.u32 %v5814_v29, %v5288_v18  ;;  %v5255_v41 = vor.u32 %v5810_v1, %v5254_v57  ;;  %v5256_v29 = vld [vmem:[#allocation7 + $0x260] sm:$0xf0]  ;;  %v2559_v18 = vsel %vm765_vm2, %v2547_v31, %v2549_v8  ;;  %v5222_v1 = vld [vmem:[#allocation7 + $0x200] sm:$0xf] }
 0x1e5   :  { %v6609_v27 = vadd.f32 %v6562_v45, %v6560_v43  ;;  %v2550_v54 = vrot.slane %v6598_v6, 1  ;;  %v6620_v43 = vperm.slane %v6603_v9, 0  ;;  %v5319_v45 = vor.u32 %v5826_v63, %v5318_v12 }
 0x1e7   :  { %v2551_v0 = vrot.slane %v6609_v27, 1  ;;  %3479 = vmatpush.bf16.msra.mxu1 %v5319_v45  ;;  %v6646_v45 = vadd.f32 %v6468_v59, %v2201_v14  ;;  %v6658_v59 = vsel %vm117_vm7, 1.0, %v7068_v38  ;;  %v4967_v14 = vor.u32 %v5738_v42, %v4966_v37  ;;  %v5198_v42 = vld [vmem:[#allocation7 + $0x1c8] sm:$0xf] }
 0x1e8   :  { %3518 = vmatpush.bf16.msra.mxu3 %v5291_v49 }
 0x1e9   :  { %v6564_v44 = vpop.f32.mrf.mxu2  ;;  %3463 = vmatpush.bf16.msra.mxu0 %v4967_v14  ;;  %v5200_v14 = vld [vmem:[#allocation7 + $0x1e8] sm:$0xf0] }
 0x1ea   :  { %v6566_v53 = vpop.f32.mrf.mxu3 }
 0x1eb   :  { %v6568_v21 = vpop.f32.mrf.mxu0  ;;  %v6633_v26 = vadd.f32 %v6566_v53, %v6564_v44  ;;  %v6643_v44 = vperm.slane %v6628_v52, 0  ;;  %v5287_v53 = vor.u32 %v5818_v47, %v5286_v39  ;;  %v5806_v39 = vld [vmem:[#allocation7 + $0x244] sm:$0xf] }
 0x1ec   :  { %v6570_v24 = vpop.f32.mrf.mxu1  ;;  %v5259_v37 = vor.u32 %v5806_v39, %v5256_v29  ;;  %v5802_v39 = vld [vmem:[#allocation7 + $0x21c] sm:$0xf0]  ;;  %v5798_v29 = vld [vmem:[#allocation7 + $0x204] sm:$0xf] }
 0x1ed   :  { %v6638_v12 = vadd.f32 %v6570_v24, %v6568_v21  ;;  %v5734_v21 = vld [vmem:[#allocation7 + $0x4] sm:$0xf]  ;;  %v2552_v24 = vrot.slane %v6633_v26, 1  ;;  %3480 = vmatpush.bf16.msra.mxu1 %v5287_v53  ;;  %v6675_v53 = vadd.f32 %v6487_v20, %v2239_v62  ;;  %v5795_v20 = vld [vmem:[#allocation7 + $0x1e4] sm:$0xf0] }
 0x1ee   :  { %v4971_v23 = vor.u32 %v5734_v21, %v4968_v5  ;;  %v5791_v62 = vld [vmem:[#allocation7 + $0x1cc] sm:$0xf]  ;;  %v6697_v5 = vadd.f32 %v6510_v7, %v2206_v15  ;;  %3519 = vmatpush.bf16.msra.mxu3 %v5259_v37  ;;  %v5223_v15 = vor.u32 %v5802_v39, %v5222_v1 }
 0x1ef   :  { %v2553_v47 = vrot.slane %v6638_v12, 1  ;;  %v5203_v57 = vor.u32 %v5791_v62, %v5200_v14  ;;  %v5783_v37 = vld [vmem:[#allocation7 + $0x18c] sm:$0xf]  ;;  %v5859_v14 = vld [vmem:[#allocation7 + $0x3e4] sm:$0xf0] }
 0x1f0   :  { %3501 = vmatpush.bf16.msra.mxu2 %v4971_v23 }
 0x1f1   :  { %v6574_v46 = vpop.f32.mrf.mxu2  ;;  %3481 = vmatpush.bf16.msra.mxu1 %v5255_v41 }
 0x1f2   :  { %v6576_v40 = vpop.f32.mrf.mxu3 }
 0x1f3   :  { %v6578_v13 = vpop.f32.mrf.mxu0 }
 0x1f4   :  { %v6580_v51 = vpop.f32.mrf.mxu1  ;;  %3570 = vmatpush.bf16.msrb.mxu2 %v5203_v57 }
 0x1f5   :  { %3482 = vmatpush.bf16.msra.mxu1 %v5223_v15  ;;  %v2561_v15 = vsel %vm765_vm2, %v2553_v47, %v2547_v31 }
 0x1f9   :  { %v6611_v22 = vpop.f32.mrf.mxu2 }
 0x1fa   :  { %v6613_v56 = vpop.f32.mrf.mxu3 }
 0x1fb   :  { %v2333_v19 = vpop.f32.mrf.mxu0  ;;  %v6692_v21 = vadd.f32 %v6613_v56, %v6611_v22 }
 0x1fc   :  { %v2352_v17 = vpop.f32.mrf.mxu1 }
 0x1fd   :  { %v6640_v63 = vadd.f32 %v2352_v17, %v2333_v19  ;;  %v6653_v19 = vadd.f32 %v6580_v51, %v6578_v13  ;;  %v2557_v13 = vsel %vm765_vm2, %v2549_v8, %v2551_v0 }
 0x1fe   :  { %v2565_v23 = vmul.f32 %v6244_v16, %v2557_v13 }
 0x1ff   :  { %v2581_v11 = vrot.slane %v6640_v63, 2  ;;  %v2560_v63 = vsel %vm765_vm2, %v2548_v30, %v2550_v54  ;;  %v2579_v36 = vrot.slane %v6653_v19, 2 }
 0x200   :  { %v2572_v13 = vadd.f32 %v2560_v63, %v6530_v33  ;;  %v2573_v63 = vadd.f32 %v2565_v23, %v6646_v45  ;;  %v5855_v23 = vld [vmem:[#allocation7 + $0x3cc] sm:$0xf] }
 0x201   :  { %v2371_v17 = vpop.f32.mrf.mxu2  ;;  %v2592_v22 = vsel %vm2587_vm6, %v2579_v36, %v2581_v11 }
 0x202   :  { %v2390_v51 = vpop.f32.mrf.mxu3 }
 0x203   :  { %v6672_v35 = vadd.f32 %v2390_v51, %v2371_v17  ;;  %v2336_v3 = vpop.f32.mrf.mxu0  ;;  %v5199_v17 = vor.u32 %v5795_v20, %v5198_v42  ;;  %v6700_v51 = vadd.f32 %v6524_v10, %v2244_v60  ;;  %v5224_v10 = vld [vmem:[#allocation7 + $0x220] sm:$0xf0]  ;;  %v2571_v60 = vadd.f32 %v2559_v18, %v6516_v58 }
 0x204   :  { %v2355_v49 = vpop.f32.mrf.mxu1  ;;  %v5227_v41 = vor.u32 %v5798_v29, %v5224_v10  ;;  %v6719_v42 = vadd.f32 %v6576_v40, %v6574_v46  ;;  %v2580_v58 = vrot.slane %v6692_v21, 2  ;;  %v5454_v40 = vld [vmem:[#allocation7 + $0x3c8] sm:$0xf]  ;;  %v5456_v29 = vld [vmem:[#allocation7 + $0x3e8] sm:$0xf0] }
 0x205   :  { %v6694_v8 = vadd.f32 %v2355_v49, %v2336_v3  ;;  %v2582_v56 = vrot.slane %v6672_v35, 2  ;;  %3532 = vmatpush.bf16.msrb.mxu0 %v5199_v17  ;;  %v2558_v3 = vsel %vm765_vm2, %v2550_v54, %v2552_v24  ;;  %v5166_v49 = vld [vmem:[#allocation7 + $0x188] sm:$0xf]  ;;  %v5168_v54 = vld [vmem:[#allocation7 + $0x1a8] sm:$0xf0]  ;;  %v2604_v20 = vadd.f32 %v2592_v22, %v2571_v60 }
 0x206   :  { %v5787_v35 = vld [vmem:[#allocation7 + $0x1a4] sm:$0xf0]  ;;  %3520 = vmatpush.bf16.msra.mxu3 %v5227_v41  ;;  %v5171_v46 = vor.u32 %v5783_v37, %v5168_v54  ;;  %v5455_v45 = vor.u32 %v5859_v14, %v5454_v40  ;;  %v2566_v22 = vmul.f32 %v6244_v16, %v2558_v3  ;;  %v2554_v37 = vrot.slane %v6719_v42, 1  ;;  %v5424_v14 = vld [vmem:[#allocation7 + $0x3a8] sm:$0xf0] }
 0x207   :  { %v2583_v7 = vrot.slane %v6694_v8, 2  ;;  %v5167_v18 = vor.u32 %v5787_v35, %v5166_v49  ;;  %v2593_v57 = vsel %vm2587_vm6, %v2580_v58, %v2582_v56  ;;  %v5134_v41 = vld [vmem:[#allocation7 + $0x148] sm:$0xf]  ;;  %v5775_v35 = vld [vmem:[#allocation7 + $0x14c] sm:$0xf]  ;;  %v2555_v42 = vsel %vm765_vm2, %v2551_v0, %v2553_v47 }
 0x208   :  { %3571 = vmatpush.bf16.msrb.mxu2 %v5171_v46  ;;  %v5779_v49 = vld [vmem:[#allocation7 + $0x164] sm:$0xf0]  ;;  %3551 = vmatpush.bf16.msrb.mxu1 %v5455_v45  ;;  %v2605_v54 = vadd.f32 %v2593_v57, %v2572_v13  ;;  %v5847_v46 = vld [vmem:[#allocation7 + $0x38c] sm:$0xf]  ;;  %v6759_v13 = vperm.slane %v6603_v9, 1  ;;  %v2569_v57 = vmul.f32 %v6244_v16, %v2561_v15  ;;  %v2574_v47 = vadd.f32 %v2566_v22, %v6675_v53 }
 0x209   :  { %v2590_v33 = vsel %vm2587_vm6, %v2581_v11, %v2583_v7  ;;  %v2374_v6 = vpop.f32.mrf.mxu2  ;;  %v6733_v11 = vperm.slane %v6594_v32, 1  ;;  %3533 = vmatpush.bf16.msrb.mxu0 %v5167_v18  ;;  %v5459_v32 = vor.u32 %v5855_v23, %v5456_v29  ;;  %v5135_v3 = vor.u32 %v5779_v49, %v5134_v41  ;;  %v5102_v45 = vld [vmem:[#allocation7 + $0x108] sm:$0xf]  ;;  %v5767_v15 = vld [vmem:[#allocation7 + $0x10c] sm:$0xf] }
 0x20a   :  { %v2598_v62 = vmul.f32 %v6658_v59, %v2590_v33  ;;  %v2393_v17 = vpop.f32.mrf.mxu3  ;;  %v2618_v18 = vadd.f32 %v6617_v28, %v2604_v20  ;;  %v5427_v27 = vor.u32 %v5847_v46, %v5424_v14  ;;  %v5771_v0 = vld [vmem:[#allocation7 + $0x124] sm:$0xf0]  ;;  %v2562_v9 = vsel %vm765_vm2, %v2554_v37, %v2548_v30  ;;  %v5839_v49 = vld [vmem:[#allocation7 + $0x34c] sm:$0xf] }
 0x20b   :  { %v6735_v1 = vadd.f32 %v2393_v17, %v2374_v6  ;;  %v2338_v39 = vpop.f32.mrf.mxu0  ;;  %3589 = vmatpush.bf16.msrb.mxu3 %v5459_v32  ;;  %v5851_v17 = vld [vmem:[#allocation7 + $0x3a4] sm:$0xf0]  ;;  %v6769_v23 = vperm.slane %v6628_v52, 1  ;;  %v5103_v29 = vor.u32 %v5771_v0, %v5102_v45  ;;  %v2619_v32 = vadd.f32 %v6733_v11, %v2605_v54 }
 0x20c   :  { %v2606_v10 = vadd.f32 %v2598_v62, %v2573_v63  ;;  %v2357_v60 = vpop.f32.mrf.mxu1  ;;  %v5139_v63 = vor.u32 %v5775_v35, %v5136_v4  ;;  %v5422_v62 = vld [vmem:[#allocation7 + $0x388] sm:$0xf]  ;;  %v2632_v53 = vmul.f32 %v6620_v43, %v2618_v18  ;;  %v2556_v18 = vsel %vm765_vm2, %v2552_v24, %v2554_v37  ;;  %v5759_v37 = vld [vmem:[#allocation7 + $0xcc] sm:$0xf] }
 0x20d   :  { %v2584_v33 = vrot.slane %v6735_v1, 2  ;;  %v2358_v6 = vadd.f32 %v2357_v60, %v2338_v39  ;;  %3534 = vmatpush.bf16.msrb.mxu0 %v5135_v3  ;;  %v5423_v40 = vor.u32 %v5851_v17, %v5422_v62  ;;  %v2575_v60 = vadd.f32 %v2555_v42, %v6536_v25  ;;  %v5390_v22 = vld [vmem:[#allocation7 + $0x348] sm:$0xf]  ;;  %v2662_v17 = vld [vmem:[%s7054_s10] sm:$0x3] }
 0x20e   :  { %v2620_v31 = vadd.f32 %v6617_v28, %v2606_v10  ;;  %3572 = vmatpush.bf16.msrb.mxu2 %v5139_v63  ;;  %v5104_v10 = vld [vmem:[#allocation7 + $0x128] sm:$0xf0]  ;;  %v5843_v30 = vld [vmem:[#allocation7 + $0x364] sm:$0xf0]  ;;  %v2577_v25 = vadd.f32 %v2569_v57, %v6697_v5  ;;  %v2570_v54 = vmul.f32 %v6244_v16, %v2562_v9  ;;  %v6805_v0 = vperm.slane %v2662_v17, 0 }
 0x20f   :  { %v2591_v20 = vsel %vm2587_vm6, %v2582_v56, %v2584_v33  ;;  %v2585_v39 = vrot.slane %v2358_v6, 2  ;;  %3552 = vmatpush.bf16.msrb.mxu1 %v5423_v40  ;;  %3590 = vmatpush.bf16.msrb.mxu3 %v5427_v27  ;;  %v5107_v3 = vor.u32 %v5767_v15, %v5104_v10  ;;  %v5391_v4 = vor.u32 %v5843_v30, %v5390_v22  ;;  %v5392_v63 = vld [vmem:[#allocation7 + $0x368] sm:$0xf0]  ;;  %v5070_v46 = vld [vmem:[#allocation7 + $0xc8] sm:$0xf] }
 0x210   :  { %v2599_v12 = vmul.f32 %v6658_v59, %v2591_v20  ;;  %v2634_v55 = vmul.f32 %v6620_v43, %v2620_v31  ;;  %v5763_v42 = vld [vmem:[#allocation7 + $0xe4] sm:$0xf0]  ;;  %v5395_v5 = vor.u32 %v5839_v49, %v5392_v63  ;;  %v5072_v20 = vld [vmem:[#allocation7 + $0xe8] sm:$0xf0]  ;;  %v2633_v40 = vmul.f32 %v6759_v13, %v2619_v32 }
 0x211   :  { %v2376_v56 = vpop.f32.mrf.mxu2  ;;  %3535 = vmatpush.bf16.msrb.mxu0 %v5103_v29  ;;  %v2594_v31 = vsel %vm2587_vm6, %v2585_v39, %v2579_v36  ;;  %v2588_v26 = vsel %vm2587_vm6, %v2583_v7, %v2585_v39  ;;  %v5071_v19 = vor.u32 %v5763_v42, %v5070_v46  ;;  %v6793_v36 = vadd.f32 %v6643_v44, %v2632_v53  ;;  %v5358_v8 = vld [vmem:[#allocation7 + $0x308] sm:$0xf]  ;;  %v5831_v27 = vld [vmem:[#allocation7 + $0x30c] sm:$0xf] }
 0x212   :  { %v2395_v41 = vpop.f32.mrf.mxu3  ;;  %v2607_v35 = vadd.f32 %v2599_v12, %v2574_v47  ;;  %3573 = vmatpush.bf16.msrb.mxu2 %v5107_v3  ;;  %v6797_v14 = vadd.f32 %v6643_v44, %v2634_v55  ;;  %v5075_v57 = vor.u32 %v5759_v37, %v5072_v20  ;;  %v5835_v12 = vld [vmem:[#allocation7 + $0x324] sm:$0xf0]  ;;  %v2602_v39 = vmul.f32 %v6658_v59, %v2594_v31  ;;  %v5360_v47 = vld [vmem:[#allocation7 + $0x328] sm:$0xf0] }
 0x213   :  { %v2396_v52 = vadd.f32 %v2395_v41, %v2376_v56  ;;  %v2407_v6 = vpop.f32.mrf.mxu0  ;;  %3553 = vmatpush.bf16.msrb.mxu1 %v5391_v4  ;;  %3591 = vmatpush.bf16.msrb.mxu3 %v5395_v5  ;;  %v2576_v9 = vadd.f32 %v2556_v18, %v6542_v61  ;;  %v2578_v56 = vadd.f32 %v2570_v54, %v6700_v51  ;;  %v5038_v10 = vld [vmem:[#allocation7 + $0x88] sm:$0xf]  ;;  %v6810_v21 = vperm.slane %v2662_v17, 1  ;;  %v5751_v22 = vld [vmem:[#allocation7 + $0x8c] sm:$0xf] }
 0x214   :  { %v2426_v62 = vpop.f32.mrf.mxu1  ;;  %v2621_v7 = vadd.f32 %v6733_v11, %v2607_v35  ;;  %v2608_v29 = vadd.f32 %v2588_v26, %v2575_v60  ;;  %v5755_v32 = vld [vmem:[#allocation7 + $0xa4] sm:$0xf0]  ;;  %v5363_v55 = vor.u32 %v5831_v27, %v5360_v47  ;;  %v5040_v30 = vld [vmem:[#allocation7 + $0xa8] sm:$0xf0]  ;;  %v2654_v51 = vmax.f32 %v6793_v36, 0.0 }
 0x215   :  { %v2586_v24 = vrot.slane %v2396_v52, 2  ;;  %3536 = vmatpush.bf16.msrb.mxu0 %v5071_v19  ;;  %v2427_v15 = vadd.f32 %v2426_v62, %v2407_v6  ;;  %v6818_v49 = vadd.f32 %v6769_v23, %v2633_v40  ;;  %v2656_v35 = vmax.f32 %v6797_v14, 0.0  ;;  %v5326_v52 = vld [vmem:[#allocation7 + $0x2c8] sm:$0xf]  ;;  %v5823_v18 = vld [vmem:[#allocation7 + $0x2cc] sm:$0xf] }
 0x216   :  { %3574 = vmatpush.bf16.msrb.mxu2 %v5075_v57  ;;  %v5827_v6 = vld [vmem:[#allocation7 + $0x2e4] sm:$0xf0]  ;;  %v2610_v3 = vadd.f32 %v2602_v39, %v2577_v25  ;;  %v2635_v63 = vmul.f32 %v6759_v13, %v2621_v7  ;;  %v5039_v1 = vor.u32 %v5755_v32, %v5038_v10  ;;  %v5328_v54 = vld [vmem:[#allocation7 + $0x2e8] sm:$0xf0]  ;;  %v2622_v31 = vadd.f32 %v6617_v28, %v2608_v29 }
 0x217   :  { %v2595_v45 = vsel %vm2587_vm6, %v2586_v24, %v2580_v58  ;;  %v5359_v58 = vor.u32 %v5835_v12, %v5358_v8  ;;  %v2589_v61 = vsel %vm2587_vm6, %v2584_v33, %v2586_v24  ;;  %3592 = vmatpush.bf16.msrb.mxu3 %v5363_v55  ;;  %v5006_v33 = vld [vmem:[#allocation7 + $0x48] sm:$0xf]  ;;  %v2668_v62 = vadd.f32 %v6805_v0, %v2427_v15  ;;  %v5743_v24 = vld [vmem:[#allocation7 + $0x4c] sm:$0xf] }
 0x218   :  { %v2603_v41 = vmul.f32 %v6658_v59, %v2595_v45  ;;  %v5043_v46 = vor.u32 %v5751_v22, %v5040_v30  ;;  %v5327_v42 = vor.u32 %v5827_v6, %v5326_v52  ;;  %v5747_v26 = vld [vmem:[#allocation7 + $0x64] sm:$0xf0]  ;;  %v5008_v5 = vld [vmem:[#allocation7 + $0x68] sm:$0xf0]  ;;  %v2609_v25 = vadd.f32 %v2589_v61, %v2576_v9 }
 0x219   :  { %v2445_v53 = vpop.f32.mrf.mxu2  ;;  %3554 = vmatpush.bf16.msrb.mxu1 %v5359_v58  ;;  %3537 = vmatpush.bf16.msrb.mxu0 %v5039_v1  ;;  %v5331_v20 = vor.u32 %v5823_v18, %v5328_v54  ;;  %v5294_v36 = vld [vmem:[#allocation7 + $0x288] sm:$0xf]  ;;  %v5007_v57 = vor.u32 %v5747_v26, %v5006_v33  ;;  %v5011_v8 = vor.u32 %v5743_v24, %v5008_v5  ;;  %v5815_v12 = vld [vmem:[#allocation7 + $0x28c] sm:$0xf]  ;;  %v2655_v10 = vmax.f32 %v6818_v49, 0.0 }
 0x21a   :  { %v2464_v60 = vpop.f32.mrf.mxu3  ;;  %v2611_v19 = vadd.f32 %v2603_v41, %v2578_v56  ;;  %v5819_v40 = vld [vmem:[#allocation7 + $0x2a4] sm:$0xf0]  ;;  %3575 = vmatpush.bf16.msrb.mxu2 %v5043_v46  ;;  %v5296_v27 = vld [vmem:[#allocation7 + $0x2a8] sm:$0xf0]  ;;  %v2649_v45 = vadd.f32 %v6769_v23, %v2635_v63  ;;  %v2624_v15 = vadd.f32 %v6617_v28, %v2610_v3  ;;  %v2636_v32 = vmul.f32 %v6620_v43, %v2622_v31  ;;  %v5796_v31 = vld [vmem:[#allocation7 + $0x1ec] sm:$0xf0] }
 0x21b   :  { %v2409_v4 = vpop.f32.mrf.mxu0  ;;  %v2465_v14 = vadd.f32 %v2464_v60, %v2445_v53  ;;  %v4974_v7 = vld [vmem:[#allocation7 + $0x8] sm:$0xf]  ;;  %3593 = vmatpush.bf16.msrb.mxu3 %v5331_v20  ;;  %v5295_v47 = vor.u32 %v5819_v40, %v5294_v36  ;;  %v5735_v56 = vld [vmem:[#allocation7 + $0xc] sm:$0xf]  ;;  %v5299_v41 = vor.u32 %v5815_v12, %v5296_v27  ;;  %v2623_v55 = vadd.f32 %v6733_v11, %v2609_v25  ;;  %v5208_v26 = vld [vmem:[#allocation7 + $0x1f0] sm:$0xf0] }
 0x21c   :  { %v2428_v17 = vpop.f32.mrf.mxu1  ;;  %v5739_v9 = vld [vmem:[#allocation7 + $0x24] sm:$0xf0]  ;;  %v4976_v29 = vld [vmem:[#allocation7 + $0x28] sm:$0xf0]  ;;  %v2625_v22 = vadd.f32 %v6733_v11, %v2611_v19  ;;  %v2676_v30 = vadd.f32 %v2668_v62, %v2654_v51  ;;  %v2657_v54 = vmax.f32 %v2649_v45, 0.0  ;;  %v6836_v46 = vadd.f32 %v6643_v44, %v2636_v32 }
 0x21d   :  { %v2429_v37 = vadd.f32 %v2428_v17, %v2409_v4  ;;  %3555 = vmatpush.bf16.msrb.mxu1 %v5327_v42  ;;  %v5262_v53 = vld [vmem:[#allocation7 + $0x248] sm:$0xf]  ;;  %3538 = vmatpush.bf16.msrb.mxu0 %v5007_v57  ;;  %v5807_v52 = vld [vmem:[#allocation7 + $0x24c] sm:$0xf]  ;;  %v2669_v4 = vadd.f32 %v6810_v21, %v2465_v14  ;;  %v4975_v49 = vor.u32 %v5739_v9, %v4974_v7  ;;  %v5792_v62 = vld [vmem:[#allocation7 + $0x1d4] sm:$0xf] }
 0x21e   :  { %v5811_v58 = vld [vmem:[#allocation7 + $0x264] sm:$0xf0]  ;;  %v5264_v6 = vld [vmem:[#allocation7 + $0x268] sm:$0xf0]  ;;  %3576 = vmatpush.bf16.msrb.mxu2 %v5011_v8  ;;  %v4979_v3 = vor.u32 %v5735_v56, %v4976_v29  ;;  %v2637_v25 = vmul.f32 %v6759_v13, %v2623_v55  ;;  %v2638_v19 = vmul.f32 %v6620_v43, %v2624_v15  ;;  %v5174_v40 = vld [vmem:[#allocation7 + $0x190] sm:$0xf]  ;;  %v2639_v8 = vmul.f32 %v6759_v13, %v2625_v22 }
 0x21f   :  { %v2670_v39 = vadd.f32 %v6805_v0, %v2429_v37  ;;  %v5263_v63 = vor.u32 %v5811_v58, %v5262_v53  ;;  %3594 = vmatpush.bf16.msrb.mxu3 %v5299_v41  ;;  %v5267_v11 = vor.u32 %v5807_v52, %v5264_v6  ;;  %v5230_v24 = vld [vmem:[#allocation7 + $0x208] sm:$0xf]  ;;  %v5211_v37 = vor.u32 %v5792_v62, %v5208_v26  ;;  %v5799_v20 = vld [vmem:[#allocation7 + $0x20c] sm:$0xf]  ;;  %v5788_v12 = vld [vmem:[#allocation7 + $0x1ac] sm:$0xf0] }
 0x220   :  { %v5803_v5 = vld [vmem:[#allocation7 + $0x224] sm:$0xf0]  ;;  %v5232_v36 = vld [vmem:[#allocation7 + $0x228] sm:$0xf0]  ;;  %v2677_v14 = vadd.f32 %v2669_v4, %v2655_v10  ;;  %v5784_v27 = vld [vmem:[#allocation7 + $0x194] sm:$0xf]  ;;  %v5175_v29 = vor.u32 %v5788_v12, %v5174_v40  ;;  %v2652_v13 = vadd.f32 %v6643_v44, %v2638_v19  ;;  %v6848_v58 = vadd.f32 %v6769_v23, %v2637_v25 }
 0x221   :  { %v2678_v61 = vadd.f32 %v2670_v39, %v2656_v35  ;;  %v2447_v60 = vpop.f32.mrf.mxu2  ;;  %3556 = vmatpush.bf16.msrb.mxu1 %v5295_v47  ;;  %v5206_v35 = vld [vmem:[#allocation7 + $0x1d0] sm:$0xf]  ;;  %3539 = vmatpush.bf16.msrb.mxu0 %v4975_v49  ;;  %v5176_v7 = vld [vmem:[#allocation7 + $0x1b0] sm:$0xf0]  ;;  %v5231_v45 = vor.u32 %v5803_v5, %v5230_v24  ;;  %v5235_v43 = vor.u32 %v5799_v20, %v5232_v36  ;;  %v2658_v9 = vmax.f32 %v6836_v46, 0.0 }
 0x222   :  { %v2466_v28 = vpop.f32.mrf.mxu3  ;;  %v5207_v42 = vor.u32 %v5796_v31, %v5206_v35  ;;  %3577 = vmatpush.bf16.msrb.mxu2 %v4979_v3  ;;  %v5179_v15 = vor.u32 %v5784_v27, %v5176_v7  ;;  %v5462_v32 = vld [vmem:[#allocation7 + $0x3d0] sm:$0xf]  ;;  %v5856_v53 = vld [vmem:[#allocation7 + $0x3d4] sm:$0xf]  ;;  %v6854_v44 = vadd.f32 %v6769_v23, %v2639_v8  ;;  %v2660_v31 = vmax.f32 %v2652_v13, 0.0 }
 0x223   :  { %v6832_v1 = vpack.c.bf16 %v2678_v61, %v2676_v30  ;;  %v2467_v18 = vadd.f32 %v2466_v28, %v2447_v60  ;;  %v2412_v33 = vpop.f32.mrf.mxu0  ;;  %3595 = vmatpush.bf16.msrb.mxu3 %v5267_v11  ;;  %v5860_v41 = vld [vmem:[#allocation7 + $0x3ec] sm:$0xf0]  ;;  %v5464_v30 = vld [vmem:[#allocation7 + $0x3f0] sm:$0xf0]  ;;  %v2659_v36 = vmax.f32 %v6848_v58, 0.0 }
 0x224   :  { %v2431_v51 = vpop.f32.mrf.mxu1  ;;  %v5463_v22 = vor.u32 %v5860_v41, %v5462_v32  ;;  %v5142_v61 = vld [vmem:[#allocation7 + $0x150] sm:$0xf]  ;;  %v5467_v4 = vor.u32 %v5856_v53, %v5464_v30  ;;  %v5776_v28 = vld [vmem:[#allocation7 + $0x154] sm:$0xf]  ;;  %v2661_v12 = vmax.f32 %v6854_v44, 0.0 }
 0x225   :  { %v2671_v17 = vadd.f32 %v6810_v21, %v2467_v18  ;;  %3464 = vmatmul.bf16.vlgmr.msra.gmra.mxu0 %v6832_v1  ;;  %3502 = vmatmul.bf16.vlgmr.msra.gmra.mxu2 %v6832_v1  ;;  %v2432_v39 = vadd.f32 %v2431_v51, %v2412_v33  ;;  %v5780_v60 = vld [vmem:[#allocation7 + $0x16c] sm:$0xf0]  ;;  %v5144_v49 = vld [vmem:[#allocation7 + $0x170] sm:$0xf0] }
 0x226   :  { %3557 = vmatpush.bf16.msrb.mxu1 %v5263_v63  ;;  %3608 = vmatpush.bf16.msra.mxu0 %v5207_v42  ;;  %v5430_v3 = vld [vmem:[#allocation7 + $0x390] sm:$0xf]  ;;  %v5143_v18 = vor.u32 %v5780_v60, %v5142_v61  ;;  %v5848_v11 = vld [vmem:[#allocation7 + $0x394] sm:$0xf] }
 0x227   :  { %v2679_v57 = vadd.f32 %v2671_v17, %v2657_v54  ;;  %3646 = vmatpush.bf16.msra.mxu2 %v5211_v37  ;;  %v2672_v52 = vadd.f32 %v6805_v0, %v2432_v39  ;;  %3596 = vmatpush.bf16.msrb.mxu3 %v5235_v43  ;;  %v5147_v54 = vor.u32 %v5776_v28, %v5144_v49  ;;  %v5852_v33 = vld [vmem:[#allocation7 + $0x3ac] sm:$0xf0]  ;;  %v5432_v51 = vld [vmem:[#allocation7 + $0x3b0] sm:$0xf0] }
 0x228   :  { %v5431_v23 = vor.u32 %v5852_v33, %v5430_v3  ;;  %v5435_v62 = vor.u32 %v5848_v11, %v5432_v51  ;;  %v5110_v17 = vld [vmem:[#allocation7 + $0x110] sm:$0xf]  ;;  %v5768_v26 = vld [vmem:[#allocation7 + $0x114] sm:$0xf] }
 0x229   :  { %v6843_v47 = vpack.c.bf16 %v2679_v57, %v2677_v14  ;;  %v2450_v56 = vpop.f32.mrf.mxu2  ;;  %v5772_v46 = vld [vmem:[#allocation7 + $0x12c] sm:$0xf0]  ;;  %v5112_v24 = vld [vmem:[#allocation7 + $0x130] sm:$0xf0]  ;;  %v2680_v20 = vadd.f32 %v2672_v52, %v2658_v9 }
 0x22a   :  { %v2469_v10 = vpop.f32.mrf.mxu3  ;;  %3558 = vmatpush.bf16.msrb.mxu1 %v5231_v45  ;;  %3609 = vmatpush.bf16.msra.mxu0 %v5175_v29  ;;  %v5398_v5 = vld [vmem:[#allocation7 + $0x350] sm:$0xf]  ;;  %v5840_v19 = vld [vmem:[#allocation7 + $0x354] sm:$0xf]  ;;  %v5115_v27 = vor.u32 %v5768_v26, %v5112_v24 }
 0x22b   :  { %3483 = vmatmul.bf16.vlgmr.msra.gmra.mxu1 %v6843_v47  ;;  %3521 = vmatmul.bf16.vlgmr.msra.gmra.mxu3 %v6843_v47  ;;  %v2414_v55 = vpop.f32.mrf.mxu0  ;;  %v2470_v35 = vadd.f32 %v2469_v10, %v2450_v56  ;;  %v5844_v25 = vld [vmem:[#allocation7 + $0x36c] sm:$0xf0]  ;;  %v5400_v37 = vld [vmem:[#allocation7 + $0x370] sm:$0xf0] }
 0x22c   :  { %v2433_v6 = vpop.f32.mrf.mxu1  ;;  %3647 = vmatpush.bf16.msra.mxu2 %v5179_v15  ;;  %3665 = vmatpush.bf16.msra.mxu3 %v5467_v4  ;;  %v5399_v45 = vor.u32 %v5844_v25, %v5398_v5  ;;  %v5403_v43 = vor.u32 %v5840_v19, %v5400_v37  ;;  %v5078_v9 = vld [vmem:[#allocation7 + $0xd0] sm:$0xf]  ;;  %v5760_v29 = vld [vmem:[#allocation7 + $0xd4] sm:$0xf] }
 0x22d   :  { %v2434_v63 = vadd.f32 %v2433_v6, %v2414_v55  ;;  %v2673_v57 = vadd.f32 %v6810_v21, %v2470_v35  ;;  %v5764_v56 = vld [vmem:[#allocation7 + $0xec] sm:$0xf0]  ;;  %v5080_v10 = vld [vmem:[#allocation7 + $0xf0] sm:$0xf0] }
 0x22e   :  { %3627 = vmatpush.bf16.msra.mxu1 %v5463_v22  ;;  %3610 = vmatpush.bf16.msra.mxu0 %v5143_v18  ;;  %v5366_v13 = vld [vmem:[#allocation7 + $0x310] sm:$0xf]  ;;  %v5079_v41 = vor.u32 %v5764_v56, %v5078_v9  ;;  %v5083_v53 = vor.u32 %v5760_v29, %v5080_v10  ;;  %v5832_v58 = vld [vmem:[#allocation7 + $0x314] sm:$0xf]  ;;  %v5793_v9 = vld [vmem:[#allocation7 + $0x1dc] sm:$0xf] }
 0x22f   :  { %v2674_v42 = vadd.f32 %v6805_v0, %v2434_v63  ;;  %v5111_v0 = vor.u32 %v5772_v46, %v5110_v17  ;;  %v5836_v32 = vld [vmem:[#allocation7 + $0x32c] sm:$0xf0]  ;;  %v5368_v55 = vld [vmem:[#allocation7 + $0x330] sm:$0xf0]  ;;  %v2681_v30 = vadd.f32 %v2673_v57, %v2659_v36  ;;  %v5216_v29 = vld [vmem:[#allocation7 + $0x1f8] sm:$0xf0] }
 0x230   :  { %3648 = vmatpush.bf16.msra.mxu2 %v5147_v54  ;;  %3666 = vmatpush.bf16.msra.mxu3 %v5435_v62  ;;  %v5046_v22 = vld [vmem:[#allocation7 + $0x90] sm:$0xf]  ;;  %v5048_v52 = vld [vmem:[#allocation7 + $0xb0] sm:$0xf0]  ;;  %v5367_v6 = vor.u32 %v5836_v32, %v5366_v13  ;;  %v5371_v44 = vor.u32 %v5832_v58, %v5368_v55  ;;  %v5219_v13 = vor.u32 %v5793_v9, %v5216_v29  ;;  %v5789_v58 = vld [vmem:[#allocation7 + $0x1b4] sm:$0xf0] }
 0x231   :  { %v2682_v40 = vadd.f32 %v2674_v42, %v2660_v31  ;;  %v2452_v14 = vpop.f32.mrf.mxu2  ;;  %v5756_v60 = vld [vmem:[#allocation7 + $0xac] sm:$0xf0]  ;;  %v5824_v18 = vld [vmem:[#allocation7 + $0x2d4] sm:$0xf]  ;;  %v5785_v55 = vld [vmem:[#allocation7 + $0x19c] sm:$0xf] }
 0x232   :  { %v2471_v8 = vpop.f32.mrf.mxu3  ;;  %3628 = vmatpush.bf16.msra.mxu1 %v5431_v23  ;;  %3611 = vmatpush.bf16.msra.mxu0 %v5111_v0  ;;  %v5047_v28 = vor.u32 %v5756_v60, %v5046_v22  ;;  %v5334_v3 = vld [vmem:[#allocation7 + $0x2d0] sm:$0xf]  ;;  %v5336_v54 = vld [vmem:[#allocation7 + $0x2f0] sm:$0xf0]  ;;  %v5184_v22 = vld [vmem:[#allocation7 + $0x1b8] sm:$0xf0] }
 0x233   :  { %v6860_v7 = vpack.c.bf16 %v2682_v40, %v2680_v20  ;;  %v2472_v39 = vadd.f32 %v2471_v8, %v2452_v14  ;;  %v5828_v63 = vld [vmem:[#allocation7 + $0x2ec] sm:$0xf0]  ;;  %v5339_v35 = vor.u32 %v5824_v18, %v5336_v54  ;;  %v5744_v31 = vld [vmem:[#allocation7 + $0x54] sm:$0xf]  ;;  %v5777_v54 = vld [vmem:[#allocation7 + $0x15c] sm:$0xf] }
 0x234   :  { %3649 = vmatpush.bf16.msra.mxu2 %v5115_v27  ;;  %3667 = vmatpush.bf16.msra.mxu3 %v5403_v43  ;;  %v5014_v33 = vld [vmem:[#allocation7 + $0x50] sm:$0xf]  ;;  %v5335_v51 = vor.u32 %v5828_v63, %v5334_v3  ;;  %v5016_v23 = vld [vmem:[#allocation7 + $0x70] sm:$0xf0]  ;;  %v5797_v43 = vld [vmem:[#allocation7 + $0x1f4] sm:$0xf0] }
 0x235   :  { %v2675_v15 = vadd.f32 %v6810_v21, %v2472_v39  ;;  %3469 = vmatmul.bf16.gmra.mxu0 %v6860_v7  ;;  %3507 = vmatmul.bf16.gmra.mxu2 %v6860_v7  ;;  %v5752_v21 = vld [vmem:[#allocation7 + $0x94] sm:$0xf]  ;;  %v5748_v11 = vld [vmem:[#allocation7 + $0x6c] sm:$0xf0]  ;;  %v5019_v24 = vor.u32 %v5744_v31, %v5016_v23  ;;  %v5150_v3 = vld [vmem:[#allocation7 + $0x158] sm:$0xf] }
 0x236   :  { %3629 = vmatpush.bf16.msra.mxu1 %v5399_v45  ;;  %3612 = vmatpush.bf16.msra.mxu0 %v5079_v41  ;;  %v5051_v49 = vor.u32 %v5752_v21, %v5048_v52  ;;  %v5302_v62 = vld [vmem:[#allocation7 + $0x290] sm:$0xf]  ;;  %v5816_v46 = vld [vmem:[#allocation7 + $0x294] sm:$0xf]  ;;  %v5015_v26 = vor.u32 %v5748_v11, %v5014_v33  ;;  %v5214_v45 = vld [vmem:[#allocation7 + $0x1d8] sm:$0xf]  ;;  %v5187_v21 = vor.u32 %v5785_v55, %v5184_v22 }
 0x237   :  { %v2683_v61 = vadd.f32 %v2675_v15, %v2661_v12  ;;  %v5820_v17 = vld [vmem:[#allocation7 + $0x2ac] sm:$0xf0]  ;;  %v5304_v42 = vld [vmem:[#allocation7 + $0x2b0] sm:$0xf0]  ;;  %v5215_v56 = vor.u32 %v5797_v43, %v5214_v45  ;;  %v5470_v52 = vld [vmem:[#allocation7 + $0x3d8] sm:$0xf] }
 0x238   :  { %3650 = vmatpush.bf16.msra.mxu2 %v5083_v53  ;;  %3668 = vmatpush.bf16.msra.mxu3 %v5371_v44  ;;  %v4982_v5 = vld [vmem:[#allocation7 + $0x10] sm:$0xf]  ;;  %v5736_v19 = vld [vmem:[#allocation7 + $0x14] sm:$0xf]  ;;  %v5303_v20 = vor.u32 %v5820_v17, %v5302_v62  ;;  %v5307_v36 = vor.u32 %v5816_v46, %v5304_v42  ;;  %v5182_v53 = vld [vmem:[#allocation7 + $0x198] sm:$0xf] }
 0x239   :  { %v6865_v4 = vpack.c.bf16 %v2683_v61, %v2681_v30  ;;  %v5740_v25 = vld [vmem:[#allocation7 + $0x2c] sm:$0xf0]  ;;  %v4984_v37 = vld [vmem:[#allocation7 + $0x30] sm:$0xf0]  ;;  %v5183_v60 = vor.u32 %v5789_v58, %v5182_v53  ;;  %v5857_v44 = vld [vmem:[#allocation7 + $0x3dc] sm:$0xf] }
 0x23a   :  { %3630 = vmatpush.bf16.msra.mxu1 %v5367_v6  ;;  %3613 = vmatpush.bf16.msra.mxu0 %v5047_v28  ;;  %v5270_v40 = vld [vmem:[#allocation7 + $0x250] sm:$0xf]  ;;  %v5808_v57 = vld [vmem:[#allocation7 + $0x254] sm:$0xf]  ;;  %v4983_v12 = vor.u32 %v5740_v25, %v4982_v5  ;;  %v4987_v0 = vor.u32 %v5736_v19, %v4984_v37  ;;  %v5861_v6 = vld [vmem:[#allocation7 + $0x3f4] sm:$0xf0] }
 0x23b   :  { %3488 = vmatmul.bf16.gmra.mxu1 %v6865_v4  ;;  %3526 = vmatmul.bf16.gmra.mxu3 %v6865_v4  ;;  %v5812_v14 = vld [vmem:[#allocation7 + $0x26c] sm:$0xf0]  ;;  %v5272_v8 = vld [vmem:[#allocation7 + $0x270] sm:$0xf0]  ;;  %v5471_v28 = vor.u32 %v5861_v6, %v5470_v52  ;;  %v5781_v63 = vld [vmem:[#allocation7 + $0x174] sm:$0xf0] }
 0x23c   :  { %3651 = vmatpush.bf16.msra.mxu2 %v5051_v49  ;;  %3669 = vmatpush.bf16.msra.mxu3 %v5339_v35  ;;  %v5271_v27 = vor.u32 %v5812_v14, %v5270_v40  ;;  %v5275_v39 = vor.u32 %v5808_v57, %v5272_v8  ;;  %v5238_v15 = vld [vmem:[#allocation7 + $0x210] sm:$0xf]  ;;  %v5800_v32 = vld [vmem:[#allocation7 + $0x214] sm:$0xf]  ;;  %v5472_v49 = vld [vmem:[#allocation7 + $0x3f8] sm:$0xf0] }
 0x23d   :  { %v5804_v10 = vld [vmem:[#allocation7 + $0x22c] sm:$0xf0]  ;;  %v5240_v41 = vld [vmem:[#allocation7 + $0x230] sm:$0xf0]  ;;  %v5475_v18 = vor.u32 %v5857_v44, %v5472_v49  ;;  %v5152_v33 = vld [vmem:[#allocation7 + $0x178] sm:$0xf0] }
 0x23e   :  { %3631 = vmatpush.bf16.msra.mxu1 %v5335_v51  ;;  %3614 = vmatpush.bf16.msra.mxu0 %v5015_v26  ;;  %v5239_v30 = vor.u32 %v5804_v10, %v5238_v15  ;;  %v5243_v61 = vor.u32 %v5800_v32, %v5240_v41  ;;  %v5438_v11 = vld [vmem:[#allocation7 + $0x398] sm:$0xf]  ;;  %v5151_v51 = vor.u32 %v5781_v63, %v5150_v3  ;;  %v5849_v23 = vld [vmem:[#allocation7 + $0x39c] sm:$0xf] }
 0x23f   :  { %v5155_v35 = vor.u32 %v5777_v54, %v5152_v33  ;;  %v5853_v31 = vld [vmem:[#allocation7 + $0x3b4] sm:$0xf0]  ;;  %v5440_v62 = vld [vmem:[#allocation7 + $0x3b8] sm:$0xf0] }
 0x240   :  { %3652 = vmatpush.bf16.msra.mxu2 %v5019_v24  ;;  %3670 = vmatpush.bf16.msra.mxu3 %v5307_v36  ;;  %v5439_v17 = vor.u32 %v5853_v31, %v5438_v11  ;;  %v5443_v46 = vor.u32 %v5849_v23, %v5440_v62  ;;  %v5118_v42 = vld [vmem:[#allocation7 + $0x118] sm:$0xf]  ;;  %v5769_v24 = vld [vmem:[#allocation7 + $0x11c] sm:$0xf] }
 0x241   :  { %v5773_v26 = vld [vmem:[#allocation7 + $0x134] sm:$0xf0]  ;;  %v5120_v5 = vld [vmem:[#allocation7 + $0x138] sm:$0xf0] }
 0x242   :  { %3632 = vmatpush.bf16.msra.mxu1 %v5303_v20  ;;  %3615 = vmatpush.bf16.msra.mxu0 %v4983_v12  ;;  %v5406_v25 = vld [vmem:[#allocation7 + $0x358] sm:$0xf]  ;;  %v5841_v37 = vld [vmem:[#allocation7 + $0x35c] sm:$0xf]  ;;  %v5119_v36 = vor.u32 %v5773_v26, %v5118_v42  ;;  %v5123_v40 = vor.u32 %v5769_v24, %v5120_v5 }
 0x243   :  { %v5845_v19 = vld [vmem:[#allocation7 + $0x374] sm:$0xf0]  ;;  %v5408_v20 = vld [vmem:[#allocation7 + $0x378] sm:$0xf0] }
 0x244   :  { %3653 = vmatpush.bf16.msra.mxu2 %v4987_v0  ;;  %3671 = vmatpush.bf16.msra.mxu3 %v5275_v39  ;;  %v5407_v14 = vor.u32 %v5845_v19, %v5406_v25  ;;  %v5411_v57 = vor.u32 %v5841_v37, %v5408_v20  ;;  %v5086_v8 = vld [vmem:[#allocation7 + $0xd8] sm:$0xf]  ;;  %v5761_v0 = vld [vmem:[#allocation7 + $0xdc] sm:$0xf] }
 0x245   :  { %3540 = vmatmul.bf16.vlgmr.msrb.gmra.mxu0 %v6832_v1  ;;  %3578 = vmatmul.bf16.vlgmr.msrb.gmra.mxu2 %v6832_v1  ;;  %v5765_v12 = vld [vmem:[#allocation7 + $0xf4] sm:$0xf0]  ;;  %v5376_v29 = vld [vmem:[#allocation7 + $0x338] sm:$0xf0] }
 0x246   :  { %3684 = vmatpush.bf16.msrb.mxu0 %v5215_v56  ;;  %3633 = vmatpush.bf16.msra.mxu1 %v5271_v27  ;;  %v5088_v27 = vld [vmem:[#allocation7 + $0xf8] sm:$0xf0]  ;;  %v5374_v39 = vld [vmem:[#allocation7 + $0x318] sm:$0xf]  ;;  %v5087_v43 = vor.u32 %v5765_v12, %v5086_v8 }
 0x247   :  { %v5837_v45 = vld [vmem:[#allocation7 + $0x334] sm:$0xf0]  ;;  %v5091_v9 = vor.u32 %v5761_v0, %v5088_v27  ;;  %v5833_v56 = vld [vmem:[#allocation7 + $0x31c] sm:$0xf] }
 0x248   :  { %3722 = vmatpush.bf16.msrb.mxu2 %v5219_v13  ;;  %3672 = vmatpush.bf16.msra.mxu3 %v5243_v61  ;;  %v5054_v15 = vld [vmem:[#allocation7 + $0x98] sm:$0xf]  ;;  %v5753_v13 = vld [vmem:[#allocation7 + $0x9c] sm:$0xf]  ;;  %v5375_v41 = vor.u32 %v5837_v45, %v5374_v39  ;;  %v5379_v53 = vor.u32 %v5833_v56, %v5376_v29 }
 0x249   :  { %v5757_v10 = vld [vmem:[#allocation7 + $0xb4] sm:$0xf0]  ;;  %v5056_v32 = vld [vmem:[#allocation7 + $0xb8] sm:$0xf0] }
 0x24a   :  { %3634 = vmatpush.bf16.msra.mxu1 %v5239_v30  ;;  %3685 = vmatpush.bf16.msrb.mxu0 %v5183_v60  ;;  %v5055_v58 = vor.u32 %v5757_v10, %v5054_v15  ;;  %v5059_v55 = vor.u32 %v5753_v13, %v5056_v32  ;;  %v5342_v22 = vld [vmem:[#allocation7 + $0x2d8] sm:$0xf]  ;;  %v5825_v61 = vld [vmem:[#allocation7 + $0x2dc] sm:$0xf] }
 0x24b   :  { %3559 = vmatmul.bf16.vlgmr.msrb.gmra.mxu1 %v6843_v47  ;;  %3597 = vmatmul.bf16.vlgmr.msrb.gmra.mxu3 %v6843_v47  ;;  %v5829_v30 = vld [vmem:[#allocation7 + $0x2f4] sm:$0xf0]  ;;  %v5344_v60 = vld [vmem:[#allocation7 + $0x2f8] sm:$0xf0] }
 0x24c   :  { %3723 = vmatpush.bf16.msrb.mxu2 %v5187_v21  ;;  %3741 = vmatpush.bf16.msrb.mxu3 %v5475_v18  ;;  %v5022_v21 = vld [vmem:[#allocation7 + $0x58] sm:$0xf]  ;;  %v5343_v6 = vor.u32 %v5829_v30, %v5342_v22  ;;  %v5347_v44 = vor.u32 %v5825_v61, %v5344_v60  ;;  %v5024_v49 = vld [vmem:[#allocation7 + $0x78] sm:$0xf0] }
 0x24d   :  { %v5749_v52 = vld [vmem:[#allocation7 + $0x74] sm:$0xf0]  ;;  %v5817_v18 = vld [vmem:[#allocation7 + $0x29c] sm:$0xf] }
 0x24e   :  { %3703 = vmatpush.bf16.msrb.mxu1 %v5471_v28  ;;  %3686 = vmatpush.bf16.msrb.mxu0 %v5151_v51  ;;  %v5745_v28 = vld [vmem:[#allocation7 + $0x5c] sm:$0xf]  ;;  %v5310_v3 = vld [vmem:[#allocation7 + $0x298] sm:$0xf]  ;;  %v5023_v33 = vor.u32 %v5749_v52, %v5022_v21 }
 0x24f   :  { %v5821_v63 = vld [vmem:[#allocation7 + $0x2b4] sm:$0xf0]  ;;  %v5312_v54 = vld [vmem:[#allocation7 + $0x2b8] sm:$0xf0]  ;;  %v5027_v11 = vor.u32 %v5745_v28, %v5024_v49  ;;  %v3931_v49 = vsel %vm154_vm9, 1.0, %v7068_v38 }
 0x250   :  { %3724 = vmatpush.bf16.msrb.mxu2 %v5155_v35  ;;  %3742 = vmatpush.bf16.msrb.mxu3 %v5443_v46  ;;  %v4990_v51 = vld [vmem:[#allocation7 + $0x18] sm:$0xf]  ;;  %v5737_v31 = vld [vmem:[#allocation7 + $0x1c] sm:$0xf]  ;;  %v5311_v62 = vor.u32 %v5821_v63, %v5310_v3 }
 0x251   :  { %v5741_v35 = vld [vmem:[#allocation7 + $0x34] sm:$0xf0]  ;;  %v4992_v23 = vld [vmem:[#allocation7 + $0x38] sm:$0xf0] }
 0x252   :  { %3704 = vmatpush.bf16.msrb.mxu1 %v5439_v17  ;;  %3687 = vmatpush.bf16.msrb.mxu0 %v5119_v36  ;;  %v5315_v17 = vor.u32 %v5817_v18, %v5312_v54  ;;  %v5278_v46 = vld [vmem:[#allocation7 + $0x258] sm:$0xf]  ;;  %v5809_v26 = vld [vmem:[#allocation7 + $0x25c] sm:$0xf]  ;;  %v4991_v5 = vor.u32 %v5741_v35, %v4990_v51  ;;  %v4995_v25 = vor.u32 %v5737_v31, %v4992_v23 }
 0x253   :  { %v5813_v42 = vld [vmem:[#allocation7 + $0x274] sm:$0xf0]  ;;  %v5280_v24 = vld [vmem:[#allocation7 + $0x278] sm:$0xf0] }
 0x254   :  { %3725 = vmatpush.bf16.msrb.mxu2 %v5123_v40  ;;  %3743 = vmatpush.bf16.msrb.mxu3 %v5411_v57  ;;  %v5279_v19 = vor.u32 %v5813_v42, %v5278_v46  ;;  %v5283_v37 = vor.u32 %v5809_v26, %v5280_v24  ;;  %v5246_v20 = vld [vmem:[#allocation7 + $0x218] sm:$0xf]  ;;  %v5801_v40 = vld [vmem:[#allocation7 + $0x21c] sm:$0xf] }
 0x255   :  { %3545 = vmatmul.bf16.gmra.mxu0 %v6860_v7  ;;  %3583 = vmatmul.bf16.gmra.mxu2 %v6860_v7  ;;  %v5805_v36 = vld [vmem:[#allocation7 + $0x234] sm:$0xf0] }
 0x256   :  { %3705 = vmatpush.bf16.msrb.mxu1 %v5407_v14  ;;  %3688 = vmatpush.bf16.msrb.mxu0 %v5087_v43  ;;  %v5248_v14 = vld [vmem:[#allocation7 + $0x238] sm:$0xf0]  ;;  %v5247_v57 = vor.u32 %v5805_v36, %v5246_v20 }
 0x257   :  { %v5251_v8 = vor.u32 %v5801_v40, %v5248_v14 }
 0x258   :  { %3726 = vmatpush.bf16.msrb.mxu2 %v5091_v9  ;;  %3744 = vmatpush.bf16.msrb.mxu3 %v5379_v53 }
 0x25a   :  { %3706 = vmatpush.bf16.msrb.mxu1 %v5375_v41  ;;  %3689 = vmatpush.bf16.msrb.mxu0 %v5055_v58 }
 0x25b   :  { %3564 = vmatmul.bf16.gmra.mxu1 %v6865_v4  ;;  %3602 = vmatmul.bf16.gmra.mxu3 %v6865_v4 }
 0x25c   :  { %3727 = vmatpush.bf16.msrb.mxu2 %v5059_v55  ;;  %3745 = vmatpush.bf16.msrb.mxu3 %v5347_v44 }
 0x25e   :  { %3707 = vmatpush.bf16.msrb.mxu1 %v5343_v6  ;;  %3690 = vmatpush.bf16.msrb.mxu0 %v5023_v33 }
 0x260   :  { %3728 = vmatpush.bf16.msrb.mxu2 %v5027_v11  ;;  %3746 = vmatpush.bf16.msrb.mxu3 %v5315_v17 }
 0x262   :  { %3708 = vmatpush.bf16.msrb.mxu1 %v5311_v62  ;;  %3691 = vmatpush.bf16.msrb.mxu0 %v4991_v5 }
 0x264   :  { %3729 = vmatpush.bf16.msrb.mxu2 %v4995_v25  ;;  %3747 = vmatpush.bf16.msrb.mxu3 %v5283_v37 }
 0x265   :  { %3616 = vmatmul.bf16.vlgmr.msra.gmra.mxu0 %v6832_v1  ;;  %3654 = vmatmul.bf16.vlgmr.msra.gmra.mxu2 %v6832_v1 }
 0x266   :  { %3709 = vmatpush.bf16.msrb.mxu1 %v5279_v19 }
 0x268   :  { %3748 = vmatpush.bf16.msrb.mxu3 %v5251_v8 }
 0x26a   :  { %3710 = vmatpush.bf16.msrb.mxu1 %v5247_v57 }
 0x26b   :  { %3635 = vmatmul.bf16.vlgmr.msra.gmra.mxu1 %v6843_v47  ;;  %3673 = vmatmul.bf16.vlgmr.msra.gmra.mxu3 %v6843_v47 }
 0x275   :  { %3621 = vmatmul.bf16.gmra.mxu0 %v6860_v7  ;;  %3659 = vmatmul.bf16.gmra.mxu2 %v6860_v7 }
 0x27b   :  { %3640 = vmatmul.bf16.gmra.mxu1 %v6865_v4  ;;  %3678 = vmatmul.bf16.gmra.mxu3 %v6865_v4 }
 0x285   :  { %3692 = vmatmul.bf16.vlgmr.msrb.gmra.mxu0 %v6832_v1  ;;  %3730 = vmatmul.bf16.vlgmr.msrb.gmra.mxu2 %v6832_v1 }
 0x28b   :  { %3711 = vmatmul.bf16.vlgmr.msrb.gmra.mxu1 %v6843_v47  ;;  %3749 = vmatmul.bf16.vlgmr.msrb.gmra.mxu3 %v6843_v47 }
 0x295   :  { %3697 = vmatmul.bf16.gmra.mxu0 %v6860_v7  ;;  %3735 = vmatmul.bf16.gmra.mxu2 %v6860_v7 }
 0x29b   :  { %3716 = vmatmul.bf16.gmra.mxu1 %v6865_v4  ;;  %3754 = vmatmul.bf16.gmra.mxu3 %v6865_v4 }
 0x2a2   :  { %v3465_v12 = vpop.f32.mrf.mxu0 }
 0x2a8   :  { %v3484_v0 = vpop.f32.mrf.mxu1  ;;  %v3503_v27 = vpop.f32.mrf.mxu2 }
 0x2a9   :  { %v3485_v39 = vadd.f32 %v3484_v0, %v3465_v12 }
 0x2aa   :  { %v3467_v45 = vpop.f32.mrf.mxu0 }
 0x2ab   :  { %v3760_v15 = vrot.slane %v3485_v39, 5 }
 0x2ae   :  { %v3522_v43 = vpop.f32.mrf.mxu3 }
 0x2af   :  { %v3523_v9 = vadd.f32 %v3522_v43, %v3503_v27 }
 0x2b0   :  { %v3486_v1 = vpop.f32.mrf.mxu1  ;;  %v3505_v56 = vpop.f32.mrf.mxu2 }
 0x2b1   :  { %v3487_v29 = vadd.f32 %v3486_v1, %v3467_v45  ;;  %v3777_v53 = vrot.slane %v3523_v9, 6 }
 0x2b2   :  { %v3470_v47 = vpop.f32.mrf.mxu0 }
 0x2b3   :  { %v3761_v10 = vrot.slane %v3487_v29, 5 }
 0x2b5   :  { %v3767_v7 = vsel %vm3764_vm8, %v3760_v15, %v3761_v10 }
 0x2b6   :  { %v3524_v13 = vpop.f32.mrf.mxu3 }
 0x2b7   :  { %v3525_v4 = vadd.f32 %v3524_v13, %v3505_v56 }
 0x2b8   :  { %v3489_v32 = vpop.f32.mrf.mxu1  ;;  %v3508_v41 = vpop.f32.mrf.mxu2 }
 0x2b9   :  { %v3778_v58 = vrot.slane %v3525_v4, 6  ;;  %v3490_v55 = vadd.f32 %v3489_v32, %v3470_v47 }
 0x2ba   :  { %v3472_v22 = vpop.f32.mrf.mxu0 }
 0x2bb   :  { %v3783_v30 = vsel %vm2482_vm4, %v3777_v53, %v3778_v58  ;;  %v3762_v61 = vrot.slane %v3490_v55, 5 }
 0x2bc   :  { %v3790_v60 = vadd.f32 %v3783_v30, %v3767_v7 }
 0x2bd   :  { %v3766_v21 = vsel %vm3764_vm8, %v3761_v10, %v3762_v61 }
 0x2be   :  { %v3527_v52 = vpop.f32.mrf.mxu3  ;;  %v3771_v11 = vmul.f32 %v3931_v49, %v3766_v21 }
 0x2bf   :  { %v3528_v6 = vadd.f32 %v3527_v52, %v3508_v41 }
 0x2c0   :  { %v3491_v44 = vpop.f32.mrf.mxu1  ;;  %v3510_v28 = vpop.f32.mrf.mxu2 }
 0x2c1   :  { %v3779_v3 = vrot.slane %v3528_v6, 6  ;;  %v3492_v63 = vadd.f32 %v3491_v44, %v3472_v22 }
 0x2c2   :  { %v3541_v18 = vpop.f32.mrf.mxu0 }
 0x2c3   :  { %v3782_v54 = vsel %vm2482_vm4, %v3778_v58, %v3779_v3  ;;  %v3763_v33 = vrot.slane %v3492_v63, 5 }
 0x2c4   :  { %v3787_v51 = vmul.f32 %v6477_v48, %v3782_v54 }
 0x2c5   :  { %v3765_v35 = vsel %vm3764_vm8, %v3762_v61, %v3763_v33  ;;  %v3768_v31 = vsel %vm3764_vm8, %v3763_v33, %v3760_v15 }
 0x2c6   :  { %v3529_v23 = vpop.f32.mrf.mxu3  ;;  %v3791_v62 = vadd.f32 %v3787_v51, %v3771_v11  ;;  %v3769_v19 = vmul.f32 %v3931_v49, %v3768_v31 }
 0x2c7   :  { %v3530_v17 = vadd.f32 %v3529_v23, %v3510_v28 }
 0x2c8   :  { %v3560_v46 = vpop.f32.mrf.mxu1  ;;  %v6909_v42 = vpop.f32.mrf.mxu2 }
 0x2c9   :  { %v3780_v26 = vrot.slane %v3530_v17, 6  ;;  %v3561_v14 = vadd.f32 %v3560_v46, %v3541_v18 }
 0x2ca   :  { %v3543_v24 = vpop.f32.mrf.mxu0 }
 0x2cb   :  { %v3781_v5 = vsel %vm2482_vm4, %v3779_v3, %v3780_v26  ;;  %v3784_v25 = vsel %vm2482_vm4, %v3780_v26, %v3777_v53  ;;  %v3793_v27 = vrot.slane %v3561_v14, 7 }
 0x2cc   :  { %v3785_v37 = vmul.f32 %v6477_v48, %v3784_v25  ;;  %v6916_v20 = vadd.f32 %v3781_v5, %v3765_v35 }
 0x2ce   :  { %v3789_v36 = vadd.f32 %v3785_v37, %v3769_v19  ;;  %v3598_v40 = vpop.f32.mrf.mxu3 }
 0x2d0   :  { %v3562_v57 = vpop.f32.mrf.mxu1  ;;  %v6918_v8 = vpop.f32.mrf.mxu2 }
 0x2d1   :  { %v3563_v12 = vadd.f32 %v3562_v57, %v3543_v24  ;;  %v3599_v57 = vadd.f32 %v3598_v40, %v6909_v42 }
 0x2d2   :  { %v3546_v0 = vpop.f32.mrf.mxu0 }
 0x2d3   :  { %v3794_v39 = vrot.slane %v3563_v12, 7 }
 0x2d5   :  { %v3799_v45 = vsel %vm724_vm1, %v3793_v27, %v3794_v39 }
 0x2d6   :  { %v6922_v43 = vpop.f32.mrf.mxu3  ;;  %v6924_v9 = vadd.f32 %v3799_v45, %v3790_v60 }
 0x2d8   :  { %v3565_v48 = vpop.f32.mrf.mxu1  ;;  %v6926_v1 = vpop.f32.mrf.mxu2 }
 0x2d9   :  { %v6928_v56 = vadd.f32 %v3565_v48, %v3546_v0 }
 0x2da   :  { %v3548_v29 = vpop.f32.mrf.mxu0 }
 0x2db   :  { %v3795_v47 = vrot.slane %v6928_v56, 7 }
 0x2dd   :  { %v3798_v15 = vsel %vm724_vm1, %v3794_v39, %v3795_v47 }
 0x2de   :  { %v6935_v10 = vpop.f32.mrf.mxu3  ;;  %v3803_v7 = vmul.f32 %v6134_v2, %v3798_v15 }
 0x2df   :  { %v3604_v56 = vadd.f32 %v6935_v10, %v6926_v1 }
 0x2e0   :  { %v6938_v13 = vadd.f32 %v3803_v7, %v3791_v62  ;;  %v3567_v4 = vpop.f32.mrf.mxu1  ;;  %v6940_v32 = vpop.f32.mrf.mxu2 }
 0x2e1   :  { %v3568_v49 = vadd.f32 %v3567_v4, %v3548_v29 }
 0x2e2   :  { %v3617_v41 = vpop.f32.mrf.mxu0 }
 0x2e3   :  { %v3796_v18 = vrot.slane %v3568_v49, 7 }
 0x2e5   :  { %v3800_v11 = vsel %vm724_vm1, %v3796_v18, %v3793_v27 }
 0x2e6   :  { %v6942_v53 = vpop.f32.mrf.mxu3  ;;  %v3801_v31 = vmul.f32 %v6134_v2, %v3800_v11 }
 0x2e8   :  { %v3636_v58 = vpop.f32.mrf.mxu1  ;;  %v3655_v55 = vpop.f32.mrf.mxu2  ;;  %v3805_v24 = vadd.f32 %v3801_v31, %v3789_v36 }
 0x2e9   :  { %v3637_v62 = vadd.f32 %v3636_v58, %v3617_v41  ;;  %v6965_v58 = vld [vmem:[%s7056_s12] ss:$0 sm:$0xff] }
 0x2ea   :  { %v3619_v22 = vpop.f32.mrf.mxu0  ;;  %v3809_v45 = vadd.f32 %v3805_v24, %v3599_v57 }
 0x2eb   :  { %v3813_v25 = vrot.slane %v3637_v62, 1 }
 0x2ee   :  { %v3674_v30 = vpop.f32.mrf.mxu3 }
 0x2ef   :  { %v6947_v46 = vadd.f32 %v3674_v30, %v3655_v55  ;;  %v3601_v55 = vadd.f32 %v6922_v43, %v6918_v8 }
 0x2f0   :  { %v3638_v61 = vpop.f32.mrf.mxu1  ;;  %v3657_v60 = vpop.f32.mrf.mxu2 }
 0x2f1   :  { %v3639_v35 = vadd.f32 %v3638_v61, %v3619_v22  ;;  %v3829_v0 = vrot.slane %v6947_v46, 2 }
 0x2f2   :  { %v3622_v21 = vpop.f32.mrf.mxu0 }
 0x2f3   :  { %v3814_v26 = vrot.slane %v3639_v35, 1 }
 0x2f5   :  { %v3819_v2 = vsel %vm765_vm2, %v3813_v25, %v3814_v26 }
 0x2f6   :  { %v3676_v52 = vpop.f32.mrf.mxu3  ;;  %v3825_v7 = vadd.f32 %v3819_v2, %v3809_v45 }
 0x2f7   :  { %v3677_v17 = vadd.f32 %v3676_v52, %v3657_v60 }
 0x2f8   :  { %v3641_v6 = vpop.f32.mrf.mxu1  ;;  %v3660_v44 = vpop.f32.mrf.mxu2 }
 0x2f9   :  { %v3830_v19 = vrot.slane %v3677_v17, 2  ;;  %v3642_v37 = vadd.f32 %v3641_v6, %v3622_v21  ;;  %v6978_v21 = vld [vmem:[%s7057_s13] ss:$0 sm:$0xff] }
 0x2fa   :  { %v3624_v28 = vpop.f32.mrf.mxu0 }
 0x2fb   :  { %v3835_v36 = vsel %vm2587_vm6, %v3829_v0, %v3830_v19  ;;  %v3815_v29 = vrot.slane %v3642_v37, 1 }
 0x2fc   :  { %v3841_v41 = vadd.f32 %v3835_v36, %v3825_v7 }
 0x2fd   :  { %v3818_v22 = vsel %vm765_vm2, %v3814_v26, %v3815_v29 }
 0x2fe   :  { %v3679_v3 = vpop.f32.mrf.mxu3 }
 0x2ff   :  { %v6953_v27 = vadd.f32 %v3679_v3, %v3660_v44  ;;  %v6987_v3 = vld [vmem:[%s7058_s14] ss:$0 sm:$0xff]  ;;  %s5987_s14 = smov [#allocation8]  }
 0x300   :  { %v3643_v63 = vpop.f32.mrf.mxu1  ;;  %v3662_v33 = vpop.f32.mrf.mxu2 }
 0x301   :  { %v3831_v42 = vrot.slane %v6953_v27, 2  ;;  %v3644_v30 = vadd.f32 %v3643_v63, %v3624_v28  ;;  %v3822_v28 = vmul.f32 %v6244_v16, %v3818_v22 }
 0x302   :  { %v3693_v54 = vpop.f32.mrf.mxu0 }
 0x303   :  { %v3834_v8 = vsel %vm2587_vm6, %v3830_v19, %v3831_v42  ;;  %v3816_v11 = vrot.slane %v3644_v30, 1 }
 0x305   :  { %v3820_v24 = vsel %vm765_vm2, %v3816_v11, %v3813_v25  ;;  %v3817_v1 = vsel %vm765_vm2, %v3815_v29, %v3816_v11 }
 0x306   :  { %v3681_v51 = vpop.f32.mrf.mxu3 }
 0x307   :  { %v3682_v43 = vadd.f32 %v3681_v51, %v3662_v33  ;;  %v3797_v33 = vsel %vm724_vm1, %v3795_v47, %v3796_v18  ;;  %v3838_v51 = vmul.f32 %v6658_v59, %v3834_v8  ;;  %v3606_v18 = vadd.f32 %v6942_v53, %v6940_v32 }
 0x308   :  { %v3712_v23 = vpop.f32.mrf.mxu1  ;;  %v3731_v14 = vpop.f32.mrf.mxu2  ;;  %v3808_v26 = vadd.f32 %v3797_v33, %v6916_v20  ;;  %v3811_v20 = vadd.f32 %v6938_v13, %v3604_v56  ;;  %v3824_v53 = vmul.f32 %v6244_v16, %v3820_v24 }
 0x309   :  { %v6955_v39 = vadd.f32 %v3712_v23, %v3693_v54  ;;  %v3810_v54 = vadd.f32 %v6924_v9, %v3601_v55  ;;  %v6999_v23 = vld [vmem:[%s7059_s15] ss:$0 sm:$0xff]  ;;  %v3832_v62 = vrot.slane %v3682_v43, 2  ;;  %v3926_v9 = vsel %vm107_vm11, 1.0, %v7068_v38  ;;  %s3910_s15 = sshll.u32 %s5987_s14, 4  ;;  %s3911_s15 = int_to_ptr.vmem [resolvable:$true] %s3910_s15 }
 0x30a   :  { %v3695_v5 = vpop.f32.mrf.mxu0  ;;  %v3812_v36 = vadd.f32 %v3808_v26, %v3606_v18 }
 0x30b   :  { %v3845_v40 = vrot.slane %v6955_v39, 3  ;;  %v3826_v46 = vadd.f32 %v3822_v28, %v3810_v54  ;;  %v3836_v10 = vsel %vm2587_vm6, %v3832_v62, %v3829_v0  ;;  %v3833_v27 = vsel %vm2587_vm6, %v3831_v42, %v3832_v62 }
 0x30c   :  { %v3840_v29 = vmul.f32 %v6658_v59, %v3836_v10  ;;  %v3828_v13 = vadd.f32 %v3824_v53, %v3812_v36 }
 0x30d   :  { %v3842_v19 = vadd.f32 %v3838_v51, %v3826_v46 }
 0x30e   :  { %v3750_v12 = vpop.f32.mrf.mxu3  ;;  %v3844_v22 = vadd.f32 %v3840_v29, %v3828_v13 }
 0x30f   :  { %v3751_v31 = vadd.f32 %v3750_v12, %v3731_v14 }
 0x310   :  { %v3714_v48 = vpop.f32.mrf.mxu1  ;;  %v3733_v44 = vpop.f32.mrf.mxu2 }
 0x311   :  { %v3715_v15 = vadd.f32 %v3714_v48, %v3695_v5  ;;  %v3894_v38 = vadd.f32 %v6999_v23, %v3751_v31 }
 0x312   :  { %v3698_v52 = vpop.f32.mrf.mxu0 }
 0x313   :  { %v3846_v4 = vrot.slane %v3715_v15, 3  ;;  %v3827_v15 = vadd.f32 %v3817_v1, %v3811_v20 }
 0x315   :  { %v3852_v61 = vsel %vm3849_vm10, %v3845_v40, %v3846_v4 }
 0x316   :  { %v3858_v60 = vadd.f32 %v3852_v61, %v3841_v41  ;;  %v3752_v6 = vpop.f32.mrf.mxu3 }
 0x317   :  { %v3753_v16 = vadd.f32 %v3752_v6, %v3733_v44 }
 0x318   :  { %v3866_v49 = vadd.f32 %v6965_v58, %v3858_v60  ;;  %v3717_v63 = vpop.f32.mrf.mxu1  ;;  %v3736_v45 = vpop.f32.mrf.mxu2 }
 0x319   :  { %v3718_v35 = vadd.f32 %v3717_v63, %v3698_v52  ;;  %v3895_v60 = vadd.f32 %v6999_v23, %v3753_v16 }
 0x31a   :  { %v3874_v34 = vmul.f32 %v6978_v21, %v3866_v49  ;;  %v3700_v12 = vpop.f32.mrf.mxu0 }
 0x31b   :  { %v3847_v17 = vrot.slane %v3718_v35, 3 }
 0x31c   :  { %v3882_v47 = vadd.f32 %v6987_v3, %v3874_v34 }
 0x31d   :  { %v3851_v5 = vsel %vm3849_vm10, %v3846_v4, %v3847_v17  ;;  %v3843_v4 = vadd.f32 %v3833_v27, %v3827_v15 }
 0x31e   :  { %v3886_v37 = vmax.f32 %v3882_v47, 0.0  ;;  %v3855_v14 = vmul.f32 %v3926_v9, %v3851_v5  ;;  %v3755_v32 = vpop.f32.mrf.mxu3 }
 0x31f   :  { %v3756_v28 = vadd.f32 %v3755_v32, %v3736_v45 }
 0x320   :  { %v3898_v25 = vadd.f32 %v3894_v38, %v3886_v37  ;;  %v3859_v57 = vadd.f32 %v3855_v14, %v3842_v19  ;;  %v3719_v2 = vpop.f32.mrf.mxu1  ;;  %v3738_v50 = vpop.f32.mrf.mxu2 }
 0x321   :  { %v3720_v48 = vadd.f32 %v3719_v2, %v3700_v12  ;;  %v3896_v11 = vadd.f32 %v6999_v23, %v3756_v28 }
 0x322   :  { %3902 = vst [vmem:[#allocation8] sm:$0xff] %v3898_v25  ;;  %v3867_v0 = vadd.f32 %v6965_v58, %v3859_v57 }
 0x323   :  { %v3848_v7 = vrot.slane %v3720_v48, 3 }
 0x324   :  { %v3875_v41 = vmul.f32 %v6978_v21, %v3867_v0 }
 0x325   :  { %v3850_v55 = vsel %vm3849_vm10, %v3847_v17, %v3848_v7  ;;  %v3853_v42 = vsel %vm3849_vm10, %v3848_v7, %v3845_v40 }
 0x326   :  { %v3883_v59 = vadd.f32 %v6987_v3, %v3875_v41  ;;  %v3857_v30 = vmul.f32 %v3926_v9, %v3853_v42  ;;  %v3860_v61 = vadd.f32 %v3850_v55, %v3843_v4  ;;  %v3757_v43 = vpop.f32.mrf.mxu3 }
 0x327   :  { %v3758_v63 = vadd.f32 %v3757_v43, %v3738_v50 }
 0x328   :  { %v3887_v52 = vmax.f32 %v3883_v59, 0.0  ;;  %v3861_v8 = vadd.f32 %v3857_v30, %v3844_v22  ;;  %v3868_v6 = vadd.f32 %v6965_v58, %v3860_v61 }
 0x329   :  { %v3897_v31 = vadd.f32 %v6999_v23, %v3758_v63 }
 0x32a   :  { %v3899_v44 = vadd.f32 %v3895_v60, %v3887_v52  ;;  %v3869_v49 = vadd.f32 %v6965_v58, %v3861_v8  ;;  %v3876_v39 = vmul.f32 %v6978_v21, %v3868_v6 }
 0x32c   :  { %3903 = vst [vmem:[#allocation8 + $0x8] sm:$0xff] %v3899_v44  ;;  %v3884_v40 = vadd.f32 %v6987_v3, %v3876_v39  ;;  %v3877_v54 = vmul.f32 %v6978_v21, %v3869_v49 }
 0x32e   :  { %v3888_v35 = vmax.f32 %v3884_v40, 0.0  ;;  %v3885_v33 = vadd.f32 %v6987_v3, %v3877_v54 }
 0x330   :  { %v3900_v58 = vadd.f32 %v3896_v11, %v3888_v35  ;;  %v3889_v51 = vmax.f32 %v3885_v33, 0.0 }
 0x332   :  { %3904 = vst [vmem:[#allocation8 + $0x10] sm:$0xff] %v3900_v58  ;;  %v3901_v34 = vadd.f32 %v3897_v31, %v3889_v51 }
 0x334   :  { %3905 = vst [vmem:[#allocation8 + $0x18] sm:$0xff] %v3901_v34 }
 0x335   :  { %3918 = dma.vmem_to_hbm [thread:$0]  %s3911_s15, 512, %s3913_s25, [#allocation4], %s5988_s26, %s5988_s26, %s5989_s27  }
 0x336   :  { %5977 = dma.done.wait [#allocation4], 512  }
 0x337   :  { %5978 = vsyncadd [#allocation4], 4294966784 }
 0x338   :  { %3923 = vsyncpa [#allocation3], 1 }
 0x339   :  { %3924 = vsyncpa [#allocation6], 1 }
 0x33a   :  { %3925 = vsyncpa [#allocation4], 1 }

</bundles_post_ra>
